<compile_context>
chip_gen: v5e
topology: v5e:2x2
jax: 0.10.0
libtpu: 0.0.40
codegen_flags: <defaults>
</compile_context>

<pallas_src>
import functools

import jax
import jax.numpy as jnp
from jax import lax
from jax.experimental import pallas as pl
from jax.experimental.pallas import tpu as pltpu

H_DIM = 256
HEAD_DIM = 64
HEAD_PAD = 128      # head width padded to one lane tile (cols 64:128 are exact zeros)
K_ALIGN = 16        # state_dim padded to one bf16 sublane tile
VEC_ROWS = 16       # packed per-feature parameter blob rows
BN_EPS = 1e-5
LRELU_SLOPE = 0.01


def _round_up(n, m):
    return ((n + m - 1) // m) * m


def fk_kernel(x_ref, wa_ref, wb_ref, vec_ref, o_ref, xp_ref):
    """Fused FkModel forward; whole batch resident in VMEM.

    x_ref   [B, state_dim] f32          raw input (pad + bf16 cast done in-kernel)
    wa_ref  [k_pad + 2*256, 256] bf16   packed {w1(row-pad), w2, w3}
    wb_ref  [256 + 128, 128]     bf16   packed {w4(col-pad), w5(row+col-pad)}
    vec_ref [16, 256] f32               packed {b1,g1,be1, b2,g2,be2, b3,g3,be3, b4, b5}
    o_ref   [B, 128] f32                lane-dense padded output
    xp_ref  [B, k_pad] f32 scratch      zero-padded input staging buffer
    """
    batch, state_dim = x_ref.shape
    k_pad = xp_ref.shape[1]
    head_pad = wb_ref.shape[1]
    inv_b = jnp.float32(1.0 / batch)
    mxu_dtype = wa_ref.dtype

    dotf = functools.partial(jnp.dot, preferred_element_type=jnp.float32)

    def lrelu(h):
        # max(h, slope*h) == LeakyReLU for 0 < slope < 1 (single vmax, no select).
        return jnp.maximum(h, LRELU_SLOPE * h)

    def bn_lrelu(h, g, be):
        # Training-mode BatchNorm1d (biased full-batch stats) folded into one
        # scale/shift FMA; single pass for sum & sum-of-squares.
        mean = jnp.sum(h, axis=0, keepdims=True) * inv_b
        msq = jnp.sum(h * h, axis=0, keepdims=True) * inv_b
        var = jnp.maximum(msq - mean * mean, 0.0)
        scale = g * lax.rsqrt(var + BN_EPS)
        shift = be - mean * scale
        return lrelu(h * scale + shift)

    # ---- in-kernel zero pad of the input: [B, state_dim] -> [B, k_pad] ----
    xp_ref[...] = jnp.zeros_like(xp_ref)
    xp_ref[:, :state_dim] = x_ref[...]
    x = xp_ref[...].astype(mxu_dtype)

    # ---- static, tile-aligned views into the packed weight blobs ----
    w1 = wa_ref[0:k_pad, :]
    w2 = wa_ref[k_pad:k_pad + H_DIM, :]
    w3 = wa_ref[k_pad + H_DIM:k_pad + 2 * H_DIM, :]
    w4 = wb_ref[0:H_DIM, :]
    w5 = wb_ref[H_DIM:H_DIM + head_pad, :]

    # ---- static rows of the packed per-feature parameter blob ----
    b1, g1, be1 = vec_ref[0:1, :], vec_ref[1:2, :], vec_ref[2:3, :]
    b2, g2, be2 = vec_ref[3:4, :], vec_ref[4:5, :], vec_ref[5:6, :]
    b3, g3, be3 = vec_ref[6:7, :], vec_ref[7:8, :], vec_ref[8:9, :]
    b4 = vec_ref[9:10, :head_pad]
    b5 = vec_ref[10:11, :head_pad]

    h = bn_lrelu(dotf(x, w1) + b1, g1, be1)
    h = bn_lrelu(dotf(h.astype(mxu_dtype), w2) + b2, g2, be2)
    h = bn_lrelu(dotf(h.astype(mxu_dtype), w3) + b3, g3, be3)
    h = lrelu(dotf(h.astype(mxu_dtype), w4) + b4)          # [B, 128], cols 64:128 == 0
    o_ref[...] = (dotf(h.astype(mxu_dtype), w5) + b5).astype(o_ref.dtype)


def init_params(key, state_dim, output_dim):
    """Deterministic synthetic parameters. Linear weights stored [in, out] (PyTorch W^T)."""
    dims = [
        (state_dim, H_DIM),      # layers[0]
        (H_DIM, H_DIM),          # layers[3]
        (H_DIM, H_DIM),          # layers[6]
        (H_DIM, HEAD_DIM),       # head[0]
        (HEAD_DIM, output_dim),  # head[2]
    ]
    params = []
    keys = jax.random.split(key, len(dims) * 2)
    for i, (din, dout) in enumerate(dims):
        bound = 1.0 / jnp.sqrt(din)
        w = jax.random.uniform(keys[2 * i], (din, dout), jnp.float32, -bound, bound)
        b = jax.random.uniform(keys[2 * i + 1], (1, dout), jnp.float32, -bound, bound)
        params.append((w, b))
    # BatchNorm affine params (gamma=1, beta=0) for the three BN layers.
    bn = [(jnp.ones((1, H_DIM), jnp.float32), jnp.zeros((1, H_DIM), jnp.float32))
          for _ in range(3)]
    return params, bn


def prepare_params(params, bn, mxu_dtype=jnp.bfloat16):
    """Pad + cast + PACK weights once (hoisted out of the per-call hot path).

    Returns (wa, wb, vec):
      wa  bf16 [k_pad + 512, 256] : w1 (rows padded with exact zeros), w2, w3
      wb  bf16 [384, 128]         : w4 (cols 64:128 zero), w5 (rows 64:128 & cols out: zero)
      vec f32  [16, 256]          : b1,g1,be1, b2,g2,be2, b3,g3,be3, b4, b5 (one DMA)
    """
    (w1, b1), (w2, b2), (w3, b3), (w4, b4), (w5, b5) = params
    (g1, be1), (g2, be2), (g3, be3) = bn
    state_dim = w1.shape[0]
    output_dim = w5.shape[1]
    k_pad = _round_up(state_dim, K_ALIGN)

    wa = jnp.zeros((k_pad + 2 * H_DIM, H_DIM), jnp.float32)
    wa = wa.at[:state_dim, :].set(w1)
    wa = wa.at[k_pad:k_pad + H_DIM, :].set(w2)
    wa = wa.at[k_pad + H_DIM:, :].set(w3)

    wb = jnp.zeros((H_DIM + HEAD_PAD, HEAD_PAD), jnp.float32)
    wb = wb.at[:H_DIM, :HEAD_DIM].set(w4)
    wb = wb.at[H_DIM:H_DIM + HEAD_DIM, :output_dim].set(w5)

    vec = jnp.zeros((VEC_ROWS, H_DIM), jnp.float32)
    for i, row in enumerate([b1, g1, be1, b2, g2, be2, b3, g3, be3]):
        vec = vec.at[i, :].set(row[0])
    vec = vec.at[9, :HEAD_DIM].set(b4[0])
    vec = vec.at[10, :output_dim].set(b5[0])

    return jax.device_put((wa.astype(mxu_dtype), wb.astype(mxu_dtype), vec))


@functools.partial(jax.jit, static_argnames=("output_dim",))
def fk_model(x, prepared, output_dim):
    """Fused FkModel forward: one pallas_call, raw x in, whole batch resident in VMEM."""
    wa, wb, vec = prepared
    batch, state_dim = x.shape
    k_pad = wa.shape[0] - 2 * H_DIM
    out_pad = wb.shape[1]

    # Scoped-VMEM limit sized to the working set (v5e default is only 16 MiB).
    est = (wa.size * wa.dtype.itemsize + wb.size * wb.dtype.itemsize
           + vec.size * 4
           + batch * state_dim * 4      # x
           + batch * k_pad * 4          # pad scratch
           + batch * out_pad * 4        # output
           + 12 * batch * H_DIM * 4     # live f32 intermediates (generous)
           + (8 << 20))                 # margin
    vmem_limit = int(min(max(est, 32 << 20), 100 << 20))

    y_pad = pl.pallas_call(
        fk_kernel,
        out_shape=jax.ShapeDtypeStruct((batch, out_pad), jnp.float32),
        in_specs=[pl.BlockSpec(memory_space=pltpu.MemorySpace.VMEM)] * 4,
        out_specs=pl.BlockSpec(memory_space=pltpu.MemorySpace.VMEM),
        scratch_shapes=[pltpu.VMEM((batch, k_pad), jnp.float32)],
        compiler_params=pltpu.CompilerParams(vmem_limit_bytes=vmem_limit),
    )(x, wa, wb, vec)
    return y_pad[:, :output_dim]


def fk_model_ref(x, params, bn, mxu_dtype=jnp.float32):
    """Pure-JAX reference mirroring PyTorch training-mode forward.

    With mxu_dtype=jnp.bfloat16 it also mirrors the kernel's mixed-precision
    matmuls (bf16 operands, f32 accumulation)."""
    (w1, b1), (w2, b2), (w3, b3), (w4, b4), (w5, b5) = params
    (g1, be1), (g2, be2), (g3, be3) = bn

    def dot(a, w):
        return jnp.dot(a.astype(mxu_dtype), w.astype(mxu_dtype),
                       preferred_element_type=jnp.float32)

    def bn_lrelu(h, g, be):
        mean = jnp.mean(h, axis=0, keepdims=True)
        var = jnp.mean((h - mean) ** 2, axis=0, keepdims=True)
        hn = (h - mean) * lax.rsqrt(var + BN_EPS) * g + be
        return jnp.where(hn >= 0, hn, LRELU_SLOPE * hn)

    h = bn_lrelu(dot(x, w1) + b1, g1, be1)
    h = bn_lrelu(dot(h, w2) + b2, g2, be2)
    h = bn_lrelu(dot(h, w3) + b3, g3, be3)
    h = dot(h, w4) + b4
    h = jnp.where(h >= 0, h, LRELU_SLOPE * h)
    return dot(h, w5) + b5


if __name__ == "__main__":
    key = jax.random.PRNGKey(0)
    k_x, k_p = jax.random.split(key)

    batch = 256          # fills full MXU row tiles; BN needs a real batch
    state_dim = 11       # fetch_11d joint state
    output_dim = 12      # FK output, small synthetic choice

    x = jax.random.normal(k_x, (batch, state_dim), jnp.float32)
    params, bn = init_params(k_p, state_dim, output_dim)

    # Weight pad / bf16 cast / packing hoisted out of the hot path — done once.
    prepared = prepare_params(params, bn, mxu_dtype=jnp.bfloat16)

    y = fk_model(x, prepared, output_dim)
    y = jax.block_until_ready(y)
    assert y.shape == (batch, output_dim)

    # Reference mirroring the kernel's mixed precision (bf16 MXU, f32 math).
    y_ref_mixed = fk_model_ref(x, params, bn, mxu_dtype=jnp.bfloat16)
    # Full-f32 reference (PyTorch numerics); bf16 matmul operands cost ~1e-3
    # relative, hence the looser tolerance.
    y_ref_f32 = fk_model_ref(x, params, bn, mxu_dtype=jnp.float32)

    assert jnp.allclose(y, y_ref_mixed, atol=2e-2, rtol=2e-2), (
        float(jnp.max(jnp.abs(y - y_ref_mixed))))
    assert jnp.allclose(y, y_ref_f32, atol=5e-2, rtol=5e-2), (
        float(jnp.max(jnp.abs(y - y_ref_f32))))

    print("KERNEL_OK")
</pallas_src>

<mosaic_0001>
module attributes {stable_mosaic.version = 11 : i64} {
  func.func @fk_kernel(%arg0: memref<256x11xf32, #tpu.memory_space<vmem>>, %arg1: memref<528x256xbf16, #tpu.memory_space<vmem>>, %arg2: memref<384x128xbf16, #tpu.memory_space<vmem>>, %arg3: memref<16x256xf32, #tpu.memory_space<vmem>>, %arg4: memref<256x128xf32, #tpu.memory_space<vmem>>, %arg5: memref<256x16xf32, #tpu.memory_space<vmem>>) attributes {dimension_semantics = [], scalar_prefetch = 0 : i64, scratch_operands = 1 : i64, tpu.core_type = #tpu.core_type<tc>} {
    %cst = arith.constant 0.000000e+00 : f32
    %0 = vector.broadcast %cst : f32 to vector<256x16xf32>
    %c0 = arith.constant 0 : index
    %c0_0 = arith.constant 0 : index
    %1 = vector.load %arg5[%c0, %c0_0] : memref<256x16xf32, #tpu.memory_space<vmem>>, vector<256x16xf32>
    tpu.vector_store %arg5[%c0, %c0_0], %0 {strides = array<i32>} : memref<256x16xf32, #tpu.memory_space<vmem>>, vector<256x16xf32>,
    %c0_1 = arith.constant 0 : index
    %c0_2 = arith.constant 0 : index
    %2 = vector.load %arg0[%c0_1, %c0_2] : memref<256x11xf32, #tpu.memory_space<vmem>>, vector<256x11xf32>
    %c0_3 = arith.constant 0 : index
    %c0_4 = arith.constant 0 : index
    %3 = vector.load %arg5[%c0_3, %c0_4] : memref<256x16xf32, #tpu.memory_space<vmem>>, vector<256x11xf32>
    tpu.vector_store %arg5[%c0_3, %c0_4], %2 {strides = array<i32>} : memref<256x16xf32, #tpu.memory_space<vmem>>, vector<256x11xf32>,
    %c0_5 = arith.constant 0 : index
    %c0_6 = arith.constant 0 : index
    %4 = vector.load %arg5[%c0_5, %c0_6] : memref<256x16xf32, #tpu.memory_space<vmem>>, vector<256x16xf32>
    %5 = arith.truncf %4 : vector<256x16xf32> to vector<256x16xbf16>
    %c0_7 = arith.constant 0 : index
    %c0_8 = arith.constant 0 : index
    %6 = vector.load %arg1[%c0_7, %c0_8] : memref<528x256xbf16, #tpu.memory_space<vmem>>, vector<16x256xbf16>
    %c16 = arith.constant 16 : index
    %c0_9 = arith.constant 0 : index
    %7 = vector.load %arg1[%c16, %c0_9] : memref<528x256xbf16, #tpu.memory_space<vmem>>, vector<256x256xbf16>
    %c272 = arith.constant 272 : index
    %c0_10 = arith.constant 0 : index
    %8 = vector.load %arg1[%c272, %c0_10] : memref<528x256xbf16, #tpu.memory_space<vmem>>, vector<256x256xbf16>
    %c0_11 = arith.constant 0 : index
    %c0_12 = arith.constant 0 : index
    %9 = vector.load %arg2[%c0_11, %c0_12] : memref<384x128xbf16, #tpu.memory_space<vmem>>, vector<256x128xbf16>
    %c256 = arith.constant 256 : index
    %c0_13 = arith.constant 0 : index
    %10 = vector.load %arg2[%c256, %c0_13] : memref<384x128xbf16, #tpu.memory_space<vmem>>, vector<128x128xbf16>
    %c0_14 = arith.constant 0 : index
    %c0_15 = arith.constant 0 : index
    %11 = vector.load %arg3[%c0_14, %c0_15] : memref<16x256xf32, #tpu.memory_space<vmem>>, vector<1x256xf32>
    %c1 = arith.constant 1 : index
    %c0_16 = arith.constant 0 : index
    %12 = vector.load %arg3[%c1, %c0_16] : memref<16x256xf32, #tpu.memory_space<vmem>>, vector<1x256xf32>
    %c2 = arith.constant 2 : index
    %c0_17 = arith.constant 0 : index
    %13 = vector.load %arg3[%c2, %c0_17] : memref<16x256xf32, #tpu.memory_space<vmem>>, vector<1x256xf32>
    %c3 = arith.constant 3 : index
    %c0_18 = arith.constant 0 : index
    %14 = vector.load %arg3[%c3, %c0_18] : memref<16x256xf32, #tpu.memory_space<vmem>>, vector<1x256xf32>
    %c4 = arith.constant 4 : index
    %c0_19 = arith.constant 0 : index
    %15 = vector.load %arg3[%c4, %c0_19] : memref<16x256xf32, #tpu.memory_space<vmem>>, vector<1x256xf32>
    %c5 = arith.constant 5 : index
    %c0_20 = arith.constant 0 : index
    %16 = vector.load %arg3[%c5, %c0_20] : memref<16x256xf32, #tpu.memory_space<vmem>>, vector<1x256xf32>
    %c6 = arith.constant 6 : index
    %c0_21 = arith.constant 0 : index
    %17 = vector.load %arg3[%c6, %c0_21] : memref<16x256xf32, #tpu.memory_space<vmem>>, vector<1x256xf32>
    %c7 = arith.constant 7 : index
    %c0_22 = arith.constant 0 : index
    %18 = vector.load %arg3[%c7, %c0_22] : memref<16x256xf32, #tpu.memory_space<vmem>>, vector<1x256xf32>
    %c8 = arith.constant 8 : index
    %c0_23 = arith.constant 0 : index
    %19 = vector.load %arg3[%c8, %c0_23] : memref<16x256xf32, #tpu.memory_space<vmem>>, vector<1x256xf32>
    %c9 = arith.constant 9 : index
    %c0_24 = arith.constant 0 : index
    %20 = vector.load %arg3[%c9, %c0_24] : memref<16x256xf32, #tpu.memory_space<vmem>>, vector<1x128xf32>
    %c10 = arith.constant 10 : index
    %c0_25 = arith.constant 0 : index
    %21 = vector.load %arg3[%c10, %c0_25] : memref<16x256xf32, #tpu.memory_space<vmem>>, vector<1x128xf32>
    %cst_26 = arith.constant dense<0.000000e+00> : vector<256x256xf32>
    %22 = tpu.matmul %5, %6, %cst_26 {dimension_numbers = #tpu.dot_dimension_numbers<[1], [0], [0], [1], [0, 0, 1, 1], [], []>} : vector<256x16xbf16>, vector<16x256xbf16>, vector<256x256xf32> -> vector<256x256xf32>
    %23 = vector.broadcast %11 : vector<1x256xf32> to vector<256x256xf32>
    %24 = arith.addf %22, %23 : vector<256x256xf32>
    %cst_27 = arith.constant dense<0.000000e+00> : vector<256xf32>
    %25 = vector.multi_reduction <add>, %24, %cst_27 [0] : vector<256x256xf32> to vector<256xf32>
    %26 = vector.shape_cast %25 : vector<256xf32> to vector<1x256xf32>
    %cst_28 = arith.constant 3.906250e-03 : f32
    %27 = vector.broadcast %cst_28 : f32 to vector<1x256xf32>
    %28 = arith.mulf %26, %27 : vector<1x256xf32>
    %29 = arith.mulf %24, %24 : vector<256x256xf32>
    %cst_29 = arith.constant dense<0.000000e+00> : vector<256xf32>
    %30 = vector.multi_reduction <add>, %29, %cst_29 [0] : vector<256x256xf32> to vector<256xf32>
    %31 = vector.shape_cast %30 : vector<256xf32> to vector<1x256xf32>
    %cst_30 = arith.constant 3.906250e-03 : f32
    %32 = vector.broadcast %cst_30 : f32 to vector<1x256xf32>
    %33 = arith.mulf %31, %32 : vector<1x256xf32>
    %34 = arith.mulf %28, %28 : vector<1x256xf32>
    %35 = arith.subf %33, %34 : vector<1x256xf32>
    %cst_31 = arith.constant 0.000000e+00 : f32
    %36 = vector.broadcast %cst_31 : f32 to vector<1x256xf32>
    %37 = arith.maximumf %35, %36 : vector<1x256xf32>
    %cst_32 = arith.constant 9.99999974E-6 : f32
    %38 = vector.broadcast %cst_32 : f32 to vector<1x256xf32>
    %39 = arith.addf %37, %38 : vector<1x256xf32>
    %40 = math.rsqrt %39 : vector<1x256xf32>
    %41 = arith.mulf %12, %40 : vector<1x256xf32>
    %42 = arith.mulf %28, %41 : vector<1x256xf32>
    %43 = arith.subf %13, %42 : vector<1x256xf32>
    %44 = vector.broadcast %41 : vector<1x256xf32> to vector<256x256xf32>
    %45 = arith.mulf %24, %44 : vector<256x256xf32>
    %46 = vector.broadcast %43 : vector<1x256xf32> to vector<256x256xf32>
    %47 = arith.addf %45, %46 : vector<256x256xf32>
    %cst_33 = arith.constant 0.00999999977 : f32
    %48 = vector.broadcast %cst_33 : f32 to vector<256x256xf32>
    %49 = arith.mulf %48, %47 : vector<256x256xf32>
    %50 = arith.maximumf %47, %49 : vector<256x256xf32>
    %51 = arith.truncf %50 : vector<256x256xf32> to vector<256x256xbf16>
    %cst_34 = arith.constant dense<0.000000e+00> : vector<256x256xf32>
    %52 = tpu.matmul %51, %7, %cst_34 {dimension_numbers = #tpu.dot_dimension_numbers<[1], [0], [0], [1], [0, 0, 1, 1], [], []>} : vector<256x256xbf16>, vector<256x256xbf16>, vector<256x256xf32> -> vector<256x256xf32>
    %53 = vector.broadcast %14 : vector<1x256xf32> to vector<256x256xf32>
    %54 = arith.addf %52, %53 : vector<256x256xf32>
    %cst_35 = arith.constant dense<0.000000e+00> : vector<256xf32>
    %55 = vector.multi_reduction <add>, %54, %cst_35 [0] : vector<256x256xf32> to vector<256xf32>
    %56 = vector.shape_cast %55 : vector<256xf32> to vector<1x256xf32>
    %cst_36 = arith.constant 3.906250e-03 : f32
    %57 = vector.broadcast %cst_36 : f32 to vector<1x256xf32>
    %58 = arith.mulf %56, %57 : vector<1x256xf32>
    %59 = arith.mulf %54, %54 : vector<256x256xf32>
    %cst_37 = arith.constant dense<0.000000e+00> : vector<256xf32>
    %60 = vector.multi_reduction <add>, %59, %cst_37 [0] : vector<256x256xf32> to vector<256xf32>
    %61 = vector.shape_cast %60 : vector<256xf32> to vector<1x256xf32>
    %cst_38 = arith.constant 3.906250e-03 : f32
    %62 = vector.broadcast %cst_38 : f32 to vector<1x256xf32>
    %63 = arith.mulf %61, %62 : vector<1x256xf32>
    %64 = arith.mulf %58, %58 : vector<1x256xf32>
    %65 = arith.subf %63, %64 : vector<1x256xf32>
    %cst_39 = arith.constant 0.000000e+00 : f32
    %66 = vector.broadcast %cst_39 : f32 to vector<1x256xf32>
    %67 = arith.maximumf %65, %66 : vector<1x256xf32>
    %cst_40 = arith.constant 9.99999974E-6 : f32
    %68 = vector.broadcast %cst_40 : f32 to vector<1x256xf32>
    %69 = arith.addf %67, %68 : vector<1x256xf32>
    %70 = math.rsqrt %69 : vector<1x256xf32>
    %71 = arith.mulf %15, %70 : vector<1x256xf32>
    %72 = arith.mulf %58, %71 : vector<1x256xf32>
    %73 = arith.subf %16, %72 : vector<1x256xf32>
    %74 = vector.broadcast %71 : vector<1x256xf32> to vector<256x256xf32>
    %75 = arith.mulf %54, %74 : vector<256x256xf32>
    %76 = vector.broadcast %73 : vector<1x256xf32> to vector<256x256xf32>
    %77 = arith.addf %75, %76 : vector<256x256xf32>
    %cst_41 = arith.constant 0.00999999977 : f32
    %78 = vector.broadcast %cst_41 : f32 to vector<256x256xf32>
    %79 = arith.mulf %78, %77 : vector<256x256xf32>
    %80 = arith.maximumf %77, %79 : vector<256x256xf32>
    %81 = arith.truncf %80 : vector<256x256xf32> to vector<256x256xbf16>
    %cst_42 = arith.constant dense<0.000000e+00> : vector<256x256xf32>
    %82 = tpu.matmul %81, %8, %cst_42 {dimension_numbers = #tpu.dot_dimension_numbers<[1], [0], [0], [1], [0, 0, 1, 1], [], []>} : vector<256x256xbf16>, vector<256x256xbf16>, vector<256x256xf32> -> vector<256x256xf32>
    %83 = vector.broadcast %17 : vector<1x256xf32> to vector<256x256xf32>
    %84 = arith.addf %82, %83 : vector<256x256xf32>
    %cst_43 = arith.constant dense<0.000000e+00> : vector<256xf32>
    %85 = vector.multi_reduction <add>, %84, %cst_43 [0] : vector<256x256xf32> to vector<256xf32>
    %86 = vector.shape_cast %85 : vector<256xf32> to vector<1x256xf32>
    %cst_44 = arith.constant 3.906250e-03 : f32
    %87 = vector.broadcast %cst_44 : f32 to vector<1x256xf32>
    %88 = arith.mulf %86, %87 : vector<1x256xf32>
    %89 = arith.mulf %84, %84 : vector<256x256xf32>
    %cst_45 = arith.constant dense<0.000000e+00> : vector<256xf32>
    %90 = vector.multi_reduction <add>, %89, %cst_45 [0] : vector<256x256xf32> to vector<256xf32>
    %91 = vector.shape_cast %90 : vector<256xf32> to vector<1x256xf32>
    %cst_46 = arith.constant 3.906250e-03 : f32
    %92 = vector.broadcast %cst_46 : f32 to vector<1x256xf32>
    %93 = arith.mulf %91, %92 : vector<1x256xf32>
    %94 = arith.mulf %88, %88 : vector<1x256xf32>
    %95 = arith.subf %93, %94 : vector<1x256xf32>
    %cst_47 = arith.constant 0.000000e+00 : f32
    %96 = vector.broadcast %cst_47 : f32 to vector<1x256xf32>
    %97 = arith.maximumf %95, %96 : vector<1x256xf32>
    %cst_48 = arith.constant 9.99999974E-6 : f32
    %98 = vector.broadcast %cst_48 : f32 to vector<1x256xf32>
    %99 = arith.addf %97, %98 : vector<1x256xf32>
    %100 = math.rsqrt %99 : vector<1x256xf32>
    %101 = arith.mulf %18, %100 : vector<1x256xf32>
    %102 = arith.mulf %88, %101 : vector<1x256xf32>
    %103 = arith.subf %19, %102 : vector<1x256xf32>
    %104 = vector.broadcast %101 : vector<1x256xf32> to vector<256x256xf32>
    %105 = arith.mulf %84, %104 : vector<256x256xf32>
    %106 = vector.broadcast %103 : vector<1x256xf32> to vector<256x256xf32>
    %107 = arith.addf %105, %106 : vector<256x256xf32>
    %cst_49 = arith.constant 0.00999999977 : f32
    %108 = vector.broadcast %cst_49 : f32 to vector<256x256xf32>
    %109 = arith.mulf %108, %107 : vector<256x256xf32>
    %110 = arith.maximumf %107, %109 : vector<256x256xf32>
    %111 = arith.truncf %110 : vector<256x256xf32> to vector<256x256xbf16>
    %cst_50 = arith.constant dense<0.000000e+00> : vector<256x128xf32>
    %112 = tpu.matmul %111, %9, %cst_50 {dimension_numbers = #tpu.dot_dimension_numbers<[1], [0], [0], [1], [0, 0, 1, 1], [], []>} : vector<256x256xbf16>, vector<256x128xbf16>, vector<256x128xf32> -> vector<256x128xf32>
    %113 = vector.broadcast %20 : vector<1x128xf32> to vector<256x128xf32>
    %114 = arith.addf %112, %113 : vector<256x128xf32>
    %cst_51 = arith.constant 0.00999999977 : f32
    %115 = vector.broadcast %cst_51 : f32 to vector<256x128xf32>
    %116 = arith.mulf %115, %114 : vector<256x128xf32>
    %117 = arith.maximumf %114, %116 : vector<256x128xf32>
    %118 = arith.truncf %117 : vector<256x128xf32> to vector<256x128xbf16>
    %cst_52 = arith.constant dense<0.000000e+00> : vector<256x128xf32>
    %119 = tpu.matmul %118, %10, %cst_52 {dimension_numbers = #tpu.dot_dimension_numbers<[1], [0], [0], [1], [0, 0, 1, 1], [], []>} : vector<256x128xbf16>, vector<128x128xbf16>, vector<256x128xf32> -> vector<256x128xf32>
    %120 = vector.broadcast %21 : vector<1x128xf32> to vector<256x128xf32>
    %121 = arith.addf %119, %120 : vector<256x128xf32>
    %c0_53 = arith.constant 0 : index
    %c0_54 = arith.constant 0 : index
    %122 = vector.load %arg4[%c0_53, %c0_54] : memref<256x128xf32, #tpu.memory_space<vmem>>, vector<256x128xf32>
    tpu.vector_store %arg4[%c0_53, %c0_54], %121 {strides = array<i32>} : memref<256x128xf32, #tpu.memory_space<vmem>>, vector<256x128xf32>,
    return
  }
}

</mosaic_0001>

<bundles_post_ra>
// kernel: fk_model.1
= control target key start
LH: loop header
LB: loop body
LE: loop exit
PB: predicated region body
PF: predicated region fallthrough
CT: control target
= control target key end

     0   :  { %9 = vsyncpa [#allocation4], 0  ;;  %s4336_s18 = smov [#allocation3]   ;;  %s4337_s20 = smov 128   ;;  %s8181_s0 = inlined_call_operand.vmem [shape: f32[256,11], index: 0, kind: input, shape index: {}]   ;;  %s8182_s1 = inlined_call_operand.hbm [shape: bf16[528,256], index: 1, kind: input, shape index: {}]   ;;  %s8183_s2 = inlined_call_operand.vmem [shape: bf16[384,128], index: 2, kind: input, shape index: {}]   ;;  %s8184_s3 = inlined_call_operand.vmem [shape: f32[16,256], index: 3, kind: input, shape index: {}]   ;;  %s8185_s4 = inlined_call_operand.vmem [shape: f32[256,128], index: 4, kind: output, shape index: {}]  }
   0x1   :  { %s16_s17 = sshll.u32 %s8182_s1, 4  ;;  %s18_s19 = sshll.u32 %s4336_s18, 4  ;;  %s17_s17 = int_to_ptr.hbm [resolvable:$true] %s16_s17  ;;  %s19_s19 = int_to_ptr.vmem [resolvable:$true] %s18_s19 }
   0x2   :  { %s4338_s21 = smov 8  }
   0x3   :  { %24 = dma.hbm_to_vmem [thread:$0]  %s17_s17, 8448, %s19_s19, [#allocation4], %s4337_s20, %s4337_s20, %s4338_s21  }
   0x4   :  { %4334 = dma.done.wait [#allocation4], 8448  }
   0x5   :  { %4335 = vsyncadd [#allocation4], 4294958848  ;;  %vm34_vm0 = vcmask 130048   ;;  %v4339_v0 = vmov 0.0   ;;  %vm99_vm1 = vcmask 89088   ;;  %v67_v3 = vld [vmem:[%s8181_s0] sm:$0xff] }
   0x6   :  { %35 = vst.msk [vmem:[#allocation2] sm:$0xff] %vm34_vm0, %v4339_v0  ;;  %v3803_v1 = vld [vmem:[#allocation3] sm:$0xf]  ;;  %v4194_v2 = vld [vmem:[#allocation3 + $0x4] sm:$0xf0]  ;;  %v77_v12 = vld [vmem:[%s8181_s0 + $0x50] sm:$0xff] }
   0x7   :  { %36 = vst.msk [vmem:[#allocation2 + $0x8] sm:$0xff] %vm34_vm0, %v4339_v0  ;;  %v3804_v4 = vor.u32 %v4194_v2, %v3803_v1  ;;  %v68_v5 = vld [vmem:[%s8181_s0 + $0x8] sm:$0xff]  ;;  %v4193_v6 = vld [vmem:[#allocation3 + $0x4] sm:$0xf]  ;;  %v78_v13 = vld [vmem:[%s8181_s0 + $0x58] sm:$0xff]  ;;  %vm801_vm5 = vcmask 1040384  }
   0x8   :  { %37 = vst.msk [vmem:[#allocation2 + $0x10] sm:$0xff] %vm34_vm0, %v4339_v0  ;;  %v3805_v7 = vld [vmem:[#allocation3 + $0x8] sm:$0xf0]  ;;  %v69_v14 = vld [vmem:[%s8181_s0 + $0x10] sm:$0xff]  ;;  %v70_v15 = vld [vmem:[%s8181_s0 + $0x18] sm:$0xff] }
   0x9   :  { %38 = vst.msk [vmem:[#allocation2 + $0x18] sm:$0xff] %vm34_vm0, %v4339_v0  ;;  %383 = vmatpush.bf16.msra.mxu0 %v3804_v4  ;;  %4283 = vmatpush.bf16.msra.mxu1 %v3804_v4  ;;  %v3808_v9 = vor.u32 %v4193_v6, %v3805_v7  ;;  %v79_v16 = vld [vmem:[%s8181_s0 + $0x60] sm:$0xff]  ;;  %v80_v17 = vld [vmem:[%s8181_s0 + $0x68] sm:$0xff]  ;;  %v81_v20 = vld [vmem:[%s8181_s0 + $0x70] sm:$0xff] }
   0xa   :  { %39 = vst.msk [vmem:[#allocation2 + $0x20] sm:$0xff] %vm34_vm0, %v4339_v0  ;;  %4285 = vmatpush.bf16.msra.mxu3 %v3804_v4  ;;  %4284 = vmatpush.bf16.msra.mxu2 %v3804_v4  ;;  %v71_v18 = vld [vmem:[%s8181_s0 + $0x20] sm:$0xff]  ;;  %v72_v19 = vld [vmem:[%s8181_s0 + $0x28] sm:$0xff]  ;;  %v82_v21 = vld [vmem:[%s8181_s0 + $0x78] sm:$0xff] }
   0xb   :  { %40 = vst.msk [vmem:[#allocation2 + $0x28] sm:$0xff] %vm34_vm0, %v4339_v0  ;;  %v73_v28 = vld [vmem:[%s8181_s0 + $0x30] sm:$0xff]  ;;  %v74_v29 = vld [vmem:[%s8181_s0 + $0x38] sm:$0xff]  ;;  %v83_v30 = vld [vmem:[%s8181_s0 + $0x80] sm:$0xff] }
   0xc   :  { %41 = vst.msk [vmem:[#allocation2 + $0x30] sm:$0xff] %vm34_vm0, %v4339_v0  ;;  %v84_v31 = vld [vmem:[%s8181_s0 + $0x88] sm:$0xff]  ;;  %v91_v36 = vld [vmem:[%s8181_s0 + $0xc0] sm:$0xff]  ;;  %v85_v42 = vld [vmem:[%s8181_s0 + $0x90] sm:$0xff] }
   0xd   :  { %100 = vst.msk [vmem:[#allocation2] sm:$0xff] %vm99_vm1, %v67_v3  ;;  %472 = vmatpush.bf16.msrb.mxu1 %v3808_v9  ;;  %v92_v37 = vld [vmem:[%s8181_s0 + $0xc8] sm:$0xff]  ;;  %v75_v40 = vld [vmem:[%s8181_s0 + $0x40] sm:$0xff]  ;;  %v86_v43 = vld [vmem:[%s8181_s0 + $0x98] sm:$0xff] }
   0xe   :  { %101 = vst.msk [vmem:[#allocation2 + $0x8] sm:$0xff] %vm99_vm1, %v68_v5  ;;  %v76_v41 = vld [vmem:[%s8181_s0 + $0x48] sm:$0xff]  ;;  %v87_v51 = vld [vmem:[%s8181_s0 + $0xa0] sm:$0xff]  ;;  %v93_v54 = vld [vmem:[%s8181_s0 + $0xd0] sm:$0xff] }
   0xf   :  { %42 = vst.msk [vmem:[#allocation2 + $0x38] sm:$0xff] %vm34_vm0, %v4339_v0  ;;  %v88_v52 = vld [vmem:[%s8181_s0 + $0xa8] sm:$0xff]  ;;  %v94_v55 = vld [vmem:[%s8181_s0 + $0xd8] sm:$0xff]  ;;  %v89_v3 = vld [vmem:[%s8181_s0 + $0xb0] sm:$0xff] }
  0x10   :  { %43 = vst.msk [vmem:[#allocation2 + $0x40] sm:$0xff] %vm34_vm0, %v4339_v0  ;;  %v90_v4 = vld [vmem:[%s8181_s0 + $0xb8] sm:$0xff]  ;;  %v95_v5 = vld [vmem:[%s8181_s0 + $0xe0] sm:$0xff]  ;;  %v96_v7 = vld [vmem:[%s8181_s0 + $0xe8] sm:$0xff] }
  0x11   :  { %44 = vst.msk [vmem:[#allocation2 + $0x48] sm:$0xff] %vm34_vm0, %v4339_v0 }
  0x12   :  { %45 = vst.msk [vmem:[#allocation2 + $0x50] sm:$0xff] %vm34_vm0, %v4339_v0 }
  0x13   :  { %46 = vst.msk [vmem:[#allocation2 + $0x58] sm:$0xff] %vm34_vm0, %v4339_v0 }
  0x14   :  { %v132_v8 = vld [vmem:[#allocation2] sm:$0xff]  ;;  %47 = vst.msk [vmem:[#allocation2 + $0x60] sm:$0xff] %vm34_vm0, %v4339_v0 }
  0x15   :  { %v133_v10 = vld [vmem:[#allocation2 + $0x8] sm:$0xff]  ;;  %48 = vst.msk [vmem:[#allocation2 + $0x68] sm:$0xff] %vm34_vm0, %v4339_v0 }
  0x16   :  { %v4390_v11 = vpack.c.bf16 %v133_v10, %v132_v8  ;;  %49 = vst.msk [vmem:[#allocation2 + $0x70] sm:$0xff] %vm34_vm0, %v4339_v0 }
  0x17   :  { %50 = vst.msk [vmem:[#allocation2 + $0x78] sm:$0xff] %vm34_vm0, %v4339_v0 }
  0x18   :  { %3809 = vmatmul.msk.bf16.vlgmr.msra.gmra.mxu0 %vm34_vm0, %v4390_v11  ;;  %51 = vst.msk [vmem:[#allocation2 + $0x80] sm:$0xff] %vm34_vm0, %v4339_v0 }
  0x19   :  { %52 = vst.msk [vmem:[#allocation2 + $0x88] sm:$0xff] %vm34_vm0, %v4339_v0 }
  0x1a   :  { %53 = vst.msk [vmem:[#allocation2 + $0x90] sm:$0xff] %vm34_vm0, %v4339_v0 }
  0x1b   :  { %54 = vst.msk [vmem:[#allocation2 + $0x98] sm:$0xff] %vm34_vm0, %v4339_v0 }
  0x1c   :  { %55 = vst.msk [vmem:[#allocation2 + $0xa0] sm:$0xff] %vm34_vm0, %v4339_v0 }
  0x1d   :  { %56 = vst.msk [vmem:[#allocation2 + $0xa8] sm:$0xff] %vm34_vm0, %v4339_v0 }
  0x1e   :  { %57 = vst.msk [vmem:[#allocation2 + $0xb0] sm:$0xff] %vm34_vm0, %v4339_v0 }
  0x1f   :  { %58 = vst.msk [vmem:[#allocation2 + $0xb8] sm:$0xff] %vm34_vm0, %v4339_v0 }
  0x20   :  { %59 = vst.msk [vmem:[#allocation2 + $0xc0] sm:$0xff] %vm34_vm0, %v4339_v0 }
  0x21   :  { %60 = vst.msk [vmem:[#allocation2 + $0xc8] sm:$0xff] %vm34_vm0, %v4339_v0 }
  0x22   :  { %61 = vst.msk [vmem:[#allocation2 + $0xd0] sm:$0xff] %vm34_vm0, %v4339_v0 }
  0x23   :  { %62 = vst.msk [vmem:[#allocation2 + $0xd8] sm:$0xff] %vm34_vm0, %v4339_v0 }
  0x24   :  { %63 = vst.msk [vmem:[#allocation2 + $0xe0] sm:$0xff] %vm34_vm0, %v4339_v0 }
  0x25   :  { %64 = vst.msk [vmem:[#allocation2 + $0xe8] sm:$0xff] %vm34_vm0, %v4339_v0 }
  0x26   :  { %65 = vst.msk [vmem:[#allocation2 + $0xf0] sm:$0xff] %vm34_vm0, %v4339_v0 }
  0x27   :  { %66 = vst.msk [vmem:[#allocation2 + $0xf8] sm:$0xff] %vm34_vm0, %v4339_v0 }
  0x28   :  { %110 = vst.msk [vmem:[#allocation2 + $0x50] sm:$0xff] %vm99_vm1, %v77_v12 }
  0x29   :  { %111 = vst.msk [vmem:[#allocation2 + $0x58] sm:$0xff] %vm99_vm1, %v78_v13 }
  0x2a   :  { %102 = vst.msk [vmem:[#allocation2 + $0x10] sm:$0xff] %vm99_vm1, %v69_v14 }
  0x2b   :  { %103 = vst.msk [vmem:[#allocation2 + $0x18] sm:$0xff] %vm99_vm1, %v70_v15 }
  0x2c   :  { %112 = vst.msk [vmem:[#allocation2 + $0x60] sm:$0xff] %vm99_vm1, %v79_v16 }
  0x2d   :  { %113 = vst.msk [vmem:[#allocation2 + $0x68] sm:$0xff] %vm99_vm1, %v80_v17 }
  0x2e   :  { %104 = vst.msk [vmem:[#allocation2 + $0x20] sm:$0xff] %vm99_vm1, %v71_v18  ;;  %v97_v18 = vld [vmem:[%s8181_s0 + $0xf0] sm:$0xff] }
  0x2f   :  { %v142_v22 = vld [vmem:[#allocation2 + $0x50] sm:$0xff]  ;;  %105 = vst.msk [vmem:[#allocation2 + $0x28] sm:$0xff] %vm99_vm1, %v72_v19  ;;  %v98_v19 = vld [vmem:[%s8181_s0 + $0xf8] sm:$0xff] }
  0x30   :  { %v143_v23 = vld [vmem:[#allocation2 + $0x58] sm:$0xff]  ;;  %114 = vst.msk [vmem:[#allocation2 + $0x70] sm:$0xff] %vm99_vm1, %v81_v20 }
  0x31   :  { %v4451_v24 = vpack.c.bf16 %v143_v23, %v142_v22  ;;  %v134_v25 = vld [vmem:[#allocation2 + $0x10] sm:$0xff]  ;;  %115 = vst.msk [vmem:[#allocation2 + $0x78] sm:$0xff] %vm99_vm1, %v82_v21 }
  0x32   :  { %v135_v26 = vld [vmem:[#allocation2 + $0x18] sm:$0xff]  ;;  %106 = vst.msk [vmem:[#allocation2 + $0x30] sm:$0xff] %vm99_vm1, %v73_v28 }
  0x33   :  { %3814 = vmatmul.msk.bf16.vlgmr.msra.gmra.mxu1 %vm34_vm0, %v4451_v24  ;;  %v4456_v27 = vpack.c.bf16 %v135_v26, %v134_v25  ;;  %107 = vst.msk [vmem:[#allocation2 + $0x38] sm:$0xff] %vm99_vm1, %v74_v29  ;;  %v144_v32 = vld [vmem:[#allocation2 + $0x60] sm:$0xff] }
  0x34   :  { %116 = vst.msk [vmem:[#allocation2 + $0x80] sm:$0xff] %vm99_vm1, %v83_v30  ;;  %v145_v33 = vld [vmem:[#allocation2 + $0x68] sm:$0xff] }
  0x35   :  { %3810 = vmatmul.msk.bf16.gmra.mxu0 %vm34_vm0, %v4456_v27  ;;  %117 = vst.msk [vmem:[#allocation2 + $0x88] sm:$0xff] %vm99_vm1, %v84_v31  ;;  %v136_v34 = vld [vmem:[#allocation2 + $0x20] sm:$0xff]  ;;  %v4482_v38 = vpack.c.bf16 %v145_v33, %v144_v32 }
  0x36   :  { %v137_v35 = vld [vmem:[#allocation2 + $0x28] sm:$0xff]  ;;  %124 = vst.msk [vmem:[#allocation2 + $0xc0] sm:$0xff] %vm99_vm1, %v91_v36 }
  0x37   :  { %125 = vst.msk [vmem:[#allocation2 + $0xc8] sm:$0xff] %vm99_vm1, %v92_v37  ;;  %v4486_v39 = vpack.c.bf16 %v137_v35, %v136_v34  ;;  %v146_v47 = vld [vmem:[#allocation2 + $0x70] sm:$0xff] }
  0x38   :  { %108 = vst.msk [vmem:[#allocation2 + $0x40] sm:$0xff] %vm99_vm1, %v75_v40  ;;  %v147_v48 = vld [vmem:[#allocation2 + $0x78] sm:$0xff]  ;;  %v3965_v40 = vld [vmem:[#allocation3 + $0x108] sm:$0xf0] }
  0x39   :  { %109 = vst.msk [vmem:[#allocation2 + $0x48] sm:$0xff] %vm99_vm1, %v76_v41  ;;  %v138_v49 = vld [vmem:[#allocation2 + $0x30] sm:$0xff]  ;;  %v4518_v53 = vpack.c.bf16 %v147_v48, %v146_v47 }
  0x3a   :  { %118 = vst.msk [vmem:[#allocation2 + $0x90] sm:$0xff] %vm99_vm1, %v85_v42  ;;  %v139_v50 = vld [vmem:[#allocation2 + $0x38] sm:$0xff] }
  0x3b   :  { %119 = vst.msk [vmem:[#allocation2 + $0x98] sm:$0xff] %vm99_vm1, %v86_v43  ;;  %v167_v56 = vpack.c.bf16 %v139_v50, %v138_v49  ;;  %v148_v63 = vld [vmem:[#allocation2 + $0x80] sm:$0xff]  ;;  %v4223_v50 = vld [vmem:[#allocation3 + $0xf4] sm:$0xf] }
  0x3c   :  { %120 = vst.msk [vmem:[#allocation2 + $0xa0] sm:$0xff] %vm99_vm1, %v87_v51  ;;  %v149_v0 = vld [vmem:[#allocation2 + $0x88] sm:$0xff]  ;;  %v3957_v51 = vld [vmem:[#allocation3 + $0xf8] sm:$0xf0] }
  0x3d   :  { %v156_v44 = vld [vmem:[#allocation2 + $0xc0] sm:$0xff]  ;;  %121 = vst.msk [vmem:[#allocation2 + $0xa8] sm:$0xff] %vm99_vm1, %v88_v52  ;;  %v172_v6 = vpack.c.bf16 %v149_v0, %v148_v63  ;;  %v3960_v52 = vor.u32 %v4223_v50, %v3957_v51 }
  0x3e   :  { %v157_v45 = vld [vmem:[#allocation2 + $0xc8] sm:$0xff]  ;;  %126 = vst.msk [vmem:[#allocation2 + $0xd0] sm:$0xff] %vm99_vm1, %v93_v54 }
  0x3f   :  { %v4508_v46 = vpack.c.bf16 %v157_v45, %v156_v44  ;;  %127 = vst.msk [vmem:[#allocation2 + $0xd8] sm:$0xff] %vm99_vm1, %v94_v55  ;;  %v140_v1 = vld [vmem:[#allocation2 + $0x40] sm:$0xff] }
  0x40   :  { %v141_v2 = vld [vmem:[#allocation2 + $0x48] sm:$0xff]  ;;  %122 = vst.msk [vmem:[#allocation2 + $0xb0] sm:$0xff] %vm99_vm1, %v89_v3 }
  0x41   :  { %3821 = vmatmul.msk.bf16.vlgmr.msra.gmra.mxu3 %vm34_vm0, %v4508_v46  ;;  %123 = vst.msk [vmem:[#allocation2 + $0xb8] sm:$0xff] %vm99_vm1, %v90_v4  ;;  %v168_v8 = vpack.c.bf16 %v141_v2, %v140_v1  ;;  %v150_v16 = vld [vmem:[#allocation2 + $0x90] sm:$0xff] }
  0x42   :  { %128 = vst.msk [vmem:[#allocation2 + $0xe0] sm:$0xff] %vm99_vm1, %v95_v5  ;;  %v151_v17 = vld [vmem:[#allocation2 + $0x98] sm:$0xff] }
  0x43   :  { %3815 = vmatmul.msk.bf16.gmra.mxu1 %vm34_vm0, %v4482_v38  ;;  %v152_v57 = vld [vmem:[#allocation2 + $0xa0] sm:$0xff]  ;;  %129 = vst.msk [vmem:[#allocation2 + $0xe8] sm:$0xff] %vm99_vm1, %v96_v7  ;;  %v173_v20 = vpack.c.bf16 %v151_v17, %v150_v16 }
  0x44   :  { %v153_v58 = vld [vmem:[#allocation2 + $0xa8] sm:$0xff]  ;;  %130 = vst.msk [vmem:[#allocation2 + $0xf0] sm:$0xff] %vm99_vm1, %v97_v18 }
  0x45   :  { %3811 = vmatmul.msk.bf16.gmra.mxu0 %vm34_vm0, %v4486_v39  ;;  %v4533_v59 = vpack.c.bf16 %v153_v58, %v152_v57  ;;  %v158_v60 = vld [vmem:[#allocation2 + $0xd0] sm:$0xff]  ;;  %131 = vst.msk [vmem:[#allocation2 + $0xf8] sm:$0xff] %vm99_vm1, %v98_v19  ;;  %v4645_v57 = vld [vmem:[%s8184_s3] ss:$8 sm:$0x3] }
  0x46   :  { %v159_v61 = vld [vmem:[#allocation2 + $0xd8] sm:$0xff] }
  0x47   :  { %3819 = vmatmul.msk.bf16.vlgmr.msra.gmra.mxu2 %vm34_vm0, %v4533_v59  ;;  %v4537_v62 = vpack.c.bf16 %v159_v61, %v158_v60  ;;  %v154_v9 = vld [vmem:[#allocation2 + $0xb0] sm:$0xff] }
  0x48   :  { %v155_v10 = vld [vmem:[#allocation2 + $0xb8] sm:$0xff] }
  0x49   :  { %v175_v12 = vpack.c.bf16 %v155_v10, %v154_v9  ;;  %v160_v13 = vld [vmem:[#allocation2 + $0xe0] sm:$0xff]  ;;  %v3949_v9 = vld [vmem:[#allocation3 + $0xe8] sm:$0xf0] }
  0x4a   :  { %v161_v14 = vld [vmem:[#allocation2 + $0xe8] sm:$0xff] }
  0x4b   :  { %v4560_v15 = vpack.c.bf16 %v161_v14, %v160_v13  ;;  %v162_v21 = vld [vmem:[#allocation2 + $0xf0] sm:$0xff] }
  0x4c   :  { %v163_v22 = vld [vmem:[#allocation2 + $0xf8] sm:$0xff] }
  0x4d   :  { %v4573_v23 = vpack.c.bf16 %v163_v22, %v162_v21 }
  0x51   :  { %3822 = vmatmul.msk.bf16.gmra.mxu3 %vm34_vm0, %v4537_v62 }
  0x53   :  { %3816 = vmatmul.msk.bf16.gmra.mxu1 %vm34_vm0, %v4518_v53 }
  0x55   :  { %3812 = vmatmul.msk.bf16.gmra.mxu0 %vm34_vm0, %v167_v56 }
  0x57   :  { %3820 = vmatmul.msk.bf16.gmra.mxu2 %vm34_vm0, %v175_v12 }
  0x61   :  { %3823 = vmatmul.msk.bf16.gmra.mxu3 %vm34_vm0, %v4560_v15 }
  0x63   :  { %3817 = vmatmul.msk.bf16.gmra.mxu1 %vm34_vm0, %v172_v6 }
  0x65   :  { %3813 = vmatmul.msk.bf16.gmra.mxu0 %vm34_vm0, %v168_v8 }
  0x71   :  { %3824 = vmatmul.msk.bf16.gmra.mxu3 %vm34_vm0, %v4573_v23 }
  0x73   :  { %3818 = vmatmul.msk.bf16.gmra.mxu1 %vm34_vm0, %v173_v20 }
  0x83   :  { %3825 = vmatmul.msk.bf16.vlgmr.msrb.gmra.mxu1 %vm34_vm0, %v4390_v11 }
  0x93   :  { %3826 = vmatmul.msk.bf16.gmra.mxu1 %vm34_vm0, %v4456_v27 }
  0x95   :  { %v385_v37 = vpop.f32.mrf.mxu0 }
  0x9d   :  { %v387_v43 = vpop.f32.mrf.mxu0 }
  0xa3   :  { %3827 = vmatmul.msk.bf16.gmra.mxu1 %vm34_vm0, %v4486_v39  ;;  %v4225_v39 = vld [vmem:[#allocation3 + $0x104] sm:$0xf] }
  0xa4   :  { %v3968_v41 = vor.u32 %v4225_v39, %v3965_v40 }
  0xa6   :  { %1543 = vmatpush.bf16.msra.mxu1 %v3968_v41 }
  0xaa   :  { %1544 = vmatpush.bf16.msra.mxu1 %v3960_v52 }
  0xb0   :  { %v4583_v25 = vpop.f32.mrf.mxu1 }
  0xb2   :  { %v390_v45 = vpop.f32.mrf.mxu0 }
  0xb3   :  { %3828 = vmatmul.msk.bf16.gmra.mxu1 %vm34_vm0, %v167_v56 }
  0xb8   :  { %v4586_v26 = vpop.f32.mrf.mxu1 }
  0xba   :  { %v392_v48 = vpop.f32.mrf.mxu0 }
  0xc0   :  { %v4588_v28 = vpop.f32.mrf.mxu1 }
  0xc3   :  { %3829 = vmatmul.msk.bf16.gmra.mxu1 %vm34_vm0, %v168_v8  ;;  %v4221_v8 = vld [vmem:[#allocation3 + $0xe4] sm:$0xf] }
  0xc4   :  { %v3952_v10 = vor.u32 %v4221_v8, %v3949_v9 }
  0xc6   :  { %1545 = vmatpush.bf16.msra.mxu1 %v3952_v10 }
  0xc8   :  { %v4591_v29 = vpop.f32.mrf.mxu1 }
  0xd0   :  { %v4593_v30 = vpop.f32.mrf.mxu1 }
  0xd3   :  { %3830 = vmatmul.msk.bf16.gmra.mxu1 %vm34_vm0, %v4451_v24 }
  0xd8   :  { %v4597_v11 = vpop.f32.mrf.mxu1 }
  0xe0   :  { %v4599_v27 = vpop.f32.mrf.mxu1 }
  0xe3   :  { %3831 = vmatmul.msk.bf16.gmra.mxu1 %vm34_vm0, %v4482_v38 }
  0xe8   :  { %v4603_v31 = vpop.f32.mrf.mxu1 }
  0xf0   :  { %v4605_v32 = vpop.f32.mrf.mxu1 }
  0xf3   :  { %3832 = vmatmul.msk.bf16.gmra.mxu1 %vm34_vm0, %v4518_v53  ;;  %v395_v53 = vpop.f32.mrf.mxu0 }
  0xf8   :  { %v4609_v33 = vpop.f32.mrf.mxu1 }
  0xfb   :  { %v397_v56 = vpop.f32.mrf.mxu0 }
 0x100   :  { %v4611_v34 = vpop.f32.mrf.mxu1 }
 0x103   :  { %3833 = vmatmul.msk.bf16.gmra.mxu1 %vm34_vm0, %v172_v6 }
 0x108   :  { %v4614_v24 = vpop.f32.mrf.mxu1 }
 0x110   :  { %v4616_v35 = vpop.f32.mrf.mxu1 }
 0x113   :  { %3834 = vmatmul.msk.bf16.gmra.mxu1 %vm34_vm0, %v173_v20 }
 0x118   :  { %v4619_v36 = vpop.f32.mrf.mxu1 }
 0x120   :  { %v4621_v38 = vpop.f32.mrf.mxu1 }
 0x123   :  { %3835 = vmatmul.msk.bf16.gmra.mxu1 %vm34_vm0, %v4533_v59  ;;  %v400_v59 = vpop.f32.mrf.mxu0 }
 0x128   :  { %v4625_v42 = vpop.f32.mrf.mxu1 }
 0x12b   :  { %v402_v7 = vpop.f32.mrf.mxu0 }
 0x130   :  { %v4627_v44 = vpop.f32.mrf.mxu1 }
 0x133   :  { %3836 = vmatmul.msk.bf16.gmra.mxu1 %vm34_vm0, %v175_v12  ;;  %v405_v21 = vpop.f32.mrf.mxu0 }
 0x138   :  { %v4630_v47 = vpop.f32.mrf.mxu1 }
 0x140   :  { %v4632_v49 = vpop.f32.mrf.mxu1 }
 0x143   :  { %3837 = vmatmul.msk.bf16.gmra.mxu1 %vm34_vm0, %v4508_v46  ;;  %v4650_v46 = vperm.slane %v4645_v57, 0 }
 0x145   :  { %v4653_v60 = vadd.f32 %v385_v37, %v4650_v46  ;;  %v4656_v61 = vadd.f32 %v387_v43, %v4650_v46  ;;  %v4665_v1 = vadd.f32 %v390_v45, %v4650_v46  ;;  %v4675_v6 = vadd.f32 %v392_v48, %v4650_v46 }
 0x146   :  { %v4689_v20 = vadd.f32 %v397_v56, %v4650_v46  ;;  %v4695_v40 = vadd.f32 %v400_v59, %v4650_v46  ;;  %v4705_v50 = vadd.f32 %v402_v7, %v4650_v46  ;;  %v4711_v56 = vadd.f32 %v405_v21, %v4650_v46 }
 0x147   :  { %v554_v63 = vadd.f32 %v4656_v61, %v4653_v60  ;;  %v632_v0 = vmul.f32 %v4656_v61, %v4656_v61  ;;  %v634_v5 = vmul.f32 %v4665_v1, %v4665_v1  ;;  %v636_v14 = vmul.f32 %v4675_v6, %v4675_v6 }
 0x148   :  { %v4636_v54 = vpop.f32.mrf.mxu1  ;;  %v640_v39 = vmul.f32 %v4689_v20, %v4689_v20  ;;  %v642_v48 = vmul.f32 %v4695_v40, %v4695_v40  ;;  %v4728_v9 = vadd.f32 %v4583_v25, %v4650_v46 }
 0x149   :  { %v555_v4 = vadd.f32 %v554_v63, %v4665_v1 }
 0x14b   :  { %v556_v13 = vadd.f32 %v555_v4, %v4675_v6 }
 0x150   :  { %v4638_v55 = vpop.f32.mrf.mxu1 }
 0x153   :  { %3838 = vmatmul.msk.bf16.gmra.mxu1 %vm34_vm0, %v4537_v62  ;;  %v630_v62 = vmul.f32 %v4653_v60, %v4653_v60 }
 0x155   :  { %v694_v3 = vadd.f32 %v632_v0, %v630_v62  ;;  %v646_v0 = vmul.f32 %v4711_v56, %v4711_v56 }
 0x157   :  { %v695_v12 = vadd.f32 %v694_v3, %v634_v5 }
 0x158   :  { %v4647_v58 = vpop.f32.mrf.mxu1 }
 0x159   :  { %v696_v17 = vadd.f32 %v695_v12, %v636_v14  ;;  %v3941_v14 = vld [vmem:[#allocation3 + $0xd8] sm:$0xf0] }
 0x160   :  { %v4667_v2 = vpop.f32.mrf.mxu1 }
 0x163   :  { %3839 = vmatmul.msk.bf16.gmra.mxu1 %vm34_vm0, %v4560_v15  ;;  %v4681_v15 = vadd.f32 %v395_v53, %v4650_v46  ;;  %v644_v53 = vmul.f32 %v4705_v50, %v4705_v50 }
 0x165   :  { %v557_v18 = vadd.f32 %v556_v13, %v4681_v15  ;;  %v638_v19 = vmul.f32 %v4681_v15, %v4681_v15  ;;  %v4219_v13 = vld [vmem:[#allocation3 + $0xd4] sm:$0xf] }
 0x167   :  { %v697_v22 = vadd.f32 %v696_v17, %v638_v19  ;;  %v558_v37 = vadd.f32 %v557_v18, %v4689_v20  ;;  %v650_v17 = vmul.f32 %v4728_v9, %v4728_v9  ;;  %v4735_v18 = vadd.f32 %v4586_v26, %v4650_v46 }
 0x168   :  { %v4683_v16 = vpop.f32.mrf.mxu1  ;;  %v3944_v19 = vor.u32 %v4219_v13, %v3941_v14  ;;  %v4778_v14 = vadd.f32 %v4599_v27, %v4650_v46 }
 0x169   :  { %v698_v43 = vadd.f32 %v697_v22, %v640_v39  ;;  %v559_v45 = vadd.f32 %v558_v37, %v4695_v40  ;;  %v652_v25 = vmul.f32 %v4735_v18, %v4735_v18  ;;  %v4744_v39 = vadd.f32 %v4588_v28, %v4650_v46 }
 0x16a   :  { %1546 = vmatpush.bf16.msra.mxu1 %v3944_v19  ;;  %8312 = vst [vmem:[#allocation9_spill] sm:$0xff] %v4778_v14 }
 0x16b   :  { %v699_v51 = vadd.f32 %v698_v43, %v642_v48  ;;  %v560_v52 = vadd.f32 %v559_v45, %v4705_v50  ;;  %v4746_v43 = vpop.f32.mrf.mxu3  ;;  %v654_v48 = vmul.f32 %v4744_v39, %v4744_v39 }
 0x16d   :  { %v700_v62 = vadd.f32 %v699_v51, %v644_v53  ;;  %v561_v63 = vadd.f32 %v560_v52, %v4711_v56  ;;  %v4753_v51 = vadd.f32 %v4591_v29, %v4650_v46 }
 0x16f   :  { %v701_v4 = vadd.f32 %v700_v62, %v646_v0  ;;  %8309 = vst [vmem:[#allocation6_spill] sm:$0xff] %v4753_v51  ;;  %v656_v28 = vmul.f32 %v4753_v51, %v4753_v51  ;;  %v4762_v62 = vadd.f32 %v4593_v30, %v4650_v46 }
 0x170   :  { %v4697_v41 = vpop.f32.mrf.mxu1 }
 0x171   :  { %8310 = vst [vmem:[#allocation7_spill] sm:$0xff] %v4762_v62  ;;  %v658_v29 = vmul.f32 %v4762_v62, %v4762_v62 }
 0x173   :  { %3840 = vmatmul.msk.bf16.gmra.mxu1 %vm34_vm0, %v4573_v23  ;;  %v407_v23 = vpop.f32.mrf.mxu0 }
 0x174   :  { %v4719_v3 = vadd.f32 %v407_v23, %v4650_v46 }
 0x176   :  { %v562_v5 = vadd.f32 %v561_v63, %v4719_v3  ;;  %v648_v7 = vmul.f32 %v4719_v3, %v4719_v3  ;;  %v435_v63 = vpop.f32.mrf.mxu2 }
 0x178   :  { %v4713_v59 = vpop.f32.mrf.mxu1  ;;  %v563_v10 = vadd.f32 %v562_v5, %v4728_v9  ;;  %v702_v12 = vadd.f32 %v701_v4, %v648_v7  ;;  %v447_v5 = vpop.f32.mrf.mxu3  ;;  %v4769_v7 = vadd.f32 %v4597_v11, %v4650_v46  ;;  %v662_v11 = vmul.f32 %v4778_v14, %v4778_v14 }
 0x17a   :  { %v564_v21 = vadd.f32 %v563_v10, %v4735_v18  ;;  %v703_v22 = vadd.f32 %v702_v12, %v650_v17  ;;  %8311 = vst [vmem:[#allocation8_spill] sm:$0xff] %v4769_v7  ;;  %v660_v30 = vmul.f32 %v4769_v7, %v4769_v7 }
 0x17c   :  { %v565_v45 = vadd.f32 %v564_v21, %v4744_v39  ;;  %v704_v26 = vadd.f32 %v703_v22, %v652_v25  ;;  %v4785_v22 = vadd.f32 %v4603_v31, %v4650_v46 }
 0x17e   :  { %v566_v52 = vadd.f32 %v565_v45, %v4753_v51  ;;  %v705_v53 = vadd.f32 %v704_v26, %v654_v48  ;;  %v437_v21 = vpop.f32.mrf.mxu2  ;;  %8313 = vst [vmem:[#allocation10_spill] sm:$0xff] %v4785_v22  ;;  %v664_v27 = vmul.f32 %v4785_v22, %v4785_v22 }
 0x180   :  { %v4724_v8 = vpop.f32.mrf.mxu1  ;;  %v706_v0 = vadd.f32 %v705_v53, %v656_v28  ;;  %v567_v4 = vadd.f32 %v566_v52, %v4762_v62  ;;  %v450_v25 = vpop.f32.mrf.mxu3  ;;  %v4794_v52 = vadd.f32 %v4605_v32, %v4650_v46  ;;  %v4805_v32 = vadd.f32 %v435_v63, %v4650_v46 }
 0x182   :  { %v568_v10 = vadd.f32 %v567_v4, %v4769_v7  ;;  %v707_v12 = vadd.f32 %v706_v0, %v658_v29  ;;  %8314 = vst [vmem:[#allocation11_spill] sm:$0xff] %v4794_v52  ;;  %v4217_v0 = vld [vmem:[#allocation3 + $0xc4] sm:$0xf]  ;;  %v3933_v4 = vld [vmem:[#allocation3 + $0xc8] sm:$0xf0]  ;;  %v666_v31 = vmul.f32 %v4794_v52, %v4794_v52  ;;  %v4801_v29 = vadd.f32 %v4609_v33, %v4650_v46 }
 0x183   :  { %8316 = vst [vmem:[#allocation13_spill] sm:$0xff] %v4805_v32  ;;  %v670_v33 = vmul.f32 %v4805_v32, %v4805_v32 }
 0x184   :  { %v569_v17 = vadd.f32 %v568_v10, %v4778_v14  ;;  %v708_v19 = vadd.f32 %v707_v12, %v660_v30  ;;  %8315 = vst [vmem:[#allocation12_spill] sm:$0xff] %v4801_v29  ;;  %v3936_v10 = vor.u32 %v4217_v0, %v3933_v4  ;;  %v4815_v0 = vadd.f32 %v437_v21, %v4650_v46 }
 0x186   :  { %v570_v45 = vadd.f32 %v569_v17, %v4785_v22  ;;  %v709_v26 = vadd.f32 %v708_v19, %v662_v11  ;;  %v440_v12 = vpop.f32.mrf.mxu2  ;;  %1547 = vmatpush.bf16.msra.mxu1 %v3936_v10  ;;  %8317 = vst [vmem:[#allocation14_spill] sm:$0xff] %v4815_v0 }
 0x187   :  { %v4821_v4 = vadd.f32 %v440_v12, %v4650_v46  ;;  %v4836_v12 = vadd.f32 %v4746_v43, %v4650_v46 }
 0x188   :  { %v4738_v37 = vpop.f32.mrf.mxu1  ;;  %v571_v53 = vadd.f32 %v570_v45, %v4794_v52  ;;  %v710_v28 = vadd.f32 %v709_v26, %v664_v27  ;;  %v452_v11 = vpop.f32.mrf.mxu3  ;;  %v668_v45 = vmul.f32 %v4801_v29, %v4801_v29 }
 0x189   :  { %8318 = vst [vmem:[#allocation15_spill] sm:$0xff] %v4821_v4  ;;  %v674_v21 = vmul.f32 %v4821_v4, %v4821_v4 }
 0x18a   :  { %v572_v30 = vadd.f32 %v571_v53, %v4801_v29  ;;  %v711_v17 = vadd.f32 %v710_v28, %v666_v31  ;;  %v672_v28 = vmul.f32 %v4815_v0, %v4815_v0  ;;  %8320 = vst [vmem:[#allocation17_spill] sm:$0xff] %v4836_v12 }
 0x18c   :  { %v712_v26 = vadd.f32 %v711_v17, %v668_v45  ;;  %v573_v27 = vadd.f32 %v572_v30, %v4805_v32 }
 0x18e   :  { %v713_v53 = vadd.f32 %v712_v26, %v670_v33  ;;  %v574_v63 = vadd.f32 %v573_v27, %v4815_v0  ;;  %v442_v10 = vpop.f32.mrf.mxu2  ;;  %v4832_v27 = vperm.slane %v4645_v57, 1 }
 0x18f   :  { %v4829_v26 = vadd.f32 %v442_v10, %v4650_v46  ;;  %v678_v10 = vmul.f32 %v4836_v12, %v4836_v12 }
 0x190   :  { %v4756_v23 = vpop.f32.mrf.mxu1  ;;  %v455_v17 = vpop.f32.mrf.mxu3  ;;  %v714_v30 = vadd.f32 %v713_v53, %v672_v28  ;;  %v575_v45 = vadd.f32 %v574_v63, %v4821_v4  ;;  %v4845_v28 = vadd.f32 %v4614_v24, %v4832_v27  ;;  %v4849_v57 = vadd.f32 %v4611_v34, %v4832_v27 }
 0x191   :  { %8319 = vst [vmem:[#allocation16_spill] sm:$0xff] %v4829_v26  ;;  %v676_v53 = vmul.f32 %v4829_v26, %v4829_v26  ;;  %v4853_v43 = vadd.f32 %v4616_v35, %v4832_v27  ;;  %v4865_v34 = vadd.f32 %v4619_v36, %v4832_v27 }
 0x192   :  { %v715_v33 = vadd.f32 %v714_v30, %v674_v21  ;;  %v576_v0 = vadd.f32 %v575_v45, %v4829_v26  ;;  %v4858_v30 = vadd.f32 %v447_v5, %v4650_v46  ;;  %v633_v24 = vmul.f32 %v4845_v28, %v4845_v28 }
 0x193   :  { %v631_v35 = vmul.f32 %v4849_v57, %v4849_v57  ;;  %v591_v4 = vadd.f32 %v4845_v28, %v4849_v57  ;;  %v635_v5 = vmul.f32 %v4853_v43, %v4853_v43  ;;  %v637_v22 = vmul.f32 %v4865_v34, %v4865_v34 }
 0x194   :  { %8321 = vst [vmem:[#allocation18_spill] sm:$0xff] %v4858_v30  ;;  %v577_v45 = vadd.f32 %v576_v0, %v4836_v12  ;;  %v716_v21 = vadd.f32 %v715_v33, %v676_v53  ;;  %v4875_v0 = vadd.f32 %v4621_v38, %v4832_v27  ;;  %v680_v33 = vmul.f32 %v4858_v30, %v4858_v30 }
 0x195   :  { %v4880_v53 = vadd.f32 %v450_v25, %v4650_v46  ;;  %v731_v29 = vadd.f32 %v633_v24, %v631_v35  ;;  %v592_v52 = vadd.f32 %v591_v4, %v4853_v43  ;;  %v4890_v38 = vadd.f32 %v4625_v42, %v4832_v27 }
 0x196   :  { %v578_v36 = vadd.f32 %v577_v45, %v4858_v30  ;;  %v717_v12 = vadd.f32 %v716_v21, %v678_v10  ;;  %v639_v25 = vmul.f32 %v4875_v0, %v4875_v0  ;;  %v4897_v10 = vadd.f32 %v4627_v44, %v4832_v27  ;;  %v4215_v44 = vld [vmem:[#allocation3 + $0xb4] sm:$0xf] }
 0x197   :  { %8322 = vst [vmem:[#allocation19_spill] sm:$0xff] %v4880_v53  ;;  %v732_v14 = vadd.f32 %v731_v29, %v635_v5  ;;  %v593_v7 = vadd.f32 %v592_v52, %v4865_v34  ;;  %v682_v4 = vmul.f32 %v4880_v53, %v4880_v53  ;;  %v4902_v45 = vadd.f32 %v452_v11, %v4650_v46  ;;  %v3925_v5 = vld [vmem:[#allocation3 + $0xb8] sm:$0xf0] }
 0x198   :  { %v4772_v13 = vpop.f32.mrf.mxu1  ;;  %v457_v26 = vpop.f32.mrf.mxu3  ;;  %v718_v21 = vadd.f32 %v717_v12, %v680_v33  ;;  %v579_v42 = vadd.f32 %v578_v36, %v4880_v53  ;;  %v641_v52 = vmul.f32 %v4890_v38, %v4890_v38  ;;  %v4910_v35 = vadd.f32 %v4630_v47, %v4832_v27  ;;  %v3939_v53 = vld [vmem:[#allocation3 + $0xd0] sm:$0xf] }
 0x199   :  { %8323 = vst [vmem:[#allocation20_spill] sm:$0xff] %v4902_v45  ;;  %v733_v24 = vadd.f32 %v732_v14, %v637_v22  ;;  %v594_v29 = vadd.f32 %v593_v7, %v4875_v0  ;;  %v3928_v30 = vor.u32 %v4215_v44, %v3925_v5  ;;  %v643_v12 = vmul.f32 %v4897_v10, %v4897_v10 }
 0x19a   :  { %v4917_v7 = vadd.f32 %v4632_v49, %v4832_v27  ;;  %v684_v14 = vmul.f32 %v4902_v45, %v4902_v45  ;;  %v4922_v47 = vadd.f32 %v455_v17, %v4650_v46  ;;  %v580_v22 = vadd.f32 %v579_v42, %v4902_v45 }
 0x19b   :  { %v734_v51 = vadd.f32 %v733_v24, %v639_v25  ;;  %v595_v11 = vadd.f32 %v594_v29, %v4890_v38  ;;  %v719_v33 = vadd.f32 %v718_v21, %v682_v4  ;;  %1548 = vmatpush.bf16.msra.mxu1 %v3928_v30  ;;  %v645_v29 = vmul.f32 %v4910_v35, %v4910_v35 }
 0x19c   :  { %8324 = vst [vmem:[#allocation21_spill] sm:$0xff] %v4922_v47  ;;  %v4932_v49 = vadd.f32 %v4636_v54, %v4832_v27  ;;  %v647_v42 = vmul.f32 %v4917_v7, %v4917_v7  ;;  %v4939_v4 = vadd.f32 %v4638_v55, %v4832_v27  ;;  %v4944_v30 = vadd.f32 %v457_v26, %v4650_v46 }
 0x19d   :  { %v735_v25 = vadd.f32 %v734_v51, %v641_v52  ;;  %v596_v24 = vadd.f32 %v595_v11, %v4897_v10  ;;  %v686_v51 = vmul.f32 %v4922_v47, %v4922_v47  ;;  %v581_v21 = vadd.f32 %v580_v22, %v4922_v47 }
 0x19e   :  { %8325 = vst [vmem:[#allocation22_spill] sm:$0xff] %v4944_v30  ;;  %v720_v54 = vadd.f32 %v719_v33, %v684_v14  ;;  %v649_v11 = vmul.f32 %v4932_v49, %v4932_v49  ;;  %v651_v26 = vmul.f32 %v4939_v4, %v4939_v4  ;;  %v4959_v22 = vadd.f32 %v4667_v2, %v4832_v27 }
 0x19f   :  { %v736_v44 = vadd.f32 %v735_v25, %v643_v12  ;;  %v597_v17 = vadd.f32 %v596_v24, %v4910_v35  ;;  %v4952_v12 = vadd.f32 %v4647_v58, %v4832_v27  ;;  %v582_v14 = vadd.f32 %v581_v21, %v4944_v30 }
 0x1a0   :  { %v4788_v48 = vpop.f32.mrf.mxu1  ;;  %v460_v62 = vpop.f32.mrf.mxu3  ;;  %v688_v33 = vmul.f32 %v4944_v30, %v4944_v30  ;;  %v721_v24 = vadd.f32 %v720_v54, %v686_v51  ;;  %v4974_v2 = vadd.f32 %v4683_v16, %v4832_v27  ;;  %v4981_v51 = vadd.f32 %v4697_v41, %v4832_v27  ;;  %v4209_v41 = vld [vmem:[#allocation3 + $0x84] sm:$0xf] }
 0x1a1   :  { %v737_v52 = vadd.f32 %v736_v44, %v645_v29  ;;  %v598_v5 = vadd.f32 %v597_v17, %v4917_v7  ;;  %v4965_v29 = vadd.f32 %v460_v62, %v4650_v46  ;;  %v655_v62 = vmul.f32 %v4959_v22, %v4959_v22 }
 0x1a2   :  { %v722_v54 = vadd.f32 %v721_v24, %v688_v33  ;;  %v3901_v33 = vld [vmem:[#allocation3 + $0x88] sm:$0xf0] }
 0x1a3   :  { %v738_v55 = vadd.f32 %v737_v52, %v647_v42  ;;  %v599_v25 = vadd.f32 %v598_v5, %v4932_v49  ;;  %8326 = vst [vmem:[#allocation23_spill] sm:$0xff] %v4965_v29  ;;  %v653_v52 = vmul.f32 %v4952_v12, %v4952_v12  ;;  %v3904_v24 = vor.u32 %v4209_v41, %v3901_v33 }
 0x1a5   :  { %v739_v17 = vadd.f32 %v738_v55, %v649_v11  ;;  %v600_v42 = vadd.f32 %v599_v25, %v4939_v4  ;;  %v583_v11 = vadd.f32 %v582_v14, %v4965_v29  ;;  %v690_v55 = vmul.f32 %v4965_v29, %v4965_v29  ;;  %1454 = vmatpush.bf16.msrb.mxu0 %v3904_v24 }
 0x1a7   :  { %v740_v21 = vadd.f32 %v739_v17, %v651_v26  ;;  %v601_v5 = vadd.f32 %v600_v42, %v4952_v12  ;;  %v657_v17 = vmul.f32 %v4974_v2, %v4974_v2  ;;  %v4994_v42 = vadd.f32 %v4713_v59, %v4832_v27 }
 0x1a8   :  { %v4807_v19 = vpop.f32.mrf.mxu1  ;;  %v462_v44 = vpop.f32.mrf.mxu3 }
 0x1a9   :  { %v4987_v25 = vadd.f32 %v462_v44, %v4650_v46  ;;  %v741_v16 = vadd.f32 %v740_v21, %v653_v52  ;;  %v602_v26 = vadd.f32 %v601_v5, %v4959_v22  ;;  %v659_v46 = vmul.f32 %v4981_v51, %v4981_v51 }
 0x1aa   :  { %v5001_v44 = vadd.f32 %v4724_v8, %v4832_v27  ;;  %v723_v52 = vadd.f32 %v722_v54, %v690_v55  ;;  %v5018_v55 = vadd.f32 %v4756_v23, %v4832_v27  ;;  %v5032_v23 = vadd.f32 %v4788_v48, %v4832_v27 }
 0x1ab   :  { %8327 = vst [vmem:[#allocation24_spill] sm:$0xff] %v4987_v25  ;;  %v742_v14 = vadd.f32 %v741_v16, %v655_v62  ;;  %v603_v30 = vadd.f32 %v602_v26, %v4974_v2  ;;  %v584_v21 = vadd.f32 %v583_v11, %v4987_v25  ;;  %v692_v59 = vmul.f32 %v4987_v25, %v4987_v25 }
 0x1ac   :  { %v661_v16 = vmul.f32 %v4994_v42, %v4994_v42  ;;  %v5011_v26 = vadd.f32 %v4738_v37, %v4832_v27  ;;  %v663_v11 = vmul.f32 %v5001_v44, %v5001_v44  ;;  %v5025_v37 = vadd.f32 %v4772_v13, %v4832_v27 }
 0x1ad   :  { %v743_v29 = vadd.f32 %v742_v14, %v657_v17  ;;  %v604_v62 = vadd.f32 %v603_v30, %v4981_v51  ;;  %v585_v17 = vrot.slane %v584_v21, 4  ;;  %v724_v41 = vadd.f32 %v723_v52, %v692_v59 }
 0x1ae   :  { %v665_v24 = vmul.f32 %v5011_v26, %v5011_v26  ;;  %v669_v13 = vmul.f32 %v5025_v37, %v5025_v37  ;;  %v671_v48 = vmul.f32 %v5032_v23, %v5032_v23 }
 0x1af   :  { %v744_v8 = vadd.f32 %v743_v29, %v659_v46  ;;  %v605_v54 = vadd.f32 %v604_v62, %v4994_v42  ;;  %v667_v46 = vmul.f32 %v5018_v55, %v5018_v55  ;;  %v586_v52 = vadd.f32 %v585_v17, %v584_v21 }
 0x1b0   :  { %v4823_v31 = vpop.f32.mrf.mxu1  ;;  %v725_v59 = vrot.slane %v724_v41, 4 }
 0x1b1   :  { %v745_v30 = vadd.f32 %v744_v8, %v661_v16  ;;  %v606_v33 = vadd.f32 %v605_v54, %v5001_v44  ;;  %v5039_v54 = vadd.f32 %v4807_v19, %v4832_v27  ;;  %v5046_v21 = vadd.f32 %v4823_v31, %v4832_v27 }
 0x1b2   :  { %v587_v17 = vrot.slane %v586_v52, 2 }
 0x1b3   :  { %v746_v29 = vadd.f32 %v745_v30, %v663_v11  ;;  %v607_v14 = vadd.f32 %v606_v33, %v5011_v26  ;;  %8328 = vst [vmem:[#allocation25_spill] sm:$0xff] %v5046_v21  ;;  %v726_v33 = vadd.f32 %v725_v59, %v724_v41 }
 0x1b4   :  { %v588_v41 = vadd.f32 %v587_v17, %v586_v52 }
 0x1b5   :  { %v747_v16 = vadd.f32 %v746_v29, %v665_v24  ;;  %v608_v8 = vadd.f32 %v607_v14, %v5018_v55  ;;  %v673_v14 = vmul.f32 %v5039_v54, %v5039_v54  ;;  %v727_v59 = vrot.slane %v726_v33, 2 }
 0x1b6   :  { %v589_v17 = vrot.slane %v588_v41, 1 }
 0x1b7   :  { %v748_v11 = vadd.f32 %v747_v16, %v667_v46  ;;  %v609_v30 = vadd.f32 %v608_v8, %v5025_v37  ;;  %v675_v8 = vmul.f32 %v5046_v21, %v5046_v21 }
 0x1b8   :  { %v4841_v63 = vpop.f32.mrf.mxu1  ;;  %v590_v47 = vadd.f32 %v589_v17, %v588_v41 }
 0x1b9   :  { %v749_v24 = vadd.f32 %v748_v11, %v669_v13  ;;  %v610_v29 = vadd.f32 %v609_v30, %v5032_v23  ;;  %v5053_v19 = vadd.f32 %v4841_v63, %v4832_v27 }
 0x1ba   :  { %v5100_v17 = vmul.f32 0.00390625, %v590_v47 }
 0x1bb   :  { %8329 = vst [vmem:[#allocation26_spill] sm:$0xff] %v5053_v19  ;;  %v750_v46 = vadd.f32 %v749_v24, %v671_v48  ;;  %v611_v16 = vadd.f32 %v610_v29, %v5039_v54  ;;  %v677_v63 = vmul.f32 %v5053_v19, %v5053_v19 }
 0x1bd   :  { %v751_v11 = vadd.f32 %v750_v46, %v673_v14  ;;  %v612_v30 = vadd.f32 %v611_v16, %v5046_v21  ;;  %v728_v14 = vadd.f32 %v727_v59, %v726_v33 }
 0x1bf   :  { %v752_v24 = vadd.f32 %v751_v11, %v675_v8  ;;  %v613_v29 = vadd.f32 %v612_v30, %v5053_v19  ;;  %v729_v33 = vrot.slane %v728_v14, 1 }
 0x1c0   :  { %v4883_v32 = vpop.f32.mrf.mxu1 }
 0x1c1   :  { %v5060_v31 = vadd.f32 %v4883_v32, %v4832_v27  ;;  %v753_v46 = vadd.f32 %v752_v24, %v677_v63  ;;  %v730_v41 = vadd.f32 %v729_v33, %v728_v14 }
 0x1c3   :  { %8330 = vst [vmem:[#allocation27_spill] sm:$0xff] %v5060_v31  ;;  %v679_v32 = vmul.f32 %v5060_v31, %v5060_v31  ;;  %v614_v16 = vadd.f32 %v613_v29, %v5060_v31 }
 0x1c5   :  { %v754_v8 = vadd.f32 %v753_v46, %v679_v32 }
 0x1c8   :  { %v4925_v36 = vpop.f32.mrf.mxu1 }
 0x1c9   :  { %v5067_v48 = vadd.f32 %v4925_v36, %v4832_v27 }
 0x1cb   :  { %8331 = vst [vmem:[#allocation28_spill] sm:$0xff] %v5067_v48  ;;  %v681_v25 = vmul.f32 %v5067_v48, %v5067_v48  ;;  %v615_v11 = vadd.f32 %v614_v16, %v5067_v48  ;;  %v4204_v48 = vld [vmem:[#allocation3 + $0x54] sm:$0xf0] }
 0x1cd   :  { %v755_v63 = vadd.f32 %v754_v8, %v681_v25 }
 0x1d0   :  { %v4967_v58 = vpop.f32.mrf.mxu1 }
 0x1d1   :  { %v5074_v52 = vadd.f32 %v4967_v58, %v4832_v27 }
 0x1d3   :  { %8332 = vst [vmem:[#allocation29_spill] sm:$0xff] %v5074_v52  ;;  %v683_v30 = vmul.f32 %v5074_v52, %v5074_v52  ;;  %v616_v24 = vadd.f32 %v615_v11, %v5074_v52 }
 0x1d5   :  { %v756_v32 = vadd.f32 %v755_v63, %v683_v30 }
 0x1d8   :  { %v541_v5 = vpop.f32.mrf.mxu1 }
 0x1d9   :  { %v5080_v36 = vadd.f32 %v541_v5, %v4832_v27 }
 0x1db   :  { %8333 = vst [vmem:[#allocation30_spill] sm:$0xff] %v5080_v36  ;;  %v685_v29 = vmul.f32 %v5080_v36, %v5080_v36  ;;  %v617_v46 = vadd.f32 %v616_v24, %v5080_v36  ;;  %v768_v24 = vmul.f32 0.00390625, %v730_v41 }
 0x1dd   :  { %v757_v25 = vadd.f32 %v756_v32, %v685_v29 }
 0x1e0   :  { %v544_v62 = vpop.f32.mrf.mxu1 }
 0x1e1   :  { %v5086_v58 = vadd.f32 %v544_v62, %v4832_v27 }
 0x1e3   :  { %8334 = vst [vmem:[#allocation31_spill] sm:$0xff] %v5086_v58  ;;  %v687_v16 = vmul.f32 %v5086_v58, %v5086_v58  ;;  %v618_v8 = vadd.f32 %v617_v46, %v5086_v58 }
 0x1e8   :  { %v546_v13 = vpop.f32.mrf.mxu1 }
 0x1e9   :  { %v5092_v5 = vadd.f32 %v546_v13, %v4832_v27  ;;  %v758_v13 = vadd.f32 %v757_v25, %v687_v16 }
 0x1eb   :  { %8335 = vst [vmem:[#allocation32_spill] sm:$0xff] %v5092_v5  ;;  %v689_v11 = vmul.f32 %v5092_v5, %v5092_v5  ;;  %v619_v30 = vadd.f32 %v618_v8, %v5092_v5 }
 0x1ed   :  { %v759_v14 = vadd.f32 %v758_v13, %v689_v11 }
 0x1f0   :  { %v549_v59 = vpop.f32.mrf.mxu1 }
 0x1f1   :  { %v5098_v62 = vadd.f32 %v549_v59, %v4832_v27  ;;  %v770_v59 = vmul.f32 %v5100_v17, %v5100_v17 }
 0x1f3   :  { %8336 = vst [vmem:[#allocation33_spill] sm:$0xff] %v5098_v62  ;;  %v691_v63 = vmul.f32 %v5098_v62, %v5098_v62  ;;  %v620_v47 = vadd.f32 %v619_v30, %v5098_v62  ;;  %v772_v16 = vsub.f32 %v768_v24, %v770_v59 }
 0x1f5   :  { %v760_v29 = vadd.f32 %v759_v14, %v691_v63  ;;  %v774_v58 = vmax.f32 %v772_v16, 0.0 }
 0x1f7   :  { %v5117_v30 = vadd.f32 1e-05, %v774_v58  ;;  %v4210_v58 = vld [vmem:[#allocation3 + $0x84] sm:$0xf0] }
 0x1f8   :  { %v551_v36 = vpop.f32.mrf.mxu1 }
 0x1f9   :  { %v5112_v33 = vadd.f32 %v551_v36, %v4832_v27  ;;  %4298 = vrsqrt.f32 %v5117_v30  ;;  %vm784_vm7 = vweird.f32 %v5117_v30 }
 0x1fb   :  { %v621_v32 = vadd.f32 %v620_v47, %v5112_v33  ;;  %v693_v46 = vmul.f32 %v5112_v33, %v5112_v33 }
 0x1fd   :  { %v622_v25 = vrot.slane %v621_v32, 4  ;;  %v761_v8 = vadd.f32 %v760_v29, %v693_v46  ;;  %v4226_v46 = vld [vmem:[#allocation3 + $0x104] sm:$0xf0] }
 0x1ff   :  { %v623_v41 = vadd.f32 %v622_v25, %v621_v32  ;;  %v762_v5 = vrot.slane %v761_v8, 4  ;;  %v3963_v32 = vld [vmem:[#allocation3 + $0x100] sm:$0xf] }
 0x200   :  { %v3964_v16 = vor.u32 %v4226_v46, %v3963_v32  ;;  %v4205_v32 = vld [vmem:[#allocation3 + $0x64] sm:$0xf]  ;;  %v3885_v46 = vld [vmem:[#allocation3 + $0x68] sm:$0xf0] }
 0x201   :  { %v624_v45 = vrot.slane %v623_v41, 2  ;;  %v763_v52 = vadd.f32 %v762_v5, %v761_v8  ;;  %v3899_v5 = vld [vmem:[#allocation3 + $0x80] sm:$0xf]  ;;  %v5124_v8 = vpop.eup %4298 }
 0x202   :  { %v3900_v25 = vor.u32 %v4210_v58, %v3899_v5  ;;  %1365 = vmatpush.bf16.msrb.mxu3 %v3964_v16  ;;  %v3947_v5 = vld [vmem:[#allocation3 + $0xe0] sm:$0xf]  ;;  %v4222_v16 = vld [vmem:[#allocation3 + $0xe4] sm:$0xf0]  ;;  %vm785_vm6 = vweird.f32 %v5124_v8 }
 0x203   :  { %v625_v11 = vadd.f32 %v624_v45, %v623_v41  ;;  %v764_v13 = vrot.slane %v763_v52, 2  ;;  %v4207_v41 = vld [vmem:[#allocation3 + $0x74] sm:$0xf]  ;;  %v3883_v58 = vld [vmem:[#allocation3 + $0x60] sm:$0xf]  ;;  %vm786_vm8 = vmor %vm784_vm7, %vm785_vm6 }
 0x204   :  { %1276 = vmatpush.bf16.msrb.mxu2 %v3900_v25  ;;  %v4206_v25 = vld [vmem:[#allocation3 + $0x64] sm:$0xf0] }
 0x205   :  { %v626_v27 = vrot.slane %v625_v11, 1  ;;  %v765_v36 = vadd.f32 %v764_v13, %v763_v52  ;;  %v3955_v13 = vld [vmem:[#allocation3 + $0xf0] sm:$0xf] }
 0x207   :  { %v627_v63 = vadd.f32 %v626_v27, %v625_v11  ;;  %v766_v14 = vrot.slane %v765_v36, 1  ;;  %v3893_v11 = vld [vmem:[#allocation3 + $0x78] sm:$0xf0] }
 0x209   :  { %v5120_v47 = vmul.f32 0.00390625, %v627_v63  ;;  %v767_v24 = vadd.f32 %v766_v14, %v765_v36  ;;  %v3896_v36 = vor.u32 %v4207_v41, %v3893_v11  ;;  %v4224_v63 = vld [vmem:[#allocation3 + $0xf4] sm:$0xf0]  ;;  %v3891_v14 = vld [vmem:[#allocation3 + $0x70] sm:$0xf]  ;;  %v3948_v41 = vor.u32 %v4222_v16, %v3947_v5 }
 0x20a   :  { %v3956_v62 = vor.u32 %v4224_v63, %v3955_v13  ;;  %v3884_v11 = vor.u32 %v4206_v25, %v3883_v58  ;;  %v4203_v13 = vld [vmem:[#allocation3 + $0x54] sm:$0xf]  ;;  %v3877_v63 = vld [vmem:[#allocation3 + $0x58] sm:$0xf0]  ;;  %v3869_v5 = vld [vmem:[#allocation3 + $0x48] sm:$0xf0] }
 0x20b   :  { %v769_v59 = vmul.f32 0.00390625, %v767_v24  ;;  %v771_v29 = vmul.f32 %v5120_v47, %v5120_v47  ;;  %v779_v24 = vmul.f32 %v5124_v8, %v5117_v30  ;;  %1455 = vmatpush.bf16.msrb.mxu0 %v3896_v36  ;;  %v4218_v58 = vld [vmem:[#allocation3 + $0xc4] sm:$0xf0]  ;;  %v3867_v25 = vld [vmem:[#allocation3 + $0x40] sm:$0xf] }
 0x20c   :  { %1366 = vmatpush.bf16.msrb.mxu3 %v3956_v62  ;;  %v3875_v62 = vld [vmem:[#allocation3 + $0x50] sm:$0xf] }
 0x20d   :  { %v773_v45 = vsub.f32 %v769_v59, %v771_v29  ;;  %v4208_v59 = vld [vmem:[#allocation3 + $0x74] sm:$0xf0]  ;;  %v3876_v31 = vor.u32 %v4204_v48, %v3875_v62  ;;  %v3917_v62 = vld [vmem:[#allocation3 + $0xa8] sm:$0xf0] }
 0x20e   :  { %v3892_v29 = vor.u32 %v4208_v59, %v3891_v14  ;;  %v3880_v14 = vor.u32 %v4203_v13, %v3877_v63  ;;  %v4220_v59 = vld [vmem:[#allocation3 + $0xd4] sm:$0xf0] }
 0x20f   :  { %v775_v52 = vmax.f32 %v773_v45, 0.0  ;;  %v3888_v45 = vor.u32 %v4205_v32, %v3885_v46  ;;  %v4212_v48 = vld [vmem:[#allocation3 + $0x94] sm:$0xf0] }
 0x210   :  { %1277 = vmatpush.bf16.msrb.mxu2 %v3892_v29  ;;  %1367 = vmatpush.bf16.msrb.mxu3 %v3948_v41  ;;  %v3940_v29 = vor.u32 %v4220_v59, %v3939_v53  ;;  %v4202_v41 = vld [vmem:[#allocation3 + $0x44] sm:$0xf0]  ;;  %v4213_v59 = vld [vmem:[#allocation3 + $0xa4] sm:$0xf] }
 0x211   :  { %v777_v27 = vadd.f32 1e-05, %v775_v52  ;;  %v780_v52 = vmul.f32 %v5124_v8, %v779_v24  ;;  %1456 = vmatpush.bf16.msrb.mxu0 %v3888_v45  ;;  %v4201_v24 = vld [vmem:[#allocation3 + $0x44] sm:$0xf]  ;;  %v3931_v45 = vld [vmem:[#allocation3 + $0xc0] sm:$0xf]  ;;  %v3868_v21 = vor.u32 %v4202_v41, %v3867_v25 }
 0x212   :  { %v3872_v16 = vor.u32 %v4201_v24, %v3869_v5  ;;  %v3932_v63 = vor.u32 %v4218_v58, %v3931_v45  ;;  %v3923_v24 = vld [vmem:[#allocation3 + $0xb0] sm:$0xf]  ;;  %v4216_v5 = vld [vmem:[#allocation3 + $0xb4] sm:$0xf0]  ;;  %v4197_v58 = vld [vmem:[#allocation3 + $0x24] sm:$0xf] }
 0x213   :  { %4300 = vrsqrt.f32 %v777_v27  ;;  %v781_v32 = vmul.f32 0.5, %v780_v52  ;;  %vm794_vm3 = vweird.f32 %v777_v27  ;;  %v4199_v52 = vld [vmem:[#allocation3 + $0x34] sm:$0xf]  ;;  %v3793_v45 = vld [vmem:[%s8184_s3 + $0x1] ss:$8 sm:$0x3] }
 0x214   :  { %1278 = vmatpush.bf16.msrb.mxu2 %v3884_v11  ;;  %1368 = vmatpush.bf16.msrb.mxu3 %v3940_v29  ;;  %v3909_v29 = vld [vmem:[#allocation3 + $0x98] sm:$0xf0]  ;;  %v3853_v25 = vld [vmem:[#allocation3 + $0x28] sm:$0xf0]  ;;  %v3915_v41 = vld [vmem:[#allocation3 + $0xa0] sm:$0xf] }
 0x215   :  { %1457 = vmatpush.bf16.msrb.mxu0 %v3880_v14  ;;  %v782_v13 = vsub.f32 1.5, %v781_v32  ;;  %v3861_v14 = vld [vmem:[#allocation3 + $0x38] sm:$0xf0]  ;;  %v3920_v32 = vor.u32 %v4213_v59, %v3917_v62 }
 0x217   :  { %1549 = vmatpush.bf16.msra.mxu1 %v3920_v32  ;;  %v3845_v32 = vld [vmem:[#allocation3 + $0x18] sm:$0xf0] }
 0x218   :  { %1279 = vmatpush.bf16.msrb.mxu2 %v3876_v31  ;;  %1369 = vmatpush.bf16.msrb.mxu3 %v3932_v63  ;;  %v3864_v31 = vor.u32 %v4199_v52, %v3861_v14  ;;  %v4214_v63 = vld [vmem:[#allocation3 + $0xa4] sm:$0xf0]  ;;  %v4200_v52 = vld [vmem:[#allocation3 + $0x34] sm:$0xf0] }
 0x219   :  { %v4301_v36 = vpop.eup %4300  ;;  %1458 = vmatpush.bf16.msrb.mxu0 %v3872_v16  ;;  %v3924_v16 = vor.u32 %v4216_v5, %v3923_v24  ;;  %v3916_v59 = vor.u32 %v4214_v63, %v3915_v41  ;;  %v4198_v24 = vld [vmem:[#allocation3 + $0x24] sm:$0xf0]  ;;  %v3907_v5 = vld [vmem:[#allocation3 + $0x90] sm:$0xf] }
 0x21a   :  { %v789_v46 = vmul.f32 %v4301_v36, %v777_v27  ;;  %vm795_vm2 = vweird.f32 %v4301_v36  ;;  %v3908_v41 = vor.u32 %v4212_v48, %v3907_v5  ;;  %v8341_v5 = vld [vmem:[#allocation7_spill] sm:$0xff]  ;;  %v8342_v48 = vld [vmem:[#allocation8_spill] sm:$0xff] }
 0x21b   :  { %vm5129_vm4 = vmor %vm794_vm3, %vm795_vm2 }
 0x21c   :  { %v790_v19 = vmul.f32 %v4301_v36, %v789_v46  ;;  %v4211_v46 = vld [vmem:[#allocation3 + $0x94] sm:$0xf]  ;;  %1280 = vmatpush.bf16.msrb.mxu2 %v3868_v21  ;;  %1370 = vmatpush.bf16.msrb.mxu3 %v3924_v16  ;;  %v4196_v16 = vld [vmem:[#allocation3 + $0x14] sm:$0xf0] }
 0x21d   :  { %1459 = vmatpush.bf16.msrb.mxu0 %v3864_v31  ;;  %v3851_v31 = vld [vmem:[#allocation3 + $0x20] sm:$0xf] }
 0x21e   :  { %v791_v11 = vmul.f32 0.5, %v790_v19  ;;  %v783_v19 = vmul.f32 %v5124_v8, %v782_v13  ;;  %v3912_v13 = vor.u32 %v4211_v46, %v3909_v29 }
 0x220   :  { %v792_v53 = vsub.f32 1.5, %v791_v11  ;;  %v3856_v11 = vor.u32 %v4197_v58, %v3853_v25  ;;  %v787_v30 = vsel %vm786_vm8, %v5124_v8, %v783_v19  ;;  %1550 = vmatpush.bf16.msra.mxu1 %v3912_v13  ;;  %v3843_v25 = vld [vmem:[#allocation3 + $0x10] sm:$0xf]  ;;  %1371 = vmatpush.bf16.msrb.mxu3 %v3916_v59 }
 0x221   :  { %v3844_v8 = vor.u32 %v4196_v16, %v3843_v25  ;;  %v8346_v16 = vld [vmem:[#allocation12_spill] sm:$0xff] }
 0x222   :  { %v793_v27 = vmul.f32 %v4301_v36, %v792_v53  ;;  %v3859_v53 = vld [vmem:[#allocation3 + $0x30] sm:$0xf]  ;;  %1460 = vmatpush.bf16.msrb.mxu0 %v3856_v11 }
 0x223   :  { %v3860_v62 = vor.u32 %v4200_v52, %v3859_v53 }
 0x224   :  { %v797_v21 = vsel %vm5129_vm4, %v4301_v36, %v793_v27  ;;  %v4195_v36 = vld [vmem:[#allocation3 + $0x14] sm:$0xf]  ;;  %v3852_v27 = vor.u32 %v4198_v24, %v3851_v31  ;;  %1372 = vmatpush.bf16.msrb.mxu3 %v3908_v41 }
 0x225   :  { %v800_v14 = vrot.slane %v797_v21, 7  ;;  %1281 = vmatpush.bf16.msrb.mxu2 %v3860_v62  ;;  %v3848_v58 = vor.u32 %v4195_v36, %v3845_v32  ;;  %v8344_v32 = vld [vmem:[#allocation10_spill] sm:$0xff] }
 0x227   :  { %v802_v46 = vsel %vm801_vm5, %v787_v30, %v800_v14  ;;  %1461 = vmatpush.bf16.msrb.mxu0 %v3848_v58  ;;  %v8345_v58 = vld [vmem:[#allocation11_spill] sm:$0xff] }
 0x228   :  { %v804_v29 = vmul.f32 %v3793_v45, %v802_v46  ;;  %v8343_v46 = vld [vmem:[#allocation9_spill] sm:$0xff] }
 0x229   :  { %1282 = vmatpush.bf16.msrb.mxu2 %v3852_v27 }
 0x22a   :  { %v5145_v21 = vperm.slane %v804_v29, 0  ;;  %v5147_v63 = vperm.slane %v804_v29, 1 }
 0x22c   :  { %v811_v19 = vmul.f32 %v5147_v63, %v5120_v47  ;;  %v5153_v11 = vmul.f32 %v5147_v63, %v5112_v33  ;;  %v810_v45 = vmul.f32 %v5145_v21, %v5100_v17  ;;  %v5159_v13 = vmul.f32 %v5145_v21, %v4653_v60  ;;  %v3794_v47 = vld [vmem:[%s8184_s3 + $0x2] ss:$8 sm:$0x3] }
 0x22d   :  { %v5163_v53 = vmul.f32 %v5147_v63, %v4849_v57  ;;  %v5170_v33 = vmul.f32 %v5145_v21, %v4656_v61  ;;  %v5174_v17 = vmul.f32 %v5147_v63, %v4845_v28  ;;  %v5178_v60 = vmul.f32 %v5145_v21, %v4665_v1  ;;  %1283 = vmatpush.bf16.msrb.mxu2 %v3844_v8  ;;  %v8347_v8 = vld [vmem:[#allocation13_spill] sm:$0xff] }
 0x22e   :  { %8339 = vst [vmem:[#allocation34_spill] sm:$0xff] %v5153_v11  ;;  %v814_v52 = vrot.slane %v811_v19, 7  ;;  %v5182_v57 = vmul.f32 %v5147_v63, %v4853_v43  ;;  %v5186_v14 = vmul.f32 %v5145_v21, %v4675_v6  ;;  %v5190_v61 = vmul.f32 %v5147_v63, %v4865_v34  ;;  %v8364_v11 = vld [vmem:[#allocation29_spill] sm:$0xff] }
 0x22f   :  { %v5194_v28 = vmul.f32 %v5145_v21, %v4681_v15  ;;  %v5199_v59 = vmul.f32 %v5147_v63, %v4875_v0  ;;  %v5203_v43 = vmul.f32 %v5145_v21, %v4689_v20  ;;  %v5207_v6 = vmul.f32 %v5147_v63, %v4890_v38 }
 0x230   :  { %v815_v1 = vsel %vm801_vm5, %v810_v45, %v814_v52  ;;  %v5211_v15 = vmul.f32 %v5145_v21, %v4695_v40  ;;  %v5215_v62 = vmul.f32 %v5147_v63, %v4897_v10  ;;  %v5219_v0 = vmul.f32 %v5145_v21, %v4705_v50  ;;  %v8348_v45 = vld [vmem:[#allocation14_spill] sm:$0xff]  ;;  %v8351_v52 = vld [vmem:[#allocation15_spill] sm:$0xff] }
 0x231   :  { %v817_v34 = vsub.f32 %v3794_v47, %v815_v1  ;;  %v5223_v20 = vmul.f32 %v5147_v63, %v4910_v35  ;;  %v5227_v38 = vmul.f32 %v5145_v21, %v4711_v56  ;;  %v5231_v40 = vmul.f32 %v5147_v63, %v4917_v7 }
 0x232   :  { %v5235_v10 = vmul.f32 %v5145_v21, %v4719_v3  ;;  %v5241_v50 = vmul.f32 %v5147_v63, %v4932_v49  ;;  %v5245_v35 = vmul.f32 %v5145_v21, %v4728_v9  ;;  %v5249_v56 = vmul.f32 %v5147_v63, %v4939_v4  ;;  %v8340_v4 = vld [vmem:[#allocation6_spill] sm:$0xff] }
 0x233   :  { %v5237_v31 = vperm.slane %v817_v34, 0  ;;  %v5251_v7 = vperm.slane %v817_v34, 1  ;;  %v5255_v3 = vmul.f32 %v5145_v21, %v4735_v18  ;;  %v5259_v24 = vmul.f32 %v5147_v63, %v4952_v12  ;;  %v8352_v34 = vld [vmem:[#allocation25_spill] sm:$0xff] }
 0x234   :  { %v5263_v49 = vmul.f32 %v5145_v21, %v4744_v39  ;;  %v5267_v9 = vmul.f32 %v5147_v63, %v4959_v22  ;;  %v5271_v30 = vmul.f32 %v5145_v21, %v8340_v4  ;;  %v5275_v18 = vmul.f32 %v5147_v63, %v4974_v2  ;;  %v8353_v4 = vld [vmem:[#allocation16_spill] sm:$0xff] }
 0x235   :  { %v5279_v12 = vmul.f32 %v5145_v21, %v8341_v5  ;;  %v5283_v39 = vmul.f32 %v5147_v63, %v4981_v51  ;;  %v5287_v22 = vmul.f32 %v5145_v21, %v8342_v48  ;;  %v5291_v36 = vmul.f32 %v5147_v63, %v4994_v42  ;;  %v8355_v48 = vld [vmem:[#allocation26_spill] sm:$0xff] }
 0x236   :  { %v5295_v2 = vmul.f32 %v5145_v21, %v8343_v46  ;;  %v851_v27 = vmul.f32 %v5147_v63, %v5001_v44  ;;  %v5301_v29 = vmul.f32 %v5145_v21, %v8344_v32  ;;  %v5305_v51 = vmul.f32 %v5147_v63, %v5011_v26  ;;  %v8357_v46 = vld [vmem:[#allocation17_spill] sm:$0xff] }
 0x237   :  { %v5309_v25 = vmul.f32 %v5145_v21, %v8345_v58  ;;  %v855_v42 = vmul.f32 %v5147_v63, %v5018_v55  ;;  %v5315_v41 = vmul.f32 %v5145_v21, %v8346_v16  ;;  %v5319_v44 = vmul.f32 %v5147_v63, %v5025_v37  ;;  %v8358_v58 = vld [vmem:[#allocation27_spill] sm:$0xff]  ;;  %v8359_v16 = vld [vmem:[#allocation18_spill] sm:$0xff] }
 0x238   :  { %v858_v19 = vmul.f32 %v5145_v21, %v8347_v8  ;;  %v859_v26 = vmul.f32 %v5147_v63, %v5032_v23  ;;  %v5327_v47 = vmul.f32 %v5145_v21, %v8348_v45  ;;  %v5331_v55 = vmul.f32 %v5147_v63, %v5039_v54  ;;  %v8361_v45 = vld [vmem:[#allocation28_spill] sm:$0xff] }
 0x239   :  { %v862_v1 = vmul.f32 %v5145_v21, %v8351_v52  ;;  %v863_v37 = vmul.f32 %v5147_v63, %v8352_v34  ;;  %v5339_v5 = vmul.f32 %v5145_v21, %v8353_v4  ;;  %v5343_v23 = vmul.f32 %v5147_v63, %v8355_v48  ;;  %v8363_v34 = vld [vmem:[#allocation19_spill] sm:$0xff] }
 0x23a   :  { %8349 = vst [vmem:[#allocation6_spill] sm:$0xff] %v5327_v47  ;;  %v866_v32 = vmul.f32 %v5145_v21, %v8357_v46  ;;  %v867_v54 = vmul.f32 %v5147_v63, %v8358_v58  ;;  %v5351_v8 = vmul.f32 %v5145_v21, %v8359_v16  ;;  %v5355_v52 = vmul.f32 %v5147_v63, %v8361_v45  ;;  %v8369_v16 = vld [vmem:[#allocation21_spill] sm:$0xff] }
 0x23b   :  { %8350 = vst [vmem:[#allocation7_spill] sm:$0xff] %v5331_v55  ;;  %v870_v4 = vmul.f32 %v5145_v21, %v8363_v34  ;;  %v871_v48 = vmul.f32 %v5147_v63, %v8364_v11  ;;  %v8370_v55 = vld [vmem:[#allocation31_spill] sm:$0xff]  ;;  %v8372_v47 = vld [vmem:[#allocation33_spill] sm:$0xff] }
 0x23c   :  { %8354 = vst [vmem:[#allocation8_spill] sm:$0xff] %v5339_v5  ;;  %v8367_v5 = vld [vmem:[#allocation30_spill] sm:$0xff]  ;;  %v875_v45 = vmul.f32 %v5147_v63, %v8370_v55  ;;  %v879_v11 = vmul.f32 %v5147_v63, %v8372_v47  ;;  %v5388_v55 = vadd.f32 %v5237_v31, %v858_v19  ;;  %v5394_v47 = vadd.f32 %v5237_v31, %v862_v1 }
 0x23d   :  { %8356 = vst [vmem:[#allocation9_spill] sm:$0xff] %v5343_v23  ;;  %v8365_v23 = vld [vmem:[#allocation20_spill] sm:$0xff]  ;;  %v5367_v58 = vmul.f32 %v5147_v63, %v8367_v5  ;;  %v5382_v5 = vadd.f32 %v5251_v7, %v851_v27  ;;  %v5403_v27 = vadd.f32 %v5251_v7, %v867_v54  ;;  %v5409_v19 = vadd.f32 %v5251_v7, %v871_v48 }
 0x23e   :  { %8360 = vst [vmem:[#allocation10_spill] sm:$0xff] %v5351_v8  ;;  %v5363_v46 = vmul.f32 %v5145_v21, %v8365_v23  ;;  %v874_v8 = vmul.f32 %v5145_v21, %v8369_v16  ;;  %v887_v23 = vadd.f32 %v5237_v31, %v5159_v13  ;;  %v5385_v16 = vadd.f32 %v5251_v7, %v855_v42 }
 0x23f   :  { %8362 = vst [vmem:[#allocation11_spill] sm:$0xff] %v5355_v52  ;;  %v8371_v52 = vld [vmem:[#allocation23_spill] sm:$0xff]  ;;  %v5397_v13 = vadd.f32 %v5251_v7, %v863_v37  ;;  %v5406_v42 = vadd.f32 %v5237_v31, %v870_v4  ;;  %v5415_v1 = vadd.f32 %v5251_v7, %v875_v45  ;;  %v889_v54 = vadd.f32 %v5237_v31, %v5170_v33 }
 0x240   :  { %8366 = vst [vmem:[#allocation12_spill] sm:$0xff] %v5363_v46  ;;  %v878_v34 = vmul.f32 %v5145_v21, %v8371_v52  ;;  %v888_v46 = vadd.f32 %v5251_v7, %v5163_v53  ;;  %v5391_v52 = vadd.f32 %v5251_v7, %v859_v26  ;;  %v5400_v53 = vadd.f32 %v5237_v31, %v866_v32 }
 0x241   :  { %8368 = vst [vmem:[#allocation13_spill] sm:$0xff] %v5367_v58  ;;  %v5412_v26 = vadd.f32 %v5237_v31, %v874_v8  ;;  %v5421_v32 = vadd.f32 %v5251_v7, %v879_v11  ;;  %v951_v4 = vmul.f32 0.01, %v887_v23  ;;  %v890_v48 = vadd.f32 %v5251_v7, %v5174_v17 }
 0x242   :  { %8373 = vst [vmem:[#allocation14_spill] sm:$0xff] %v5394_v47  ;;  %v5418_v37 = vadd.f32 %v5237_v31, %v878_v34  ;;  %v891_v8 = vadd.f32 %v5237_v31, %v5178_v60  ;;  %v893_v45 = vadd.f32 %v5237_v31, %v5186_v14  ;;  %v892_v34 = vadd.f32 %v5251_v7, %v5182_v57 }
 0x243   :  { %8374 = vst [vmem:[#allocation15_spill] sm:$0xff] %v5397_v13  ;;  %v894_v11 = vadd.f32 %v5251_v7, %v5190_v61  ;;  %v954_v33 = vmul.f32 0.01, %v890_v48  ;;  %v895_v14 = vadd.f32 %v5237_v31, %v5194_v28  ;;  %v897_v57 = vadd.f32 %v5237_v31, %v5203_v43  ;;  %v8384_v61 = vld [vmem:[#allocation32_spill] sm:$0xff] }
 0x244   :  { %8375 = vst [vmem:[#allocation25_spill] sm:$0xff] %v5400_v53  ;;  %v957_v17 = vmul.f32 0.01, %v893_v45  ;;  %v8383_v53 = vld [vmem:[#allocation22_spill] sm:$0xff]  ;;  %v898_v43 = vadd.f32 %v5251_v7, %v5207_v6  ;;  %v5465_v6 = vadd.f32 %v5251_v7, %v5223_v20  ;;  %v905_v20 = vadd.f32 %v5237_v31, %v5235_v10 }
 0x245   :  { %8376 = vst [vmem:[#allocation16_spill] sm:$0xff] %v5403_v27  ;;  %v958_v27 = vmul.f32 0.01, %v894_v11  ;;  %v5437_v60 = vmul.f32 %v5145_v21, %v8383_v53  ;;  %v1018_v13 = vmax.f32 %v890_v48, %v954_v33  ;;  %v961_v47 = vmul.f32 0.01, %v897_v57 }
 0x246   :  { %8377 = vst [vmem:[#allocation26_spill] sm:$0xff] %v5406_v42  ;;  %v956_v42 = vmul.f32 0.01, %v892_v34  ;;  %v896_v53 = vadd.f32 %v5251_v7, %v5199_v59  ;;  %v5457_v59 = vadd.f32 %v5237_v31, %v5219_v0  ;;  %v903_v0 = vadd.f32 %v5237_v31, %v5227_v38 }
 0x247   :  { %8378 = vst [vmem:[#allocation17_spill] sm:$0xff] %v5409_v19  ;;  %v952_v19 = vmul.f32 0.01, %v888_v46  ;;  %v1022_v28 = vmax.f32 %v894_v11, %v958_v27  ;;  %v1025_v33 = vmax.f32 %v897_v57, %v961_v47  ;;  %v5461_v27 = vadd.f32 %v5251_v7, %v5215_v62 }
 0x248   :  { %8379 = vst [vmem:[#allocation27_spill] sm:$0xff] %v5412_v26  ;;  %v953_v26 = vmul.f32 0.01, %v889_v54  ;;  %v1020_v48 = vmax.f32 %v892_v34, %v956_v42  ;;  %v8385_v42 = vld [vmem:[#allocation24_spill] sm:$0xff]  ;;  %v5477_v62 = vmul.f32 0.01, %v5457_v59 }
 0x249   :  { %8380 = vst [vmem:[#allocation18_spill] sm:$0xff] %v5415_v1  ;;  %v955_v1 = vmul.f32 0.01, %v891_v8  ;;  %v5469_v47 = vmul.f32 %v5145_v21, %v8385_v42  ;;  %v967_v34 = vmul.f32 0.01, %v903_v0  ;;  %v904_v21 = vadd.f32 %v5251_v7, %v5231_v40 }
 0x24a   :  { %8381 = vst [vmem:[#allocation28_spill] sm:$0xff] %v5418_v37  ;;  %v1016_v37 = vmax.f32 %v888_v46, %v952_v19  ;;  %v1017_v58 = vmax.f32 %v889_v54, %v953_v26  ;;  %v1021_v26 = vmax.f32 %v893_v45, %v957_v17  ;;  %v5484_v11 = vmul.f32 0.01, %v5382_v5 }
 0x24b   :  { %8382 = vst [vmem:[#allocation19_spill] sm:$0xff] %v5421_v32  ;;  %v1015_v32 = vmax.f32 %v887_v23, %v951_v4  ;;  %v5445_v23 = vmul.f32 %v5147_v63, %v8384_v61  ;;  %v1019_v19 = vmax.f32 %v891_v8, %v955_v1  ;;  %v959_v4 = vmul.f32 0.01, %v895_v14 }
 0x24c   :  { %v1080_v54 = vpack.c.bf16 %v1018_v13, %v1016_v37  ;;  %v5453_v13 = vadd.f32 %v5237_v31, %v5211_v15  ;;  %v962_v1 = vmul.f32 0.01, %v898_v43  ;;  %v5494_v57 = vmul.f32 0.01, %v5465_v6 }
 0x24d   :  { %v1079_v46 = vpack.c.bf16 %v1017_v58, %v1015_v32  ;;  %v1023_v63 = vmax.f32 %v895_v14, %v959_v4  ;;  %v960_v58 = vmul.f32 0.01, %v896_v53  ;;  %v1081_v37 = vpack.c.bf16 %v1021_v26, %v1019_v19 }
 0x24e   :  { %1373 = vmatmul.bf16.vlgmr.msrb.gmra.mxu3 %v1080_v54  ;;  %1551 = vmatmul.bf16.vlgmr.msra.gmra.mxu1 %v1080_v54  ;;  %v5472_v15 = vmul.f32 0.01, %v5453_v13  ;;  %v1082_v32 = vpack.c.bf16 %v1022_v28, %v1020_v48  ;;  %v1026_v45 = vmax.f32 %v898_v43, %v962_v1  ;;  %v5491_v14 = vmul.f32 0.01, %v5461_v27 }
 0x24f   :  { %1284 = vmatmul.bf16.vlgmr.msrb.gmra.mxu2 %v1079_v46  ;;  %1462 = vmatmul.bf16.vlgmr.msrb.gmra.mxu0 %v1079_v46  ;;  %v1024_v8 = vmax.f32 %v896_v53, %v960_v58  ;;  %v5486_v17 = vpack.c.bf16 %v1025_v33, %v1023_v63  ;;  %v969_v61 = vmul.f32 0.01, %v905_v20  ;;  %v1031_v10 = vmax.f32 %v903_v0, %v967_v34 }
 0x250   :  { %v1027_v38 = vmax.f32 %v5453_v13, %v5472_v15  ;;  %v906_v46 = vadd.f32 %v5251_v7, %v5241_v50  ;;  %v968_v40 = vmul.f32 0.01, %v904_v21  ;;  %v1029_v26 = vmax.f32 %v5457_v59, %v5477_v62  ;;  %v3795_v13 = vld [vmem:[%s8184_s3 + $0x3] ss:$8 sm:$0x3] }
 0x251   :  { %v5498_v19 = vpack.c.bf16 %v1026_v45, %v1024_v8  ;;  %v907_v54 = vadd.f32 %v5237_v31, %v5245_v35  ;;  %v909_v4 = vadd.f32 %v5237_v31, %v5255_v3  ;;  %v1033_v53 = vmax.f32 %v905_v20, %v969_v61 }
 0x252   :  { %v970_v48 = vmul.f32 0.01, %v906_v46  ;;  %v1032_v28 = vmax.f32 %v904_v21, %v968_v40  ;;  %v908_v43 = vadd.f32 %v5251_v7, %v5249_v56  ;;  %v910_v33 = vadd.f32 %v5251_v7, %v5259_v24 }
 0x253   :  { %v971_v63 = vmul.f32 0.01, %v907_v54  ;;  %v973_v50 = vmul.f32 0.01, %v909_v4  ;;  %v911_v58 = vadd.f32 %v5237_v31, %v5263_v49  ;;  %v5512_v1 = vpack.c.bf16 %v1033_v53, %v1031_v10 }
 0x254   :  { %v1034_v35 = vmax.f32 %v906_v46, %v970_v48  ;;  %v972_v42 = vmul.f32 0.01, %v908_v43  ;;  %v913_v3 = vadd.f32 %v5237_v31, %v5271_v30  ;;  %v974_v45 = vmul.f32 0.01, %v910_v33 }
 0x255   :  { %v1035_v0 = vmax.f32 %v907_v54, %v971_v63  ;;  %v1037_v8 = vmax.f32 %v909_v4, %v973_v50  ;;  %v975_v20 = vmul.f32 0.01, %v911_v58  ;;  %v912_v24 = vadd.f32 %v5251_v7, %v5267_v9 }
 0x256   :  { %v5516_v56 = vpack.c.bf16 %v1034_v35, %v1032_v28  ;;  %v1036_v34 = vmax.f32 %v908_v43, %v972_v42  ;;  %v977_v21 = vmul.f32 0.01, %v913_v3  ;;  %v1038_v49 = vmax.f32 %v910_v33, %v974_v45 }
 0x257   :  { %v5520_v61 = vpack.c.bf16 %v1037_v8, %v1035_v0  ;;  %v1039_v10 = vmax.f32 %v911_v58, %v975_v20  ;;  %v914_v46 = vadd.f32 %v5251_v7, %v5275_v18  ;;  %v976_v30 = vmul.f32 0.01, %v912_v24 }
 0x258   :  { %v1041_v40 = vmax.f32 %v913_v3, %v977_v21  ;;  %v915_v54 = vadd.f32 %v5237_v31, %v5279_v12  ;;  %v917_v4 = vadd.f32 %v5237_v31, %v5287_v22  ;;  %v5528_v53 = vpack.c.bf16 %v1038_v49, %v1036_v34 }
 0x259   :  { %v978_v9 = vmul.f32 0.01, %v914_v46  ;;  %v916_v48 = vadd.f32 %v5251_v7, %v5283_v39  ;;  %v918_v28 = vadd.f32 %v5251_v7, %v5291_v36  ;;  %v1040_v43 = vmax.f32 %v912_v24, %v976_v30 }
 0x25a   :  { %v5534_v18 = vpack.c.bf16 %v1041_v40, %v1039_v10  ;;  %v979_v12 = vmul.f32 0.01, %v915_v54  ;;  %v981_v63 = vmul.f32 0.01, %v917_v4  ;;  %v921_v39 = vadd.f32 %v5237_v31, %v5301_v29 }
 0x25b   :  { %v1042_v50 = vmax.f32 %v914_v46, %v978_v9  ;;  %v980_v22 = vmul.f32 0.01, %v916_v48  ;;  %v982_v33 = vmul.f32 0.01, %v918_v28  ;;  %v922_v36 = vadd.f32 %v5251_v7, %v5305_v51 }
 0x25c   :  { %v1043_v58 = vmax.f32 %v915_v54, %v979_v12  ;;  %v1045_v35 = vmax.f32 %v917_v4, %v981_v63  ;;  %v985_v45 = vmul.f32 0.01, %v921_v39  ;;  %v923_v29 = vadd.f32 %v5237_v31, %v5309_v25  ;;  %v8386_v54 = vld [vmem:[#allocation6_spill] sm:$0xff]  ;;  %v8387_v63 = vld [vmem:[#allocation7_spill] sm:$0xff] }
 0x25d   :  { %v1044_v42 = vmax.f32 %v916_v48, %v980_v22  ;;  %v1046_v3 = vmax.f32 %v918_v28, %v982_v33  ;;  %v986_v20 = vmul.f32 0.01, %v922_v36  ;;  %v925_v51 = vadd.f32 %v5237_v31, %v5315_v41  ;;  %v8388_v33 = vld [vmem:[#allocation8_spill] sm:$0xff] }
 0x25e   :  { %1378 = vmatmul.bf16.gmra.mxu3 %v1082_v32  ;;  %1556 = vmatmul.bf16.gmra.mxu1 %v1082_v32  ;;  %v5542_v32 = vpack.c.bf16 %v1042_v50, %v1040_v43  ;;  %v5544_v8 = vpack.c.bf16 %v1045_v35, %v1043_v58  ;;  %v1049_v24 = vmax.f32 %v921_v39, %v985_v45  ;;  %v988_v46 = vmul.f32 0.01, %v5385_v16  ;;  %v8389_v39 = vld [vmem:[#allocation14_spill] sm:$0xff] }
 0x25f   :  { %1289 = vmatmul.bf16.gmra.mxu2 %v1081_v37  ;;  %1467 = vmatmul.bf16.gmra.mxu0 %v1081_v37  ;;  %v919_v37 = vadd.f32 %v5237_v31, %v5295_v2  ;;  %v1048_v2 = vmax.f32 %v5382_v5, %v5484_v11  ;;  %v5548_v34 = vpack.c.bf16 %v1046_v3, %v1044_v42  ;;  %v987_v40 = vmul.f32 0.01, %v923_v29 }
 0x260   :  { %v1050_v49 = vmax.f32 %v922_v36, %v986_v20  ;;  %v926_v10 = vadd.f32 %v5251_v7, %v5319_v44  ;;  %v989_v30 = vmul.f32 0.01, %v925_v51  ;;  %v929_v5 = vadd.f32 %v5237_v31, %v8386_v54 }
 0x261   :  { %v983_v0 = vmul.f32 0.01, %v919_v37  ;;  %v991_v11 = vmul.f32 0.01, %v5388_v55  ;;  %v1052_v41 = vmax.f32 %v5385_v16, %v988_v46  ;;  %v1051_v48 = vmax.f32 %v923_v29, %v987_v40  ;;  %v8390_v16 = vld [vmem:[#allocation9_spill] sm:$0xff] }
 0x262   :  { %v5562_v25 = vpack.c.bf16 %v1050_v49, %v1048_v2  ;;  %v990_v9 = vmul.f32 0.01, %v926_v10  ;;  %v1053_v28 = vmax.f32 %v925_v51, %v989_v30  ;;  %v993_v43 = vmul.f32 0.01, %v929_v5  ;;  %v8393_v40 = vld [vmem:[#allocation25_spill] sm:$0xff] }
 0x263   :  { %v1047_v21 = vmax.f32 %v919_v37, %v983_v0  ;;  %v1055_v44 = vmax.f32 %v5388_v55, %v991_v11  ;;  %v930_v50 = vadd.f32 %v5251_v7, %v8387_v63  ;;  %v992_v22 = vmul.f32 0.01, %v5391_v52 }
 0x264   :  { %v1054_v12 = vmax.f32 %v926_v10, %v990_v9  ;;  %v933_v37 = vadd.f32 %v5237_v31, %v8388_v33  ;;  %v5571_v58 = vpack.c.bf16 %v1053_v28, %v1051_v48  ;;  %v1057_v35 = vmax.f32 %v929_v5, %v993_v43  ;;  %v8392_v10 = vld [vmem:[#allocation10_spill] sm:$0xff]  ;;  %v8394_v5 = vld [vmem:[#allocation11_spill] sm:$0xff]  ;;  %v8395_v9 = vld [vmem:[#allocation16_spill] sm:$0xff] }
 0x265   :  { %v5560_v4 = vpack.c.bf16 %v1049_v24, %v1047_v21  ;;  %v995_v36 = vmul.f32 0.01, %v8389_v39  ;;  %v934_v42 = vadd.f32 %v5251_v7, %v8390_v16  ;;  %v994_v55 = vmul.f32 0.01, %v930_v50  ;;  %v8391_v21 = vld [vmem:[#allocation15_spill] sm:$0xff] }
 0x266   :  { %v5576_v3 = vpack.c.bf16 %v1054_v12, %v1052_v41  ;;  %v1056_v0 = vmax.f32 %v5391_v52, %v992_v22  ;;  %v997_v45 = vmul.f32 0.01, %v933_v37  ;;  %v5579_v20 = vpack.c.bf16 %v1057_v35, %v1055_v44 }
 0x267   :  { %v1059_v2 = vmax.f32 %v8389_v39, %v995_v36  ;;  %v996_v29 = vmul.f32 0.01, %v8391_v21  ;;  %v998_v51 = vmul.f32 0.01, %v934_v42  ;;  %v1058_v24 = vmax.f32 %v930_v50, %v994_v55  ;;  %v8396_v50 = vld [vmem:[#allocation12_spill] sm:$0xff]  ;;  %v8398_v39 = vld [vmem:[#allocation13_spill] sm:$0xff] }
 0x268   :  { %v1061_v49 = vmax.f32 %v933_v37, %v997_v45  ;;  %v937_v46 = vadd.f32 %v5237_v31, %v8392_v10  ;;  %v999_v30 = vmul.f32 0.01, %v8393_v40  ;;  %v938_v11 = vadd.f32 %v5251_v7, %v8394_v5  ;;  %v8397_v37 = vld [vmem:[#allocation26_spill] sm:$0xff]  ;;  %v8399_v36 = vld [vmem:[#allocation17_spill] sm:$0xff]  ;;  %v8400_v45 = vld [vmem:[#allocation27_spill] sm:$0xff] }
 0x269   :  { %v1060_v52 = vmax.f32 %v8391_v21, %v996_v29  ;;  %v1062_v54 = vmax.f32 %v934_v42, %v998_v51  ;;  %v1000_v41 = vmul.f32 0.01, %v8395_v9  ;;  %v5594_v48 = vpack.c.bf16 %v1058_v24, %v1056_v0 }
 0x26a   :  { %v5596_v28 = vpack.c.bf16 %v1061_v49, %v1059_v2  ;;  %v1001_v43 = vmul.f32 0.01, %v937_v46  ;;  %v1063_v44 = vmax.f32 %v8393_v40, %v999_v30  ;;  %v1002_v12 = vmul.f32 0.01, %v938_v11 }
 0x26b   :  { %v1064_v63 = vmax.f32 %v8395_v9, %v1000_v41  ;;  %v941_v22 = vadd.f32 %v5237_v31, %v8396_v50  ;;  %v1003_v35 = vmul.f32 0.01, %v8397_v37  ;;  %v1004_v16 = vmul.f32 0.01, %v8399_v36  ;;  %v8402_v41 = vld [vmem:[#allocation28_spill] sm:$0xff] }
 0x26c   :  { %v1065_v33 = vmax.f32 %v937_v46, %v1001_v43  ;;  %v1066_v42 = vmax.f32 %v938_v11, %v1002_v12  ;;  %v945_v0 = vadd.f32 %v5237_v31, %v5437_v60  ;;  %v1007_v2 = vmul.f32 0.01, %v8400_v45  ;;  %v8401_v60 = vld [vmem:[#allocation18_spill] sm:$0xff] }
 0x26d   :  { %v1005_v55 = vmul.f32 0.01, %v941_v22  ;;  %v1067_v29 = vmax.f32 %v8397_v37, %v1003_v35  ;;  %v1068_v24 = vmax.f32 %v8399_v36, %v1004_v16  ;;  %v949_v5 = vadd.f32 %v5237_v31, %v5469_v47  ;;  %v8404_v35 = vld [vmem:[#allocation19_spill] sm:$0xff] }
 0x26e   :  { %1383 = vmatmul.bf16.gmra.mxu3 %v5498_v19  ;;  %1561 = vmatmul.bf16.gmra.mxu1 %v5498_v19  ;;  %v942_v19 = vadd.f32 %v5251_v7, %v8398_v39  ;;  %v5611_v21 = vpack.c.bf16 %v1065_v33, %v1063_v44  ;;  %v5615_v49 = vpack.c.bf16 %v1066_v42, %v1064_v63  ;;  %v1009_v46 = vmul.f32 0.01, %v945_v0  ;;  %v8403_v44 = vld [vmem:[#allocation34_spill] sm:$0xff] }
 0x26f   :  { %1294 = vmatmul.bf16.gmra.mxu2 %v5486_v17  ;;  %1472 = vmatmul.bf16.gmra.mxu0 %v5486_v17  ;;  %v5599_v17 = vpack.c.bf16 %v1062_v54, %v1060_v52  ;;  %v1069_v10 = vmax.f32 %v941_v22, %v1005_v55  ;;  %v1071_v40 = vmax.f32 %v8400_v45, %v1007_v2  ;;  %v1008_v54 = vmul.f32 0.01, %v8401_v60 }
 0x270   :  { %v1006_v51 = vmul.f32 0.01, %v942_v19  ;;  %v946_v52 = vadd.f32 %v5251_v7, %v5445_v23  ;;  %v1073_v9 = vmax.f32 %v945_v0, %v1009_v46  ;;  %v1011_v43 = vmul.f32 0.01, %v8402_v41 }
 0x271   :  { %v5623_v11 = vpack.c.bf16 %v1069_v10, %v1067_v29  ;;  %v950_v12 = vadd.f32 %v5251_v7, %v8403_v44  ;;  %v1072_v22 = vmax.f32 %v8401_v60, %v1008_v54  ;;  %v1013_v33 = vmul.f32 0.01, %v949_v5 }
 0x272   :  { %v1070_v30 = vmax.f32 %v942_v19, %v1006_v51  ;;  %v1010_v50 = vmul.f32 0.01, %v946_v52  ;;  %v5631_v23 = vpack.c.bf16 %v1073_v9, %v1071_v40  ;;  %v1075_v37 = vmax.f32 %v8402_v41, %v1011_v43 }
 0x273   :  { %v1012_v31 = vmul.f32 0.01, %v8404_v35  ;;  %v1014_v47 = vmul.f32 0.01, %v950_v12  ;;  %v1028_v39 = vmax.f32 %v5461_v27, %v5491_v14  ;;  %v1030_v19 = vmax.f32 %v5465_v6, %v5494_v57 }
 0x274   :  { %v5628_v63 = vpack.c.bf16 %v1070_v30, %v1068_v24  ;;  %v1074_v7 = vmax.f32 %v946_v52, %v1010_v50  ;;  %v1077_v36 = vmax.f32 %v949_v5, %v1013_v33  ;;  %v1085_v45 = vpack.c.bf16 %v1029_v26, %v1027_v38 }
 0x275   :  { %v1076_v16 = vmax.f32 %v8404_v35, %v1012_v31  ;;  %v1078_v42 = vmax.f32 %v950_v12, %v1014_v47  ;;  %v1086_v14 = vpack.c.bf16 %v1030_v19, %v1028_v39  ;;  %v5671_v59 = vperm.slane %v3795_v13, 1  ;;  %v4027_v31 = vld [vmem:[#allocation3 + $0x180] sm:$0xf]  ;;  %v4242_v47 = vld [vmem:[#allocation3 + $0x184] sm:$0xf0] }
 0x276   :  { %v5640_v55 = vpack.c.bf16 %v1074_v7, %v1072_v22  ;;  %v5642_v0 = vpack.c.bf16 %v1077_v36, %v1075_v37  ;;  %v5678_v57 = vperm.slane %v3795_v13, 0  ;;  %v4091_v39 = vld [vmem:[#allocation3 + $0x200] sm:$0xf]  ;;  %v4028_v7 = vor.u32 %v4242_v47, %v4027_v31  ;;  %v4258_v36 = vld [vmem:[#allocation3 + $0x204] sm:$0xf0] }
 0x277   :  { %v5650_v27 = vpack.c.bf16 %v1078_v42, %v1076_v16  ;;  %v4029_v13 = vld [vmem:[#allocation3 + $0x188] sm:$0xf0]  ;;  %v4240_v31 = vld [vmem:[#allocation3 + $0x174] sm:$0xf0]  ;;  %v4083_v47 = vld [vmem:[#allocation3 + $0x1f0] sm:$0xf] }
 0x278   :  { %2353 = vmatpush.bf16.msra.mxu2 %v4028_v7  ;;  %v4256_v7 = vld [vmem:[#allocation3 + $0x1f4] sm:$0xf0] }
 0x27e   :  { %1388 = vmatmul.bf16.gmra.mxu3 %v1086_v14  ;;  %1566 = vmatmul.bf16.gmra.mxu1 %v1086_v14 }
 0x27f   :  { %1299 = vmatmul.bf16.gmra.mxu2 %v1085_v45  ;;  %1477 = vmatmul.bf16.gmra.mxu0 %v1085_v45 }
 0x28e   :  { %1393 = vmatmul.bf16.gmra.mxu3 %v5516_v56  ;;  %1571 = vmatmul.bf16.gmra.mxu1 %v5516_v56 }
 0x28f   :  { %1304 = vmatmul.bf16.gmra.mxu2 %v5512_v1  ;;  %1482 = vmatmul.bf16.gmra.mxu0 %v5512_v1 }
 0x29e   :  { %1398 = vmatmul.bf16.gmra.mxu3 %v5528_v53  ;;  %1576 = vmatmul.bf16.gmra.mxu1 %v5528_v53 }
 0x29f   :  { %1309 = vmatmul.bf16.gmra.mxu2 %v5520_v61  ;;  %1487 = vmatmul.bf16.gmra.mxu0 %v5520_v61 }
 0x2ae   :  { %1403 = vmatmul.bf16.gmra.mxu3 %v5542_v32  ;;  %1581 = vmatmul.bf16.gmra.mxu1 %v5542_v32 }
 0x2af   :  { %1314 = vmatmul.bf16.gmra.mxu2 %v5534_v18  ;;  %1492 = vmatmul.bf16.gmra.mxu0 %v5534_v18 }
 0x2be   :  { %1408 = vmatmul.bf16.gmra.mxu3 %v5548_v34  ;;  %1586 = vmatmul.bf16.gmra.mxu1 %v5548_v34 }
 0x2bf   :  { %1319 = vmatmul.bf16.gmra.mxu2 %v5544_v8  ;;  %1497 = vmatmul.bf16.gmra.mxu0 %v5544_v8 }
 0x2cb   :  { %v1552_v62 = vpop.f32.mrf.mxu1 }
 0x2cc   :  { %v1463_v6 = vpop.f32.mrf.mxu0 }
 0x2cd   :  { %v1464_v15 = vadd.f32 %v1463_v6, %v5671_v59 }
 0x2ce   :  { %1413 = vmatmul.bf16.gmra.mxu3 %v5562_v25  ;;  %1591 = vmatmul.bf16.gmra.mxu1 %v5562_v25 }
 0x2cf   :  { %v5674_v38 = vadd.f32 %v1552_v62, %v1464_v15  ;;  %1324 = vmatmul.bf16.gmra.mxu2 %v5560_v4  ;;  %1502 = vmatmul.bf16.gmra.mxu0 %v5560_v4 }
 0x2d1   :  { %8405 = vst [vmem:[#allocation29_spill] sm:$0xff] %v5674_v38  ;;  %v1374_v56 = vpop.f32.mrf.mxu3 }
 0x2d2   :  { %v1285_v26 = vpop.f32.mrf.mxu2 }
 0x2d3   :  { %v1286_v1 = vadd.f32 %v1285_v26, %v5678_v57  ;;  %v1554_v32 = vpop.f32.mrf.mxu1 }
 0x2d4   :  { %v1465_v61 = vpop.f32.mrf.mxu0 }
 0x2d5   :  { %v5683_v53 = vadd.f32 %v1374_v56, %v1286_v1  ;;  %v1466_v18 = vadd.f32 %v1465_v61, %v5671_v59  ;;  %v4257_v1 = vld [vmem:[#allocation3 + $0x204] sm:$0xf]  ;;  %v4093_v56 = vld [vmem:[#allocation3 + $0x208] sm:$0xf0] }
 0x2d7   :  { %8406 = vst [vmem:[#allocation20_spill] sm:$0xff] %v5683_v53  ;;  %v5686_v8 = vadd.f32 %v1554_v32, %v1466_v18  ;;  %v4096_v18 = vor.u32 %v4257_v1, %v4093_v56 }
 0x2d9   :  { %8407 = vst [vmem:[#allocation30_spill] sm:$0xff] %v5686_v8  ;;  %v1376_v2 = vpop.f32.mrf.mxu3  ;;  %2620 = vmatpush.bf16.msrb.mxu1 %v4096_v18 }
 0x2da   :  { %v1287_v34 = vpop.f32.mrf.mxu2 }
 0x2db   :  { %v1288_v4 = vadd.f32 %v1287_v34, %v5678_v57  ;;  %v1557_v24 = vpop.f32.mrf.mxu1 }
 0x2dc   :  { %v1468_v29 = vpop.f32.mrf.mxu0 }
 0x2dd   :  { %v5689_v51 = vadd.f32 %v1376_v2, %v1288_v4  ;;  %v1469_v25 = vadd.f32 %v1468_v29, %v5671_v59 }
 0x2de   :  { %1418 = vmatmul.bf16.gmra.mxu3 %v5576_v3  ;;  %1596 = vmatmul.bf16.gmra.mxu1 %v5576_v3 }
 0x2df   :  { %8408 = vst [vmem:[#allocation21_spill] sm:$0xff] %v5689_v51  ;;  %v5692_v10 = vadd.f32 %v1557_v24, %v1469_v25  ;;  %1329 = vmatmul.bf16.gmra.mxu2 %v5571_v58  ;;  %1507 = vmatmul.bf16.gmra.mxu0 %v5571_v58 }
 0x2e1   :  { %8409 = vst [vmem:[#allocation31_spill] sm:$0xff] %v5692_v10  ;;  %v1379_v30 = vpop.f32.mrf.mxu3 }
 0x2e2   :  { %v1290_v46 = vpop.f32.mrf.mxu2 }
 0x2e3   :  { %v1291_v40 = vadd.f32 %v1290_v46, %v5678_v57  ;;  %v1559_v5 = vpop.f32.mrf.mxu1 }
 0x2e4   :  { %v1470_v52 = vpop.f32.mrf.mxu0 }
 0x2e5   :  { %v5699_v60 = vadd.f32 %v1379_v30, %v1291_v40  ;;  %v1471_v54 = vadd.f32 %v1470_v52, %v5671_v59 }
 0x2e7   :  { %8410 = vst [vmem:[#allocation23_spill] sm:$0xff] %v5699_v60  ;;  %v5702_v9 = vadd.f32 %v1559_v5, %v1471_v54 }
 0x2e9   :  { %8411 = vst [vmem:[#allocation33_spill] sm:$0xff] %v5702_v9  ;;  %v1381_v58 = vpop.f32.mrf.mxu3 }
 0x2ea   :  { %v1292_v41 = vpop.f32.mrf.mxu2 }
 0x2eb   :  { %v1293_v43 = vadd.f32 %v1292_v41, %v5678_v57  ;;  %v1562_v50 = vpop.f32.mrf.mxu1 }
 0x2ec   :  { %v1473_v44 = vpop.f32.mrf.mxu0 }
 0x2ed   :  { %v5705_v12 = vadd.f32 %v1381_v58, %v1293_v43  ;;  %v1474_v3 = vadd.f32 %v1473_v44, %v5671_v59 }
 0x2ee   :  { %1423 = vmatmul.bf16.gmra.mxu3 %v5594_v48  ;;  %1601 = vmatmul.bf16.gmra.mxu1 %v5594_v48  ;;  %v4241_v48 = vld [vmem:[#allocation3 + $0x184] sm:$0xf] }
 0x2ef   :  { %v5708_v22 = vadd.f32 %v1562_v50, %v1474_v3  ;;  %1334 = vmatmul.bf16.gmra.mxu2 %v5579_v20  ;;  %1512 = vmatmul.bf16.gmra.mxu0 %v5579_v20  ;;  %v4092_v20 = vor.u32 %v4258_v36, %v4091_v39  ;;  %v4032_v15 = vor.u32 %v4241_v48, %v4029_v13 }
 0x2f1   :  { %8412 = vst [vmem:[#allocation22_spill] sm:$0xff] %v5708_v22  ;;  %v1384_v35 = vpop.f32.mrf.mxu3  ;;  %2442 = vmatpush.bf16.msra.mxu3 %v4092_v20  ;;  %2531 = vmatpush.bf16.msra.mxu0 %v4032_v15  ;;  %v4085_v15 = vld [vmem:[#allocation3 + $0x1f8] sm:$0xf0] }
 0x2f2   :  { %v1295_v33 = vpop.f32.mrf.mxu2 }
 0x2f3   :  { %v1296_v37 = vadd.f32 %v1295_v33, %v5678_v57  ;;  %v1564_v45 = vpop.f32.mrf.mxu1 }
 0x2f4   :  { %v1475_v19 = vpop.f32.mrf.mxu0 }
 0x2f5   :  { %v5715_v16 = vadd.f32 %v1384_v35, %v1296_v37  ;;  %v1476_v42 = vadd.f32 %v1475_v19, %v5671_v59  ;;  %v4019_v35 = vld [vmem:[#allocation3 + $0x170] sm:$0xf] }
 0x2f6   :  { %v4020_v19 = vor.u32 %v4240_v31, %v4019_v35  ;;  %v4254_v35 = vld [vmem:[#allocation3 + $0x1e4] sm:$0xf0] }
 0x2f7   :  { %v5718_v14 = vadd.f32 %v1564_v45, %v1476_v42  ;;  %v4239_v45 = vld [vmem:[#allocation3 + $0x174] sm:$0xf] }
 0x2f8   :  { %2354 = vmatpush.bf16.msra.mxu2 %v4020_v19  ;;  %v4237_v19 = vld [vmem:[#allocation3 + $0x164] sm:$0xf] }
 0x2f9   :  { %v1386_v26 = vpop.f32.mrf.mxu3 }
 0x2fa   :  { %v1297_v6 = vpop.f32.mrf.mxu2 }
 0x2fb   :  { %v1298_v62 = vadd.f32 %v1297_v6, %v5678_v57  ;;  %v1567_v4 = vpop.f32.mrf.mxu1  ;;  %v4255_v6 = vld [vmem:[#allocation3 + $0x1f4] sm:$0xf] }
 0x2fc   :  { %v1478_v61 = vpop.f32.mrf.mxu0 }
 0x2fd   :  { %v5721_v32 = vadd.f32 %v1386_v26, %v1298_v62  ;;  %v1479_v34 = vadd.f32 %v1478_v61, %v5671_v59  ;;  %v4088_v26 = vor.u32 %v4255_v6, %v4085_v15 }
 0x2fe   :  { %1428 = vmatmul.bf16.gmra.mxu3 %v5599_v17  ;;  %1606 = vmatmul.bf16.gmra.mxu1 %v5599_v17 }
 0x2ff   :  { %v5724_v2 = vadd.f32 %v1567_v4, %v1479_v34  ;;  %1339 = vmatmul.bf16.gmra.mxu2 %v5596_v28  ;;  %1517 = vmatmul.bf16.gmra.mxu0 %v5596_v28 }
 0x300   :  { %2621 = vmatpush.bf16.msrb.mxu1 %v4088_v26 }
 0x301   :  { %v1389_v24 = vpop.f32.mrf.mxu3 }
 0x302   :  { %v1300_v29 = vpop.f32.mrf.mxu2 }
 0x303   :  { %v1301_v25 = vadd.f32 %v1300_v29, %v5678_v57  ;;  %v1569_v52 = vpop.f32.mrf.mxu1 }
 0x304   :  { %v1480_v46 = vpop.f32.mrf.mxu0 }
 0x305   :  { %v5731_v40 = vadd.f32 %v1389_v24, %v1301_v25  ;;  %v1481_v30 = vadd.f32 %v1480_v46, %v5671_v59 }
 0x307   :  { %v5734_v54 = vadd.f32 %v1569_v52, %v1481_v30 }
 0x309   :  { %v1391_v28 = vpop.f32.mrf.mxu3 }
 0x30a   :  { %v1302_v5 = vpop.f32.mrf.mxu2 }
 0x30b   :  { %v1303_v41 = vadd.f32 %v1302_v5, %v5678_v57  ;;  %v1572_v44 = vpop.f32.mrf.mxu1 }
 0x30c   :  { %v1483_v43 = vpop.f32.mrf.mxu0 }
 0x30d   :  { %v5737_v58 = vadd.f32 %v1391_v28, %v1303_v41  ;;  %v1484_v17 = vadd.f32 %v1483_v43, %v5671_v59 }
 0x30e   :  { %1433 = vmatmul.bf16.gmra.mxu3 %v5615_v49  ;;  %1611 = vmatmul.bf16.gmra.mxu1 %v5615_v49  ;;  %v4021_v49 = vld [vmem:[#allocation3 + $0x178] sm:$0xf0] }
 0x30f   :  { %v5740_v3 = vadd.f32 %v1572_v44, %v1484_v17  ;;  %1344 = vmatmul.bf16.gmra.mxu2 %v5611_v21  ;;  %1522 = vmatmul.bf16.gmra.mxu0 %v5611_v21  ;;  %v4084_v21 = vor.u32 %v4256_v7, %v4083_v47  ;;  %v4024_v48 = vor.u32 %v4239_v45, %v4021_v49  ;;  %v4011_v17 = vld [vmem:[#allocation3 + $0x160] sm:$0xf]  ;;  %v4238_v44 = vld [vmem:[#allocation3 + $0x164] sm:$0xf0]  ;;  %v4253_v49 = vld [vmem:[#allocation3 + $0x1e4] sm:$0xf] }
 0x311   :  { %v1394_v37 = vpop.f32.mrf.mxu3  ;;  %2443 = vmatpush.bf16.msra.mxu3 %v4084_v21  ;;  %2532 = vmatpush.bf16.msra.mxu0 %v4024_v48  ;;  %v4077_v48 = vld [vmem:[#allocation3 + $0x1e8] sm:$0xf0] }
 0x312   :  { %v1305_v50 = vpop.f32.mrf.mxu2  ;;  %v4080_v15 = vor.u32 %v4253_v49, %v4077_v48 }
 0x313   :  { %v1306_v33 = vadd.f32 %v1305_v50, %v5678_v57  ;;  %v5751_v42 = vpop.f32.mrf.mxu1  ;;  %v4075_v50 = vld [vmem:[#allocation3 + $0x1e0] sm:$0xf] }
 0x314   :  { %v5747_v39 = vpop.f32.mrf.mxu0  ;;  %2622 = vmatpush.bf16.msrb.mxu1 %v4080_v15  ;;  %v4235_v15 = vld [vmem:[#allocation3 + $0x154] sm:$0xf] }
 0x315   :  { %v5749_v36 = vadd.f32 %v1394_v37, %v1306_v33  ;;  %v4012_v37 = vor.u32 %v4238_v44, %v4011_v17 }
 0x317   :  { %2355 = vmatpush.bf16.msra.mxu2 %v4012_v37  ;;  %v4003_v37 = vld [vmem:[#allocation3 + $0x150] sm:$0xf] }
 0x319   :  { %v5755_v13 = vpop.f32.mrf.mxu3 }
 0x31a   :  { %v5753_v20 = vpop.f32.mrf.mxu2 }
 0x31b   :  { %v1577_v56 = vpop.f32.mrf.mxu1 }
 0x31c   :  { %v1488_v62 = vpop.f32.mrf.mxu0 }
 0x31d   :  { %v1489_v1 = vadd.f32 %v1488_v62, %v5671_v59 }
 0x31e   :  { %1438 = vmatmul.bf16.gmra.mxu3 %v5628_v63  ;;  %1616 = vmatmul.bf16.gmra.mxu1 %v5628_v63 }
 0x31f   :  { %v5758_v61 = vadd.f32 %v1577_v56, %v1489_v1  ;;  %1349 = vmatmul.bf16.gmra.mxu2 %v5623_v11  ;;  %1527 = vmatmul.bf16.gmra.mxu0 %v5623_v11 }
 0x321   :  { %v1399_v4 = vpop.f32.mrf.mxu3 }
 0x322   :  { %v1310_v18 = vpop.f32.mrf.mxu2 }
 0x323   :  { %v1311_v34 = vadd.f32 %v1310_v18, %v5678_v57  ;;  %v5769_v24 = vpop.f32.mrf.mxu1 }
 0x324   :  { %v5765_v29 = vpop.f32.mrf.mxu0 }
 0x325   :  { %v5767_v25 = vadd.f32 %v1399_v4, %v1311_v34 }
 0x329   :  { %v5773_v30 = vpop.f32.mrf.mxu3 }
 0x32a   :  { %v5771_v46 = vpop.f32.mrf.mxu2 }
 0x32b   :  { %v1582_v5 = vpop.f32.mrf.mxu1 }
 0x32c   :  { %v1493_v52 = vpop.f32.mrf.mxu0 }
 0x32d   :  { %v1494_v11 = vadd.f32 %v1493_v52, %v5671_v59 }
 0x32e   :  { %1443 = vmatmul.bf16.gmra.mxu3 %v5640_v55  ;;  %1621 = vmatmul.bf16.gmra.mxu1 %v5640_v55  ;;  %v4013_v55 = vld [vmem:[#allocation3 + $0x168] sm:$0xf0] }
 0x32f   :  { %v5776_v41 = vadd.f32 %v1582_v5, %v1494_v11  ;;  %1354 = vmatmul.bf16.gmra.mxu2 %v5631_v23  ;;  %1532 = vmatmul.bf16.gmra.mxu0 %v5631_v23  ;;  %v4076_v23 = vor.u32 %v4254_v35, %v4075_v50  ;;  %v4016_v21 = vor.u32 %v4237_v19, %v4013_v55  ;;  %v4236_v35 = vld [vmem:[#allocation3 + $0x154] sm:$0xf0] }
 0x330   :  { %v4004_v55 = vor.u32 %v4236_v35, %v4003_v37 }
 0x331   :  { %v1404_v43 = vpop.f32.mrf.mxu3  ;;  %2444 = vmatpush.bf16.msra.mxu3 %v4076_v23  ;;  %2533 = vmatpush.bf16.msra.mxu0 %v4016_v21  ;;  %v4067_v23 = vld [vmem:[#allocation3 + $0x1d0] sm:$0xf]  ;;  %v4252_v21 = vld [vmem:[#allocation3 + $0x1d4] sm:$0xf0] }
 0x332   :  { %v1315_v63 = vpop.f32.mrf.mxu2  ;;  %2356 = vmatpush.bf16.msra.mxu2 %v4004_v55 }
 0x333   :  { %v1316_v28 = vadd.f32 %v1315_v63, %v5678_v57  ;;  %v5787_v47 = vpop.f32.mrf.mxu1 }
 0x334   :  { %v5783_v33 = vpop.f32.mrf.mxu0 }
 0x335   :  { %v5785_v31 = vadd.f32 %v1404_v43, %v1316_v28 }
 0x339   :  { %v5791_v45 = vpop.f32.mrf.mxu3 }
 0x33a   :  { %v5789_v7 = vpop.f32.mrf.mxu2 }
 0x33b   :  { %v1587_v26 = vpop.f32.mrf.mxu1 }
 0x33c   :  { %v1498_v6 = vpop.f32.mrf.mxu0 }
 0x33d   :  { %v1499_v62 = vadd.f32 %v1498_v6, %v5671_v59  ;;  %v4068_v6 = vor.u32 %v4252_v21, %v4067_v23 }
 0x33e   :  { %1448 = vmatmul.bf16.gmra.mxu3 %v5650_v27  ;;  %1626 = vmatmul.bf16.gmra.mxu1 %v5650_v27 }
 0x33f   :  { %v5794_v1 = vadd.f32 %v1587_v26, %v1499_v62  ;;  %1359 = vmatmul.bf16.gmra.mxu2 %v5642_v0  ;;  %1537 = vmatmul.bf16.gmra.mxu0 %v5642_v0  ;;  %v4005_v62 = vld [vmem:[#allocation3 + $0x158] sm:$0xf0] }
 0x340   :  { %2445 = vmatpush.bf16.msra.mxu3 %v4068_v6 }
 0x341   :  { %8413 = vst [vmem:[#allocation32_spill] sm:$0xff] %v5794_v1  ;;  %v1409_v34 = vpop.f32.mrf.mxu3 }
 0x342   :  { %v1320_v56 = vpop.f32.mrf.mxu2 }
 0x343   :  { %v1321_v18 = vadd.f32 %v1320_v56, %v5678_v57  ;;  %v5805_v11 = vpop.f32.mrf.mxu1  ;;  %v4008_v56 = vor.u32 %v4235_v15, %v4005_v62 }
 0x344   :  { %v5801_v4 = vpop.f32.mrf.mxu0 }
 0x345   :  { %v5803_v52 = vadd.f32 %v1409_v34, %v1321_v18  ;;  %v4251_v34 = vld [vmem:[#allocation3 + $0x1d4] sm:$0xf]  ;;  %2534 = vmatpush.bf16.msra.mxu0 %v4008_v56 }
 0x347   :  { %8414 = vst [vmem:[#allocation24_spill] sm:$0xff] %v5803_v52  ;;  %v4249_v52 = vld [vmem:[#allocation3 + $0x1c4] sm:$0xf] }
 0x349   :  { %v5809_v63 = vpop.f32.mrf.mxu3 }
 0x34a   :  { %v5807_v5 = vpop.f32.mrf.mxu2  ;;  %8415 = vst [vmem:[#allocation6_spill] sm:$0xff] %v5809_v63 }
 0x34b   :  { %v1592_v43 = vpop.f32.mrf.mxu1 }
 0x34c   :  { %v1503_v28 = vpop.f32.mrf.mxu0 }
 0x34d   :  { %v1504_v0 = vadd.f32 %v1503_v28, %v5671_v59  ;;  %v4069_v28 = vld [vmem:[#allocation3 + $0x1d8] sm:$0xf0] }
 0x34f   :  { %v5812_v17 = vadd.f32 %v1592_v43, %v1504_v0  ;;  %v4072_v43 = vor.u32 %v4251_v34, %v4069_v28 }
 0x351   :  { %8416 = vst [vmem:[#allocation7_spill] sm:$0xff] %v5812_v17  ;;  %v1414_v50 = vpop.f32.mrf.mxu3  ;;  %2623 = vmatpush.bf16.msrb.mxu1 %v4072_v43 }
 0x352   :  { %v1325_v27 = vpop.f32.mrf.mxu2 }
 0x353   :  { %v1326_v44 = vadd.f32 %v1325_v27, %v5678_v57  ;;  %v5819_v48 = vpop.f32.mrf.mxu1 }
 0x354   :  { %v5815_v19 = vpop.f32.mrf.mxu0 }
 0x355   :  { %v5817_v49 = vadd.f32 %v1414_v50, %v1326_v44 }
 0x357   :  { %8417 = vst [vmem:[#allocation8_spill] sm:$0xff] %v5817_v49  ;;  %v4234_v49 = vld [vmem:[#allocation3 + $0x144] sm:$0xf0] }
 0x359   :  { %v5823_v18 = vpop.f32.mrf.mxu3 }
 0x35a   :  { %v5821_v26 = vpop.f32.mrf.mxu2  ;;  %8419 = vst [vmem:[#allocation9_spill] sm:$0xff] %v5823_v18  ;;  %v4250_v18 = vld [vmem:[#allocation3 + $0x1c4] sm:$0xf0] }
 0x35b   :  { %8418 = vst [vmem:[#allocation14_spill] sm:$0xff] %v5821_v26  ;;  %v1597_v44 = vpop.f32.mrf.mxu1 }
 0x35c   :  { %v1508_v0 = vpop.f32.mrf.mxu0 }
 0x35d   :  { %v1509_v27 = vadd.f32 %v1508_v0, %v5671_v59 }
 0x35f   :  { %v5826_v50 = vadd.f32 %v1597_v44, %v1509_v27 }
 0x361   :  { %8420 = vst [vmem:[#allocation15_spill] sm:$0xff] %v5826_v50  ;;  %v1419_v23 = vpop.f32.mrf.mxu3  ;;  %v4061_v50 = vld [vmem:[#allocation3 + $0x1c8] sm:$0xf0] }
 0x362   :  { %v1330_v37 = vpop.f32.mrf.mxu2 }
 0x363   :  { %v1331_v35 = vadd.f32 %v1330_v37, %v5678_v57  ;;  %v5833_v6 = vpop.f32.mrf.mxu1  ;;  %v3995_v37 = vld [vmem:[#allocation3 + $0x140] sm:$0xf] }
 0x364   :  { %v5829_v55 = vpop.f32.mrf.mxu0 }
 0x365   :  { %v5831_v21 = vadd.f32 %v1419_v23, %v1331_v35  ;;  %v4059_v35 = vld [vmem:[#allocation3 + $0x1c0] sm:$0xf] }
 0x366   :  { %v4060_v26 = vor.u32 %v4250_v18, %v4059_v35 }
 0x367   :  { %8421 = vst [vmem:[#allocation10_spill] sm:$0xff] %v5831_v21  ;;  %v3996_v21 = vor.u32 %v4234_v49, %v3995_v37  ;;  %v4064_v49 = vor.u32 %v4249_v52, %v4061_v50  ;;  %v1711_v37 = vmul.f32 %v5686_v8, %v5686_v8  ;;  %v1713_v52 = vmul.f32 %v5692_v10, %v5692_v10 }
 0x368   :  { %2446 = vmatpush.bf16.msra.mxu3 %v4060_v26 }
 0x369   :  { %v5837_v62 = vpop.f32.mrf.mxu3  ;;  %2357 = vmatpush.bf16.msra.mxu2 %v3996_v21  ;;  %2624 = vmatpush.bf16.msrb.mxu1 %v4064_v49 }
 0x36a   :  { %v5835_v15 = vpop.f32.mrf.mxu2  ;;  %8423 = vst [vmem:[#allocation11_spill] sm:$0xff] %v5837_v62 }
 0x36b   :  { %8422 = vst [vmem:[#allocation25_spill] sm:$0xff] %v5835_v15  ;;  %v1602_v28 = vpop.f32.mrf.mxu1 }
 0x36c   :  { %v1513_v56 = vpop.f32.mrf.mxu0 }
 0x36d   :  { %v1514_v34 = vadd.f32 %v1513_v56, %v5671_v59  ;;  %v4233_v56 = vld [vmem:[#allocation3 + $0x144] sm:$0xf] }
 0x36f   :  { %v5840_v0 = vadd.f32 %v1602_v28, %v1514_v34  ;;  %v3997_v34 = vld [vmem:[#allocation3 + $0x148] sm:$0xf0] }
 0x371   :  { %8424 = vst [vmem:[#allocation16_spill] sm:$0xff] %v5840_v0  ;;  %v1424_v44 = vpop.f32.mrf.mxu3 }
 0x372   :  { %v1335_v43 = vpop.f32.mrf.mxu2 }
 0x373   :  { %v1336_v27 = vadd.f32 %v1335_v43, %v5678_v57  ;;  %v5847_v62 = vpop.f32.mrf.mxu1  ;;  %v4000_v43 = vor.u32 %v4233_v56, %v3997_v34  ;;  %v1709_v56 = vmul.f32 %v5674_v38, %v5674_v38 }
 0x374   :  { %v5843_v23 = vpop.f32.mrf.mxu0 }
 0x375   :  { %v5845_v15 = vadd.f32 %v1424_v44, %v1336_v27  ;;  %2535 = vmatpush.bf16.msra.mxu0 %v4000_v43  ;;  %v1669_v43 = vadd.f32 %v5686_v8, %v5674_v38  ;;  %v1809_v49 = vadd.f32 %v1711_v37, %v1709_v56  ;;  %v1632_v37 = vadd.f32 %v5689_v51, %v5683_v53 }
 0x376   :  { %v1712_v56 = vmul.f32 %v5699_v60, %v5699_v60 }
 0x377   :  { %8425 = vst [vmem:[#allocation12_spill] sm:$0xff] %v5845_v15 }
 0x379   :  { %v5851_v0 = vpop.f32.mrf.mxu3 }
 0x37a   :  { %v5849_v28 = vpop.f32.mrf.mxu2  ;;  %8427 = vst [vmem:[#allocation13_spill] sm:$0xff] %v5851_v0  ;;  %v1670_v0 = vadd.f32 %v1669_v43, %v5692_v10  ;;  %v1486_v10 = vadd.f32 %v5747_v39, %v5671_v59 }
 0x37b   :  { %8426 = vst [vmem:[#allocation26_spill] sm:$0xff] %v5849_v28  ;;  %v5855_v27 = vpop.f32.mrf.mxu1  ;;  %v1708_v28 = vmul.f32 %v5683_v53, %v5683_v53 }
 0x37c   :  { %v5853_v63 = vpop.f32.mrf.mxu0  ;;  %8428 = vst [vmem:[#allocation17_spill] sm:$0xff] %v5855_v27  ;;  %v1671_v8 = vadd.f32 %v1670_v0, %v5702_v9  ;;  %v1721_v0 = vmul.f32 %v5724_v2, %v5724_v2 }
 0x381   :  { %v5859_v18 = vpop.f32.mrf.mxu3 }
 0x382   :  { %v5857_v44 = vpop.f32.mrf.mxu2  ;;  %8430 = vst [vmem:[#allocation18_spill] sm:$0xff] %v5859_v18  ;;  %v1715_v18 = vmul.f32 %v5702_v9, %v5702_v9 }
 0x383   :  { %8429 = vst [vmem:[#allocation27_spill] sm:$0xff] %v5857_v44  ;;  %v5863_v21 = vpop.f32.mrf.mxu1  ;;  %v1810_v44 = vadd.f32 %v1809_v49, %v1713_v52  ;;  %v1633_v52 = vadd.f32 %v1632_v37, %v5699_v60  ;;  %v1714_v49 = vmul.f32 %v5705_v12, %v5705_v12  ;;  %v1716_v60 = vmul.f32 %v5715_v16, %v5715_v16 }
 0x384   :  { %v5861_v26 = vpop.f32.mrf.mxu0  ;;  %8431 = vst [vmem:[#allocation28_spill] sm:$0xff] %v5863_v21 }
 0x385   :  { %v1811_v38 = vadd.f32 %v1810_v44, %v1715_v18  ;;  %v3987_v18 = vld [vmem:[#allocation3 + $0x130] sm:$0xf]  ;;  %v1634_v9 = vadd.f32 %v1633_v52, %v5705_v12  ;;  %v1491_v52 = vadd.f32 %v5765_v29, %v5671_v59 }
 0x389   :  { %v5873_v50 = vpop.f32.mrf.mxu3 }
 0x38a   :  { %v5867_v35 = vpop.f32.mrf.mxu2  ;;  %8433 = vst [vmem:[#allocation19_spill] sm:$0xff] %v5873_v50  ;;  %v1717_v50 = vmul.f32 %v5708_v22, %v5708_v22 }
 0x38b   :  { %8432 = vst [vmem:[#allocation34_spill] sm:$0xff] %v5867_v35  ;;  %v5881_v15 = vpop.f32.mrf.mxu1  ;;  %v1710_v35 = vmul.f32 %v5689_v51, %v5689_v51  ;;  %v1672_v51 = vadd.f32 %v1671_v8, %v5708_v22 }
 0x38c   :  { %v5875_v34 = vpop.f32.mrf.mxu0  ;;  %8435 = vst [vmem:[#allocation36_spill] sm:$0xff] %v5881_v15  ;;  %v1719_v15 = vmul.f32 %v5718_v14, %v5718_v14  ;;  %v1812_v53 = vadd.f32 %v1811_v38, %v1717_v50  ;;  %v1723_v50 = vmul.f32 %v5734_v54, %v5734_v54 }
 0x38d   :  { %8434 = vst [vmem:[#allocation35_spill] sm:$0xff] %v5875_v34  ;;  %v1772_v43 = vadd.f32 %v1710_v35, %v1708_v28  ;;  %v4232_v28 = vld [vmem:[#allocation3 + $0x134] sm:$0xf0]  ;;  %v4051_v35 = vld [vmem:[#allocation3 + $0x1b0] sm:$0xf]  ;;  %v1673_v38 = vadd.f32 %v1672_v51, %v5718_v14  ;;  %v1718_v51 = vmul.f32 %v5721_v32, %v5721_v32 }
 0x38e   :  { %v4248_v34 = vld [vmem:[#allocation3 + $0x1b4] sm:$0xf0]  ;;  %v1813_v8 = vadd.f32 %v1812_v53, %v1719_v15 }
 0x38f   :  { %v1773_v37 = vadd.f32 %v1772_v43, %v1712_v56  ;;  %v1635_v56 = vadd.f32 %v1634_v9, %v5715_v16  ;;  %v5921_v43 = vadd.f32 %v5751_v42, %v1486_v10  ;;  %v1674_v53 = vadd.f32 %v1673_v38, %v5724_v2 }
 0x390   :  { %v1814_v15 = vadd.f32 %v1813_v8, %v1721_v0  ;;  %v1725_v9 = vmul.f32 %v5740_v3, %v5740_v3  ;;  %v1720_v10 = vmul.f32 %v5731_v40, %v5731_v40  ;;  %v1722_v38 = vmul.f32 %v5737_v58, %v5737_v58 }
 0x391   :  { %v5907_v44 = vpop.f32.mrf.mxu3  ;;  %v1774_v27 = vadd.f32 %v1773_v37, %v1714_v49  ;;  %v1675_v42 = vadd.f32 %v1674_v53, %v5734_v54  ;;  %v4231_v49 = vld [vmem:[#allocation3 + $0x134] sm:$0xf]  ;;  %v1727_v0 = vmul.f32 %v5921_v43, %v5921_v43 }
 0x392   :  { %v5902_v21 = vpop.f32.mrf.mxu2  ;;  %8437 = vst [vmem:[#allocation38_spill] sm:$0xff] %v5907_v44  ;;  %v4052_v44 = vor.u32 %v4248_v34, %v4051_v35  ;;  %v1636_v34 = vadd.f32 %v1635_v56, %v5721_v32  ;;  %v1815_v29 = vadd.f32 %v1814_v15, %v1723_v50  ;;  %v4247_v50 = vld [vmem:[#allocation3 + $0x1b4] sm:$0xf]  ;;  %v4053_v56 = vld [vmem:[#allocation3 + $0x1b8] sm:$0xf0] }
 0x393   :  { %8436 = vst [vmem:[#allocation37_spill] sm:$0xff] %v5902_v21  ;;  %v3988_v21 = vor.u32 %v4232_v28, %v3987_v18  ;;  %v5917_v22 = vpop.f32.mrf.mxu1  ;;  %v1775_v18 = vadd.f32 %v1774_v27, %v1716_v60  ;;  %v3989_v28 = vld [vmem:[#allocation3 + $0x138] sm:$0xf0]  ;;  %v5939_v60 = vadd.f32 %v5769_v24, %v1491_v52  ;;  %v1496_v27 = vadd.f32 %v5783_v33, %v5671_v59 }
 0x394   :  { %v5912_v39 = vpop.f32.mrf.mxu0  ;;  %2447 = vmatpush.bf16.msra.mxu3 %v4052_v44  ;;  %v3992_v35 = vor.u32 %v4231_v49, %v3989_v28  ;;  %v1637_v53 = vadd.f32 %v1636_v34, %v5731_v40  ;;  %v1816_v24 = vadd.f32 %v1815_v29, %v1725_v9  ;;  %v1729_v52 = vmul.f32 %v5758_v61, %v5758_v61 }
 0x395   :  { %2358 = vmatpush.bf16.msra.mxu2 %v3988_v21  ;;  %v1308_v21 = vadd.f32 %v5753_v20, %v5678_v57  ;;  %v1776_v37 = vadd.f32 %v1775_v18, %v1718_v51  ;;  %v1676_v20 = vadd.f32 %v1675_v42, %v5740_v3  ;;  %v4056_v15 = vor.u32 %v4247_v50, %v4053_v56 }
 0x396   :  { %2536 = vmatpush.bf16.msra.mxu0 %v3992_v35  ;;  %v1724_v18 = vmul.f32 %v5749_v36, %v5749_v36  ;;  %v1817_v34 = vadd.f32 %v1816_v24, %v1727_v0  ;;  %v1731_v9 = vmul.f32 %v5939_v60, %v5939_v60  ;;  %v5966_v29 = vadd.f32 %v5787_v47, %v1496_v27 }
 0x397   :  { %v1777_v51 = vadd.f32 %v1776_v37, %v1720_v10  ;;  %v1677_v42 = vadd.f32 %v1676_v20, %v5921_v43  ;;  %v5959_v49 = vadd.f32 %v5755_v13, %v1308_v21  ;;  %v1501_v10 = vadd.f32 %v5801_v4, %v5671_v59  ;;  %2625 = vmatpush.bf16.msrb.mxu1 %v4056_v15 }
 0x398   :  { %8438 = vst [vmem:[#allocation39_spill] sm:$0xff] %v5966_v29  ;;  %v1638_v35 = vadd.f32 %v1637_v53, %v5737_v58  ;;  %v1313_v13 = vadd.f32 %v5771_v46, %v5678_v57  ;;  %v1818_v21 = vadd.f32 %v1817_v34, %v1729_v52  ;;  %v1733_v0 = vmul.f32 %v5776_v41, %v5776_v41 }
 0x399   :  { %v5948_v8 = vpop.f32.mrf.mxu3  ;;  %v1778_v37 = vadd.f32 %v1777_v51, %v1722_v38  ;;  %v1678_v20 = vadd.f32 %v1677_v42, %v5758_v61  ;;  %v1726_v27 = vmul.f32 %v5959_v49, %v5959_v49  ;;  %v1735_v38 = vmul.f32 %v5966_v29, %v5966_v29 }
 0x39a   :  { %v5943_v44 = vpop.f32.mrf.mxu2  ;;  %v1639_v50 = vadd.f32 %v1638_v35, %v5749_v36  ;;  %v1819_v56 = vadd.f32 %v1818_v21, %v1731_v9  ;;  %v5983_v53 = vadd.f32 %v5805_v11, %v1501_v10  ;;  %v1506_v46 = vadd.f32 %v5815_v19, %v5671_v59 }
 0x39b   :  { %v5961_v28 = vpop.f32.mrf.mxu1  ;;  %v1779_v47 = vadd.f32 %v1778_v37, %v1724_v18  ;;  %v1679_v4 = vadd.f32 %v1678_v20, %v5939_v60  ;;  %v5991_v15 = vadd.f32 %v5773_v30, %v1313_v13  ;;  %v1318_v18 = vadd.f32 %v5789_v7, %v5678_v57 }
 0x39c   :  { %v5953_v33 = vpop.f32.mrf.mxu0  ;;  %8439 = vst [vmem:[#allocation40_spill] sm:$0xff] %v5983_v53  ;;  %v1640_v52 = vadd.f32 %v1639_v50, %v5959_v49  ;;  %v1820_v34 = vadd.f32 %v1819_v56, %v1733_v0  ;;  %v1737_v11 = vmul.f32 %v5794_v1, %v5794_v1  ;;  %v1728_v30 = vmul.f32 %v5767_v25, %v5767_v25 }
 0x39d   :  { %v1680_v51 = vadd.f32 %v1679_v4, %v5776_v41  ;;  %v1780_v19 = vadd.f32 %v1779_v47, %v1726_v27  ;;  %v1739_v7 = vmul.f32 %v5983_v53, %v5983_v53  ;;  %v6011_v13 = vadd.f32 %v5819_v48, %v1506_v46 }
 0x39e   :  { %v1641_v10 = vadd.f32 %v1640_v52, %v5767_v25  ;;  %v1821_v20 = vadd.f32 %v1820_v34, %v1735_v38  ;;  %v1511_v21 = vadd.f32 %v5829_v55, %v5671_v59  ;;  %v1730_v0 = vmul.f32 %v5991_v15, %v5991_v15 }
 0x39f   :  { %v1681_v35 = vadd.f32 %v1680_v51, %v5966_v29  ;;  %8440 = vst [vmem:[#allocation41_spill] sm:$0xff] %v6011_v13  ;;  %v6018_v50 = vadd.f32 %v5791_v45, %v1318_v18  ;;  %v1323_v27 = vadd.f32 %v5807_v5, %v5678_v57  ;;  %v1741_v56 = vmul.f32 %v5812_v17, %v5812_v17 }
 0x3a0   :  { %v1822_v4 = vadd.f32 %v1821_v20, %v1737_v11  ;;  %v1781_v48 = vadd.f32 %v1780_v19, %v1728_v30  ;;  %v1642_v38 = vadd.f32 %v1641_v10, %v5991_v15  ;;  %v1732_v55 = vmul.f32 %v5785_v31, %v5785_v31  ;;  %v8443_v11 = vld [vmem:[#allocation6_spill] sm:$0xff] }
 0x3a1   :  { %v5996_v42 = vpop.f32.mrf.mxu3  ;;  %8441 = vst [vmem:[#allocation42_spill] sm:$0xff] %v6018_v50  ;;  %v1682_v47 = vadd.f32 %v1681_v35, %v5794_v1  ;;  %v1743_v45 = vmul.f32 %v6011_v13, %v6011_v13  ;;  %v6032_v51 = vadd.f32 %v5833_v6, %v1511_v21  ;;  %v1516_v5 = vadd.f32 %v5843_v23, %v5671_v59 }
 0x3a2   :  { %v5987_v24 = vpop.f32.mrf.mxu2  ;;  %v1823_v52 = vadd.f32 %v1822_v4, %v1739_v7  ;;  %v1782_v18 = vadd.f32 %v1781_v48, %v1730_v0  ;;  %v1734_v34 = vmul.f32 %v6018_v50, %v6018_v50  ;;  %v6039_v19 = vadd.f32 %v8443_v11, %v1323_v27  ;;  %v8444_v7 = vld [vmem:[#allocation15_spill] sm:$0xff]  ;;  %v8446_v48 = vld [vmem:[#allocation14_spill] sm:$0xff] }
 0x3a3   :  { %v6006_v37 = vpop.f32.mrf.mxu1  ;;  %v1683_v46 = vadd.f32 %v1682_v47, %v5983_v53  ;;  %8442 = vst [vmem:[#allocation43_spill] sm:$0xff] %v6032_v51  ;;  %v1643_v35 = vadd.f32 %v1642_v38, %v5785_v31  ;;  %v1745_v6 = vmul.f32 %v8444_v7, %v8444_v7  ;;  %v1519_v23 = vadd.f32 %v5853_v63, %v5671_v59  ;;  %v8445_v47 = vld [vmem:[#allocation24_spill] sm:$0xff] }
 0x3a4   :  { %v6000_v9 = vpop.f32.mrf.mxu0  ;;  %v1824_v20 = vadd.f32 %v1823_v52, %v1741_v56  ;;  %v1783_v0 = vadd.f32 %v1782_v18, %v1732_v55  ;;  %v1736_v4 = vmul.f32 %v8445_v47, %v8445_v47  ;;  %v1747_v52 = vmul.f32 %v6032_v51, %v6032_v51  ;;  %v8448_v53 = vld [vmem:[#allocation16_spill] sm:$0xff] }
 0x3a5   :  { %v1684_v10 = vadd.f32 %v1683_v46, %v5812_v17  ;;  %v1328_v46 = vadd.f32 %v8446_v48, %v5678_v57  ;;  %v6061_v63 = vadd.f32 %v5847_v62, %v1516_v5  ;;  %v1521_v55 = vadd.f32 %v5861_v26, %v5671_v59  ;;  %v8451_v62 = vld [vmem:[#allocation35_spill] sm:$0xff] }
 0x3a6   :  { %v1825_v56 = vadd.f32 %v1824_v20, %v1743_v45  ;;  %v1644_v18 = vadd.f32 %v1643_v35, %v6018_v50  ;;  %v1738_v48 = vmul.f32 %v6039_v19, %v6039_v19  ;;  %v1749_v45 = vmul.f32 %v8448_v53, %v8448_v53  ;;  %v8449_v20 = vld [vmem:[#allocation17_spill] sm:$0xff]  ;;  %v8454_v50 = vld [vmem:[#allocation8_spill] sm:$0xff] }
 0x3a7   :  { %v1685_v27 = vadd.f32 %v1684_v10, %v6011_v13  ;;  %8447 = vst [vmem:[#allocation6_spill] sm:$0xff] %v6061_v63  ;;  %v1784_v10 = vadd.f32 %v1783_v0, %v1734_v34  ;;  %v6072_v1 = vadd.f32 %v8449_v20, %v1519_v23  ;;  %v1524_v5 = vadd.f32 %v8451_v62, %v5671_v59  ;;  %v8452_v35 = vld [vmem:[#allocation9_spill] sm:$0xff]  ;;  %v8455_v23 = vld [vmem:[#allocation28_spill] sm:$0xff] }
 0x3a8   :  { %v1826_v17 = vadd.f32 %v1825_v56, %v1745_v6  ;;  %v1645_v26 = vadd.f32 %v1644_v18, %v8445_v47  ;;  %v6078_v34 = vadd.f32 %v8452_v35, %v1328_v46  ;;  %v1740_v6 = vmul.f32 %v8454_v50, %v8454_v50 }
 0x3a9   :  { %v6054_v11 = vpop.f32.mrf.mxu3  ;;  %v1686_v13 = vadd.f32 %v1685_v27, %v8444_v7  ;;  %8450 = vst [vmem:[#allocation24_spill] sm:$0xff] %v6072_v1  ;;  %v1785_v29 = vadd.f32 %v1784_v10, %v1736_v4  ;;  %v1751_v56 = vmul.f32 %v6061_v63, %v6061_v63  ;;  %v6086_v20 = vadd.f32 %v8455_v23, %v1521_v55 }
 0x3aa   :  { %v6042_v30 = vpop.f32.mrf.mxu2  ;;  %8453 = vst [vmem:[#allocation14_spill] sm:$0xff] %v6078_v34  ;;  %v1827_v27 = vadd.f32 %v1826_v17, %v1747_v52  ;;  %v1646_v62 = vadd.f32 %v1645_v26, %v6039_v19  ;;  %v1526_v46 = vadd.f32 %v5912_v39, %v5671_v59  ;;  %v1753_v17 = vmul.f32 %v6072_v1, %v6072_v1  ;;  %v8458_v52 = vld [vmem:[#allocation36_spill] sm:$0xff] }
 0x3ab   :  { %v6056_v38 = vpop.f32.mrf.mxu1  ;;  %v1687_v0 = vadd.f32 %v1686_v13, %v6032_v51  ;;  %8456 = vst [vmem:[#allocation17_spill] sm:$0xff] %v6086_v20  ;;  %v1786_v7 = vadd.f32 %v1785_v29, %v1738_v48  ;;  %v8457_v13 = vld [vmem:[#allocation25_spill] sm:$0xff]  ;;  %v6097_v35 = vadd.f32 %v8458_v52, %v1524_v5  ;;  %v1742_v29 = vmul.f32 %v6078_v34, %v6078_v34  ;;  %v8467_v51 = vld [vmem:[#allocation12_spill] sm:$0xff] }
 0x3ac   :  { %v1533_v21 = vpop.f32.mrf.mxu0  ;;  %v1333_v18 = vadd.f32 %v8457_v13, %v5678_v57  ;;  %v1828_v10 = vadd.f32 %v1827_v27, %v1749_v45  ;;  %v1647_v23 = vadd.f32 %v1646_v62, %v8454_v50  ;;  %v1529_v39 = vadd.f32 %v5953_v33, %v5671_v59  ;;  %v8461_v33 = vld [vmem:[#allocation11_spill] sm:$0xff] }
 0x3ad   :  { %v1688_v4 = vadd.f32 %v1687_v0, %v8448_v53  ;;  %8459 = vst [vmem:[#allocation35_spill] sm:$0xff] %v6097_v35  ;;  %v1787_v0 = vadd.f32 %v1786_v7, %v1740_v6  ;;  %v1755_v5 = vmul.f32 %v6086_v20, %v6086_v20  ;;  %v6112_v52 = vadd.f32 %v5917_v22, %v1526_v46  ;;  %v8462_v7 = vld [vmem:[#allocation26_spill] sm:$0xff] }
 0x3ae   :  { %v1829_v27 = vadd.f32 %v1828_v10, %v1751_v56  ;;  %v1648_v13 = vadd.f32 %v1647_v23, %v6078_v34  ;;  %v6119_v53 = vadd.f32 %v8461_v33, %v1333_v18  ;;  %v1338_v6 = vadd.f32 %v8462_v7, %v5678_v57  ;;  %v8463_v46 = vld [vmem:[#allocation10_spill] sm:$0xff]  ;;  %v8464_v33 = vld [vmem:[#allocation27_spill] sm:$0xff] }
 0x3af   :  { %v1689_v48 = vadd.f32 %v1688_v4, %v6061_v63  ;;  %8460 = vst [vmem:[#allocation9_spill] sm:$0xff] %v6112_v52  ;;  %v1531_v4 = vadd.f32 %v6000_v9, %v5671_v59  ;;  %v1757_v10 = vmul.f32 %v6097_v35, %v6097_v35  ;;  %v1788_v23 = vadd.f32 %v1787_v0, %v1742_v29 }
 0x3b0   :  { %v1830_v56 = vadd.f32 %v1829_v27, %v1753_v17  ;;  %v6127_v22 = vadd.f32 %v5961_v28, %v1529_v39  ;;  %v1534_v9 = vadd.f32 %v1533_v21, %v5671_v59  ;;  %v1744_v18 = vmul.f32 %v8463_v46, %v8463_v46  ;;  %v8465_v39 = vld [vmem:[#allocation13_spill] sm:$0xff] }
 0x3b1   :  { %v1690_v62 = vadd.f32 %v1689_v48, %v6072_v1  ;;  %v6116_v63 = vpop.f32.mrf.mxu3  ;;  %v1649_v1 = vadd.f32 %v1648_v13, %v8463_v46  ;;  %v1341_v7 = vadd.f32 %v8464_v33, %v5678_v57  ;;  %v1759_v29 = vmul.f32 %v6112_v52, %v6112_v52 }
 0x3b2   :  { %v6105_v26 = vpop.f32.mrf.mxu2  ;;  %v1831_v17 = vadd.f32 %v1830_v56, %v1755_v5  ;;  %v6139_v0 = vadd.f32 %v6006_v37, %v1531_v4  ;;  %v1746_v21 = vmul.f32 %v6119_v53, %v6119_v53  ;;  %v6145_v13 = vadd.f32 %v8465_v39, %v1338_v6  ;;  %v8468_v39 = vld [vmem:[#allocation18_spill] sm:$0xff] }
 0x3b3   :  { %v1624_v45 = vpop.f32.mrf.mxu1  ;;  %v1691_v48 = vadd.f32 %v1690_v62, %v6086_v20  ;;  %v8466_v62 = vld [vmem:[#allocation34_spill] sm:$0xff]  ;;  %v6153_v37 = vadd.f32 %v6056_v38, %v1534_v9  ;;  %v1789_v20 = vadd.f32 %v1788_v23, %v1744_v18  ;;  %v1748_v6 = vmul.f32 %v8467_v51, %v8467_v51 }
 0x3b4   :  { %v1535_v55 = vpop.f32.mrf.mxu0  ;;  %v1343_v33 = vadd.f32 %v8466_v62, %v5678_v57  ;;  %v1832_v5 = vadd.f32 %v1831_v17, %v1757_v10  ;;  %v6159_v46 = vadd.f32 %v8468_v39, %v1341_v7  ;;  %v8469_v10 = vld [vmem:[#allocation37_spill] sm:$0xff]  ;;  %v1763_v38 = vmul.f32 %v6139_v0, %v6139_v0  ;;  %v8471_v7 = vld [vmem:[#allocation19_spill] sm:$0xff] }
 0x3b5   :  { %v1692_v27 = vadd.f32 %v1691_v48, %v6097_v35  ;;  %v1536_v28 = vadd.f32 %v1535_v55, %v5671_v59  ;;  %v1761_v35 = vmul.f32 %v6127_v22, %v6127_v22  ;;  %v1346_v17 = vadd.f32 %v8469_v10, %v5678_v57 }
 0x3b6   :  { %v1650_v23 = vadd.f32 %v1649_v1, %v6119_v53  ;;  %v1790_v18 = vadd.f32 %v1789_v20, %v1746_v21  ;;  %v6172_v39 = vadd.f32 %v8471_v7, %v1343_v33  ;;  %v1752_v1 = vmul.f32 %v6159_v46, %v6159_v46  ;;  %v8472_v21 = vld [vmem:[#allocation38_spill] sm:$0xff] }
 0x3b7   :  { %v1693_v48 = vadd.f32 %v1692_v27, %v6112_v52  ;;  %v1833_v27 = vadd.f32 %v1832_v5, %v1759_v29  ;;  %v6166_v9 = vadd.f32 %v1624_v45, %v1536_v28  ;;  %v1750_v52 = vmul.f32 %v6145_v13, %v6145_v13 }
 0x3b8   :  { %v1765_v5 = vmul.f32 %v6153_v37, %v6153_v37  ;;  %v1651_v45 = vadd.f32 %v1650_v23, %v8467_v51  ;;  %v1791_v28 = vadd.f32 %v1790_v18, %v1748_v6  ;;  %v1348_v20 = vadd.f32 %v5943_v44, %v5678_v57 }
 0x3b9   :  { %v1694_v62 = vadd.f32 %v1693_v48, %v6127_v22  ;;  %8470 = vst [vmem:[#allocation8_spill] sm:$0xff] %v6166_v9  ;;  %v1834_v34 = vadd.f32 %v1833_v27, %v1761_v35  ;;  %v1446_v48 = vpop.f32.mrf.mxu3  ;;  %v6185_v33 = vadd.f32 %v8472_v21, %v1346_v17  ;;  %v1754_v6 = vmul.f32 %v6172_v39, %v6172_v39 }
 0x3ba   :  { %v1351_v23 = vadd.f32 %v5987_v24, %v5678_v57 }
 0x3bb   :  { %v1627_v4 = vpop.f32.mrf.mxu1  ;;  %v1695_v29 = vadd.f32 %v1694_v62, %v6139_v0  ;;  %v1835_v35 = vadd.f32 %v1834_v34, %v1763_v38  ;;  %v1767_v62 = vmul.f32 %v6166_v9, %v6166_v9  ;;  %v1756_v24 = vmul.f32 %v6185_v33, %v6185_v33 }
 0x3bc   :  { %v1538_v56 = vpop.f32.mrf.mxu0 }
 0x3bd   :  { %v1539_v55 = vadd.f32 %v1538_v56, %v5671_v59  ;;  %v1357_v56 = vpop.f32.mrf.mxu2  ;;  %v1696_v27 = vadd.f32 %v1695_v29, %v6153_v37  ;;  %v1836_v44 = vadd.f32 %v1835_v35, %v1765_v5 }
 0x3bf   :  { %v6177_v10 = vadd.f32 %v1627_v4, %v1539_v55  ;;  %v1652_v55 = vadd.f32 %v1651_v45, %v6145_v13  ;;  %v1792_v4 = vadd.f32 %v1791_v28, %v1750_v52  ;;  %v1697_v17 = vadd.f32 %v1696_v27, %v6166_v9 }
 0x3c0   :  { %v6201_v52 = vadd.f32 %v5948_v8, %v1348_v20  ;;  %v1353_v45 = vadd.f32 %v6042_v30, %v5678_v57  ;;  %v1837_v5 = vadd.f32 %v1836_v44, %v1767_v62  ;;  %v6212_v27 = vadd.f32 %v5996_v42, %v1351_v23 }
 0x3c1   :  { %v1769_v34 = vmul.f32 %v6177_v10, %v6177_v10  ;;  %v1653_v7 = vadd.f32 %v1652_v55, %v6159_v46  ;;  %v1793_v29 = vadd.f32 %v1792_v4, %v1752_v1  ;;  %v1698_v21 = vadd.f32 %v1697_v17, %v6177_v10 }
 0x3c2   :  { %v1356_v8 = vadd.f32 %v6105_v26, %v5678_v57  ;;  %v6223_v44 = vadd.f32 %v6054_v11, %v1353_v45  ;;  %v1358_v42 = vadd.f32 %v1357_v56, %v5678_v57  ;;  %v1449_v26 = vpop.f32.mrf.mxu3 }
 0x3c3   :  { %v1629_v28 = vpop.f32.mrf.mxu1  ;;  %v1794_v1 = vadd.f32 %v1793_v29, %v1754_v6  ;;  %v1838_v20 = vadd.f32 %v1837_v5, %v1769_v34 }
 0x3c4   :  { %v1540_v18 = vpop.f32.mrf.mxu0  ;;  %v1762_v56 = vmul.f32 %v6223_v44, %v6223_v44 }
 0x3c5   :  { %v1541_v38 = vadd.f32 %v1540_v18, %v5671_v59  ;;  %v1654_v59 = vadd.f32 %v1653_v7, %v6172_v39  ;;  %v1360_v30 = vpop.f32.mrf.mxu2  ;;  %v1758_v18 = vmul.f32 %v6201_v52, %v6201_v52  ;;  %v1795_v23 = vadd.f32 %v1794_v1, %v1756_v24 }
 0x3c6   :  { %v6230_v7 = vadd.f32 %v6116_v63, %v1356_v8  ;;  %v1361_v29 = vadd.f32 %v1360_v30, %v5678_v57  ;;  %v6236_v24 = vadd.f32 %v1446_v48, %v1358_v42 }
 0x3c7   :  { %v6208_v35 = vadd.f32 %v1629_v28, %v1541_v38  ;;  %v1655_v4 = vadd.f32 %v1654_v59, %v6185_v33  ;;  %v1760_v38 = vmul.f32 %v6212_v27, %v6212_v27  ;;  %v1796_v11 = vadd.f32 %v1795_v23, %v1758_v18 }
 0x3c8   :  { %v1764_v63 = vmul.f32 %v6230_v7, %v6230_v7  ;;  %v6241_v8 = vadd.f32 %v1449_v26, %v1361_v29  ;;  %v1766_v18 = vmul.f32 %v6236_v24, %v6236_v24 }
 0x3c9   :  { %8473 = vst [vmem:[#allocation28_spill] sm:$0xff] %v6208_v35  ;;  %v1699_v55 = vadd.f32 %v1698_v21, %v6208_v35  ;;  %v1771_v62 = vmul.f32 %v6208_v35, %v6208_v35  ;;  %v1656_v34 = vadd.f32 %v1655_v4, %v6201_v52  ;;  %v1797_v1 = vadd.f32 %v1796_v11, %v1760_v38 }
 0x3cb   :  { %v1700_v6 = vrot.slane %v1699_v55, 4  ;;  %v1839_v17 = vadd.f32 %v1838_v20, %v1771_v62  ;;  %v1657_v45 = vadd.f32 %v1656_v34, %v6212_v27  ;;  %v1798_v62 = vadd.f32 %v1797_v1, %v1762_v56 }
 0x3cc   :  { %v1768_v34 = vmul.f32 %v6241_v8, %v6241_v8 }
 0x3cd   :  { %v1701_v28 = vadd.f32 %v1700_v6, %v1699_v55  ;;  %v1840_v5 = vrot.slane %v1839_v17, 4  ;;  %v1658_v20 = vadd.f32 %v1657_v45, %v6223_v44  ;;  %v1362_v23 = vpop.f32.mrf.mxu2  ;;  %v1799_v6 = vadd.f32 %v1798_v62, %v1764_v63 }
 0x3ce   :  { %v1363_v26 = vadd.f32 %v1362_v23, %v5678_v57 }
 0x3cf   :  { %v1702_v21 = vrot.slane %v1701_v28, 2  ;;  %v1841_v59 = vadd.f32 %v1840_v5, %v1839_v17  ;;  %v1659_v4 = vadd.f32 %v1658_v20, %v6230_v7  ;;  %v1800_v5 = vadd.f32 %v1799_v6, %v1766_v18 }
 0x3d1   :  { %v1703_v30 = vadd.f32 %v1702_v21, %v1701_v28  ;;  %v1842_v55 = vrot.slane %v1841_v59, 2  ;;  %v1660_v17 = vadd.f32 %v1659_v4, %v6236_v24  ;;  %v1451_v28 = vpop.f32.mrf.mxu3 }
 0x3d2   :  { %v6251_v45 = vadd.f32 %v1451_v28, %v1363_v26 }
 0x3d3   :  { %v1704_v48 = vrot.slane %v1703_v30, 1  ;;  %v1843_v42 = vadd.f32 %v1842_v55, %v1841_v59  ;;  %v1661_v11 = vadd.f32 %v1660_v17, %v6241_v8  ;;  %v1801_v59 = vadd.f32 %v1800_v5, %v1768_v34 }
 0x3d4   :  { %v1770_v20 = vmul.f32 %v6251_v45, %v6251_v45 }
 0x3d5   :  { %v1705_v38 = vadd.f32 %v1704_v48, %v1703_v30  ;;  %v1844_v29 = vrot.slane %v1843_v42, 1  ;;  %v1662_v1 = vadd.f32 %v1661_v11, %v6251_v45 }
 0x3d6   :  { %v1802_v55 = vadd.f32 %v1801_v59, %v1770_v20 }
 0x3d7   :  { %v6253_v56 = vmul.f32 0.00390625, %v1705_v38  ;;  %v1845_v21 = vadd.f32 %v1844_v29, %v1843_v42  ;;  %v1663_v30 = vrot.slane %v1662_v1, 4 }
 0x3d8   :  { %v1803_v18 = vrot.slane %v1802_v55, 4 }
 0x3d9   :  { %v1847_v63 = vmul.f32 0.00390625, %v1845_v21  ;;  %v1849_v57 = vmul.f32 %v6253_v56, %v6253_v56  ;;  %v1664_v4 = vadd.f32 %v1663_v30, %v1662_v1 }
 0x3da   :  { %v1804_v6 = vadd.f32 %v1803_v18, %v1802_v55 }
 0x3db   :  { %v1851_v62 = vsub.f32 %v1847_v63, %v1849_v57  ;;  %v1665_v23 = vrot.slane %v1664_v4, 2 }
 0x3dc   :  { %v1805_v34 = vrot.slane %v1804_v6, 2 }
 0x3dd   :  { %v1853_v48 = vmax.f32 %v1851_v62, 0.0  ;;  %v1666_v42 = vadd.f32 %v1665_v23, %v1664_v4 }
 0x3de   :  { %v1806_v38 = vadd.f32 %v1805_v34, %v1804_v6 }
 0x3df   :  { %v1855_v17 = vadd.f32 1e-05, %v1853_v48  ;;  %v1667_v26 = vrot.slane %v1666_v42, 1 }
 0x3e0   :  { %v1807_v28 = vrot.slane %v1806_v38, 1 }
 0x3e1   :  { %4302 = vrsqrt.f32 %v1855_v17  ;;  %v1668_v29 = vadd.f32 %v1667_v26, %v1666_v42  ;;  %vm1872_vm10 = vweird.f32 %v1855_v17 }
 0x3e2   :  { %v1808_v11 = vadd.f32 %v1807_v28, %v1806_v38  ;;  %v3979_v38 = vld [vmem:[#allocation3 + $0x120] sm:$0xf] }
 0x3e3   :  { %v1706_v5 = vmul.f32 0.00390625, %v1668_v29  ;;  %v4230_v29 = vld [vmem:[#allocation3 + $0x124] sm:$0xf0] }
 0x3e4   :  { %v1846_v35 = vmul.f32 0.00390625, %v1808_v11 }
 0x3e5   :  { %v1848_v9 = vmul.f32 %v1706_v5, %v1706_v5 }
 0x3e7   :  { %v4303_v21 = vpop.eup %4302  ;;  %v1850_v20 = vsub.f32 %v1846_v35, %v1848_v9  ;;  %v3796_v35 = vld [vmem:[%s8184_s3 + $0x4] ss:$8 sm:$0x3] }
 0x3e8   :  { %v1867_v59 = vmul.f32 %v4303_v21, %v1855_v17  ;;  %vm1873_vm9 = vweird.f32 %v4303_v21  ;;  %v3980_v17 = vor.u32 %v4230_v29, %v3979_v38  ;;  %v8479_v38 = vld [vmem:[#allocation23_spill] sm:$0xff] }
 0x3e9   :  { %v1852_v1 = vmax.f32 %v1850_v20, 0.0  ;;  %vm1874_vm11 = vmor %vm1872_vm10, %vm1873_vm9  ;;  %v4246_v20 = vld [vmem:[#allocation3 + $0x1a4] sm:$0xf0]  ;;  %v8480_v29 = vld [vmem:[#allocation31_spill] sm:$0xff] }
 0x3ea   :  { %v1868_v63 = vmul.f32 %v4303_v21, %v1867_v59  ;;  %v4043_v59 = vld [vmem:[#allocation3 + $0x1a0] sm:$0xf]  ;;  %2359 = vmatpush.bf16.msra.mxu2 %v3980_v17 }
 0x3eb   :  { %v1854_v57 = vadd.f32 1e-05, %v1852_v1 }
 0x3ec   :  { %v1869_v30 = vmul.f32 0.5, %v1868_v63 }
 0x3ed   :  { %4304 = vrsqrt.f32 %v1854_v57  ;;  %vm1862_vm13 = vweird.f32 %v1854_v57 }
 0x3ee   :  { %v1870_v55 = vsub.f32 1.5, %v1869_v30  ;;  %v3981_v30 = vld [vmem:[#allocation3 + $0x128] sm:$0xf0] }
 0x3f0   :  { %v1871_v18 = vmul.f32 %v4303_v21, %v1870_v55 }
 0x3f2   :  { %v1875_v6 = vsel %vm1874_vm11, %v4303_v21, %v1871_v18  ;;  %v4229_v21 = vld [vmem:[#allocation3 + $0x124] sm:$0xf] }
 0x3f3   :  { %v4305_v62 = vpop.eup %4304  ;;  %v1878_v9 = vrot.slane %v1875_v6, 7  ;;  %v3984_v55 = vor.u32 %v4229_v21, %v3981_v30  ;;  %v3797_v18 = vld [vmem:[%s8184_s3 + $0x5] ss:$8 sm:$0x3]  ;;  %v8482_v30 = vld [vmem:[#allocation22_spill] sm:$0xff] }
 0x3f4   :  { %v1857_v4 = vmul.f32 %v4305_v62, %v1854_v57  ;;  %vm1863_vm12 = vweird.f32 %v4305_v62  ;;  %v4044_v57 = vor.u32 %v4246_v20, %v4043_v59  ;;  %v8475_v6 = vld [vmem:[#allocation20_spill] sm:$0xff]  ;;  %v8481_v59 = vld [vmem:[#allocation33_spill] sm:$0xff] }
 0x3f5   :  { %vm1864_vm14 = vmor %vm1862_vm13, %vm1863_vm12  ;;  %2537 = vmatpush.bf16.msra.mxu0 %v3984_v55 }
 0x3f6   :  { %v1858_v48 = vmul.f32 %v4305_v62, %v1857_v4  ;;  %2448 = vmatpush.bf16.msra.mxu3 %v4044_v57 }
 0x3f8   :  { %v1859_v23 = vmul.f32 0.5, %v1858_v48 }
 0x3fa   :  { %v1860_v42 = vsub.f32 1.5, %v1859_v23 }
 0x3fc   :  { %v1861_v34 = vmul.f32 %v4305_v62, %v1860_v42 }
 0x3fe   :  { %v1865_v26 = vsel %vm1864_vm14, %v4305_v62, %v1861_v34  ;;  %v8476_v34 = vld [vmem:[#allocation29_spill] sm:$0xff] }
 0x3ff   :  { %v1879_v28 = vsel %vm801_vm5, %v1865_v26, %v1878_v9  ;;  %v8477_v9 = vld [vmem:[#allocation21_spill] sm:$0xff] }
 0x400   :  { %v1881_v11 = vmul.f32 %v3796_v35, %v1879_v28  ;;  %v8478_v35 = vld [vmem:[#allocation30_spill] sm:$0xff] }
 0x402   :  { %v6264_v1 = vperm.slane %v1881_v11, 0  ;;  %v6266_v63 = vperm.slane %v1881_v11, 1 }
 0x404   :  { %v1888_v62 = vmul.f32 %v6266_v63, %v6253_v56  ;;  %v6272_v4 = vmul.f32 %v6264_v1, %v6251_v45  ;;  %v1887_v48 = vmul.f32 %v6264_v1, %v1706_v5  ;;  %v6280_v42 = vmul.f32 %v6264_v1, %v8475_v6 }
 0x405   :  { %v6284_v56 = vmul.f32 %v6266_v63, %v8476_v34  ;;  %v6288_v45 = vmul.f32 %v6264_v1, %v8477_v9  ;;  %v6292_v26 = vmul.f32 %v6266_v63, %v8478_v35  ;;  %v6296_v5 = vmul.f32 %v6264_v1, %v8479_v38  ;;  %v8483_v9 = vld [vmem:[#allocation42_spill] sm:$0xff]  ;;  %v8484_v35 = vld [vmem:[#allocation39_spill] sm:$0xff]  ;;  %v8485_v38 = vld [vmem:[#allocation32_spill] sm:$0xff] }
 0x406   :  { %8474 = vst [vmem:[#allocation25_spill] sm:$0xff] %v6272_v4  ;;  %v1891_v23 = vrot.slane %v1888_v62, 7  ;;  %v6300_v28 = vmul.f32 %v6266_v63, %v8480_v29  ;;  %v6305_v17 = vmul.f32 %v6264_v1, %v5705_v12  ;;  %v6309_v20 = vmul.f32 %v6266_v63, %v8481_v59  ;;  %v8486_v29 = vld [vmem:[#allocation40_spill] sm:$0xff]  ;;  %v8488_v59 = vld [vmem:[#allocation7_spill] sm:$0xff] }
 0x407   :  { %v1903_v21 = vmul.f32 %v6264_v1, %v5715_v16  ;;  %v1904_v55 = vmul.f32 %v6266_v63, %v8482_v30  ;;  %v6317_v62 = vmul.f32 %v6264_v1, %v5721_v32  ;;  %v6325_v12 = vmul.f32 %v6264_v1, %v5731_v40  ;;  %v8489_v30 = vld [vmem:[#allocation14_spill] sm:$0xff]  ;;  %v8494_v4 = vld [vmem:[#allocation15_spill] sm:$0xff] }
 0x408   :  { %v1892_v11 = vsel %vm801_vm5, %v1887_v48, %v1891_v23  ;;  %v6321_v48 = vmul.f32 %v6266_v63, %v5718_v14  ;;  %v6329_v23 = vmul.f32 %v6266_v63, %v5724_v2  ;;  %v6333_v16 = vmul.f32 %v6264_v1, %v5737_v58 }
 0x409   :  { %v1894_v57 = vsub.f32 %v3797_v18, %v1892_v11  ;;  %v6337_v32 = vmul.f32 %v6266_v63, %v5734_v54  ;;  %v1911_v14 = vmul.f32 %v6264_v1, %v5749_v36  ;;  %v1912_v18 = vmul.f32 %v6266_v63, %v5740_v3 }
 0x40a   :  { %v6345_v40 = vmul.f32 %v6264_v1, %v5959_v49  ;;  %v6349_v2 = vmul.f32 %v6266_v63, %v5921_v43  ;;  %v1915_v54 = vmul.f32 %v6264_v1, %v5767_v25  ;;  %v1916_v36 = vmul.f32 %v6266_v63, %v5758_v61 }
 0x40b   :  { %v6351_v58 = vperm.slane %v1894_v57, 0  ;;  %v6353_v6 = vperm.slane %v1894_v57, 1  ;;  %v6361_v3 = vmul.f32 %v6264_v1, %v5991_v15  ;;  %v6365_v49 = vmul.f32 %v6266_v63, %v5939_v60 }
 0x40c   :  { %v1919_v43 = vmul.f32 %v6264_v1, %v5785_v31  ;;  %v1920_v34 = vmul.f32 %v6266_v63, %v5776_v41  ;;  %v6373_v25 = vmul.f32 %v6264_v1, %v8483_v9  ;;  %v6377_v61 = vmul.f32 %v6266_v63, %v8484_v35  ;;  %v8491_v9 = vld [vmem:[#allocation41_spill] sm:$0xff] }
 0x40d   :  { %v1923_v15 = vmul.f32 %v6264_v1, %v8445_v47  ;;  %v1924_v60 = vmul.f32 %v6266_v63, %v8485_v38  ;;  %v6385_v31 = vmul.f32 %v6264_v1, %v6039_v19  ;;  %v6389_v41 = vmul.f32 %v6266_v63, %v8486_v29  ;;  %v8493_v19 = vld [vmem:[#allocation10_spill] sm:$0xff] }
 0x40e   :  { %v1927_v11 = vmul.f32 %v6264_v1, %v8454_v50  ;;  %v1928_v57 = vmul.f32 %v6266_v63, %v8488_v59  ;;  %v6397_v47 = vmul.f32 %v6264_v1, %v8489_v30  ;;  %v6401_v35 = vmul.f32 %v6266_v63, %v8491_v9 }
 0x40f   :  { %8487 = vst [vmem:[#allocation36_spill] sm:$0xff] %v6389_v41  ;;  %v1931_v38 = vmul.f32 %v6264_v1, %v8493_v19  ;;  %v1932_v29 = vmul.f32 %v6266_v63, %v8494_v4  ;;  %v6409_v50 = vmul.f32 %v6264_v1, %v6119_v53  ;;  %v8496_v41 = vld [vmem:[#allocation43_spill] sm:$0xff]  ;;  %v1935_v30 = vmul.f32 %v6264_v1, %v8467_v51 }
 0x410   :  { %8490 = vst [vmem:[#allocation11_spill] sm:$0xff] %v6397_v47  ;;  %v6413_v59 = vmul.f32 %v6266_v63, %v8496_v41  ;;  %v8498_v47 = vld [vmem:[#allocation16_spill] sm:$0xff]  ;;  %v6421_v19 = vmul.f32 %v6264_v1, %v6145_v13  ;;  %v1939_v53 = vmul.f32 %v6264_v1, %v6159_v46  ;;  %v6433_v51 = vmul.f32 %v6264_v1, %v6172_v39 }
 0x411   :  { %8492 = vst [vmem:[#allocation26_spill] sm:$0xff] %v6401_v35  ;;  %v1936_v9 = vmul.f32 %v6266_v63, %v8498_v47  ;;  %v8500_v35 = vld [vmem:[#allocation6_spill] sm:$0xff]  ;;  %v1943_v13 = vmul.f32 %v6264_v1, %v6185_v33  ;;  %v6445_v46 = vmul.f32 %v6264_v1, %v6201_v52  ;;  %v1947_v39 = vmul.f32 %v6264_v1, %v6212_v27 }
 0x412   :  { %8495 = vst [vmem:[#allocation27_spill] sm:$0xff] %v6409_v50  ;;  %v6425_v4 = vmul.f32 %v6266_v63, %v8500_v35  ;;  %v8502_v50 = vld [vmem:[#allocation24_spill] sm:$0xff]  ;;  %v6457_v33 = vmul.f32 %v6264_v1, %v6223_v44  ;;  %v1952_v52 = vmul.f32 %v6266_v63, %v6153_v37  ;;  %v1964_v27 = vadd.f32 %v6351_v58, %v6280_v42 }
 0x413   :  { %8497 = vst [vmem:[#allocation13_spill] sm:$0xff] %v6413_v59  ;;  %v1940_v41 = vmul.f32 %v6266_v63, %v8502_v50  ;;  %v8504_v59 = vld [vmem:[#allocation17_spill] sm:$0xff]  ;;  %v1966_v44 = vadd.f32 %v6351_v58, %v6288_v45  ;;  %v6481_v37 = vadd.f32 %v6351_v58, %v6296_v5  ;;  %v6491_v42 = vadd.f32 %v6353_v6, %v1904_v55 }
 0x414   :  { %8499 = vst [vmem:[#allocation34_spill] sm:$0xff] %v6421_v19  ;;  %v6437_v47 = vmul.f32 %v6266_v63, %v8504_v59  ;;  %v8506_v19 = vld [vmem:[#allocation35_spill] sm:$0xff]  ;;  %v1948_v59 = vmul.f32 %v6266_v63, %v6127_v22  ;;  %v6471_v22 = vadd.f32 %v6353_v6, %v6284_v56  ;;  %v6494_v56 = vadd.f32 %v6351_v58, %v1911_v14 }
 0x415   :  { %8501 = vst [vmem:[#allocation12_spill] sm:$0xff] %v6425_v4  ;;  %v1944_v35 = vmul.f32 %v6266_v63, %v8506_v19  ;;  %v8508_v4 = vld [vmem:[#allocation9_spill] sm:$0xff]  ;;  %v1951_v19 = vmul.f32 %v6264_v1, %v6230_v7  ;;  %v6477_v7 = vadd.f32 %v6353_v6, %v6292_v26  ;;  %v6497_v45 = vadd.f32 %v6353_v6, %v1912_v18 }
 0x416   :  { %8503 = vst [vmem:[#allocation18_spill] sm:$0xff] %v6433_v51  ;;  %v6449_v50 = vmul.f32 %v6266_v63, %v8508_v4  ;;  %v1955_v4 = vmul.f32 %v6264_v1, %v6241_v8  ;;  %v6488_v8 = vadd.f32 %v6351_v58, %v1903_v21  ;;  %v6500_v26 = vadd.f32 %v6351_v58, %v1915_v54  ;;  %v4244_v51 = vld [vmem:[#allocation3 + $0x194] sm:$0xf0] }
 0x417   :  { %8505 = vst [vmem:[#allocation37_spill] sm:$0xff] %v6437_v47  ;;  %v6503_v5 = vadd.f32 %v6353_v6, %v1916_v36  ;;  %v6509_v21 = vadd.f32 %v6353_v6, %v1920_v34  ;;  %v6512_v55 = vadd.f32 %v6351_v58, %v1923_v15  ;;  %v6515_v14 = vadd.f32 %v6353_v6, %v1924_v60 }
 0x418   :  { %8507 = vst [vmem:[#allocation19_spill] sm:$0xff] %v6445_v46  ;;  %v6518_v18 = vadd.f32 %v6351_v58, %v1927_v11  ;;  %v6521_v54 = vadd.f32 %v6353_v6, %v1928_v57  ;;  %v6524_v36 = vadd.f32 %v6351_v58, %v1931_v38  ;;  %v6530_v34 = vadd.f32 %v6351_v58, %v1935_v30  ;;  %v4045_v11 = vld [vmem:[#allocation3 + $0x1a8] sm:$0xf0]  ;;  %v3971_v46 = vld [vmem:[#allocation3 + $0x110] sm:$0xf] }
 0x419   :  { %8509 = vst [vmem:[#allocation38_spill] sm:$0xff] %v6449_v50  ;;  %v1956_v50 = vmul.f32 %v6266_v63, %v6177_v10  ;;  %v6485_v10 = vadd.f32 %v6353_v6, %v6300_v28  ;;  %v6506_v28 = vadd.f32 %v6351_v58, %v1919_v43  ;;  %v4245_v43 = vld [vmem:[#allocation3 + $0x1a4] sm:$0xf]  ;;  %v6533_v15 = vadd.f32 %v6353_v6, %v1936_v9  ;;  %v4228_v57 = vld [vmem:[#allocation3 + $0x114] sm:$0xf0] }
 0x41a   :  { %8510 = vst [vmem:[#allocation20_spill] sm:$0xff] %v6457_v33  ;;  %v6527_v33 = vadd.f32 %v6353_v6, %v1932_v29  ;;  %v6536_v60 = vadd.f32 %v6351_v58, %v1939_v53  ;;  %v6539_v47 = vadd.f32 %v6353_v6, %v1940_v41  ;;  %v6542_v38 = vadd.f32 %v6351_v58, %v1943_v13  ;;  %v4035_v9 = vld [vmem:[#allocation3 + $0x190] sm:$0xf] }
 0x41b   :  { %8511 = vst [vmem:[#allocation29_spill] sm:$0xff] %v6524_v36  ;;  %v6545_v29 = vadd.f32 %v6353_v6, %v1944_v35  ;;  %v6548_v30 = vadd.f32 %v6351_v58, %v1947_v39  ;;  %v6551_v53 = vadd.f32 %v6353_v6, %v1948_v59  ;;  %v6557_v41 = vadd.f32 %v6353_v6, %v1952_v52  ;;  %v3973_v35 = vld [vmem:[#allocation3 + $0x118] sm:$0xf0] }
 0x41c   :  { %8512 = vst [vmem:[#allocation21_spill] sm:$0xff] %v6527_v33  ;;  %v6560_v13 = vadd.f32 %v6351_v58, %v1955_v4  ;;  %v6563_v39 = vadd.f32 %v6353_v6, %v1956_v50  ;;  %v2030_v59 = vmul.f32 0.01, %v1966_v44  ;;  %v2032_v36 = vmul.f32 0.01, %v6481_v37 }
 0x41d   :  { %8513 = vst [vmem:[#allocation30_spill] sm:$0xff] %v6530_v34  ;;  %v4036_v34 = vor.u32 %v4244_v51, %v4035_v9  ;;  %v1971_v51 = vadd.f32 %v6353_v6, %v6309_v20  ;;  %v1975_v20 = vadd.f32 %v6353_v6, %v6321_v48 }
 0x41e   :  { %8514 = vst [vmem:[#allocation23_spill] sm:$0xff] %v6533_v15  ;;  %v4227_v15 = vld [vmem:[#allocation3 + $0x114] sm:$0xf]  ;;  %v2094_v4 = vmax.f32 %v1966_v44, %v2030_v59 }
 0x41f   :  { %8515 = vst [vmem:[#allocation31_spill] sm:$0xff] %v6536_v60  ;;  %v6554_v60 = vadd.f32 %v6351_v58, %v1951_v19  ;;  %v4048_v19 = vor.u32 %v4245_v43, %v4045_v11  ;;  %2449 = vmatpush.bf16.msra.mxu3 %v4036_v34  ;;  %v2035_v34 = vmul.f32 0.01, %v1971_v51  ;;  %v2039_v11 = vmul.f32 0.01, %v1975_v20 }
 0x420   :  { %8516 = vst [vmem:[#allocation33_spill] sm:$0xff] %v6539_v47  ;;  %v2029_v47 = vmul.f32 0.01, %v6471_v22 }
 0x421   :  { %8517 = vst [vmem:[#allocation22_spill] sm:$0xff] %v6542_v38  ;;  %v4037_v38 = vld [vmem:[#allocation3 + $0x198] sm:$0xf0]  ;;  %2626 = vmatpush.bf16.msrb.mxu1 %v4048_v19  ;;  %v2103_v9 = vmax.f32 %v1975_v20, %v2039_v11  ;;  %v1994_v11 = vadd.f32 %v6351_v58, %v6385_v31 }
 0x422   :  { %8518 = vst [vmem:[#allocation42_spill] sm:$0xff] %v6545_v29  ;;  %v4243_v29 = vld [vmem:[#allocation3 + $0x194] sm:$0xf] }
 0x423   :  { %8519 = vst [vmem:[#allocation39_spill] sm:$0xff] %v6548_v30  ;;  %v2028_v30 = vmul.f32 0.01, %v1964_v27  ;;  %v4040_v50 = vor.u32 %v4243_v29, %v4037_v38  ;;  %v8525_v29 = vld [vmem:[#allocation8_spill] sm:$0xff] }
 0x424   :  { %8520 = vst [vmem:[#allocation32_spill] sm:$0xff] %v6551_v53  ;;  %v2031_v53 = vmul.f32 0.01, %v6477_v7 }
 0x425   :  { %8521 = vst [vmem:[#allocation40_spill] sm:$0xff] %v6554_v60  ;;  %v3972_v60 = vor.u32 %v4228_v57, %v3971_v46  ;;  %v2092_v52 = vmax.f32 %v1964_v27, %v2028_v30  ;;  %v1974_v46 = vadd.f32 %v6351_v58, %v6317_v62  ;;  %v6579_v27 = vadd.f32 %v6351_v58, %v6325_v12 }
 0x426   :  { %8522 = vst [vmem:[#allocation7_spill] sm:$0xff] %v6557_v41  ;;  %v2093_v41 = vmax.f32 %v6471_v22, %v2029_v47  ;;  %v2095_v33 = vmax.f32 %v6477_v7, %v2031_v53  ;;  %v2033_v47 = vmul.f32 0.01, %v6485_v10  ;;  %v2096_v7 = vmax.f32 %v6481_v37, %v2032_v36  ;;  %2627 = vmatpush.bf16.msrb.mxu1 %v4040_v50 }
 0x427   :  { %8523 = vst [vmem:[#allocation14_spill] sm:$0xff] %v6560_v13  ;;  %v3976_v13 = vor.u32 %v4227_v15, %v3973_v35  ;;  %2360 = vmatpush.bf16.msra.mxu2 %v3972_v60  ;;  %v2156_v43 = vpack.c.bf16 %v2094_v4, %v2092_v52  ;;  %v2038_v15 = vmul.f32 0.01, %v1974_v46  ;;  %v6587_v60 = vmul.f32 %v6266_v63, %v6139_v0 }
 0x428   :  { %8524 = vst [vmem:[#allocation41_spill] sm:$0xff] %v6563_v39  ;;  %v1970_v39 = vadd.f32 %v6351_v58, %v6305_v17  ;;  %v2157_v22 = vpack.c.bf16 %v2095_v33, %v2093_v41  ;;  %v2036_v17 = vmul.f32 0.01, %v6488_v8  ;;  %v2037_v12 = vmul.f32 0.01, %v6491_v42 }
 0x429   :  { %2538 = vmatpush.bf16.msra.mxu0 %v3976_v13  ;;  %v6592_v33 = vadd.f32 %v6351_v58, %v6333_v16  ;;  %v6596_v37 = vmul.f32 %v6264_v1, %v6236_v24  ;;  %v2097_v48 = vmax.f32 %v6485_v10, %v2033_v47  ;;  %v2099_v36 = vmax.f32 %v1971_v51, %v2035_v34  ;;  %v8526_v1 = vld [vmem:[#allocation28_spill] sm:$0xff] }
 0x42a   :  { %v2034_v44 = vmul.f32 0.01, %v1970_v39  ;;  %2361 = vmatmul.bf16.vlgmr.msra.gmra.mxu2 %v2156_v43  ;;  %2450 = vmatmul.bf16.vlgmr.msra.gmra.mxu3 %v2157_v22  ;;  %v6601_v0 = vadd.f32 %v6353_v6, %v6329_v23  ;;  %v2100_v57 = vmax.f32 %v6488_v8, %v2036_v17  ;;  %v2102_v38 = vmax.f32 %v1974_v46, %v2038_v15 }
 0x42b   :  { %v6606_v16 = vadd.f32 %v6353_v6, %v6337_v32  ;;  %v6610_v24 = vmul.f32 %v6266_v63, %v8525_v29  ;;  %v6614_v10 = vmul.f32 %v6266_v63, %v8526_v1  ;;  %2628 = vmatmul.bf16.vlgmr.msrb.gmra.mxu1 %v2157_v22  ;;  %v6617_v23 = vmul.f32 0.01, %v6579_v27  ;;  %v8527_v1 = vld [vmem:[#allocation36_spill] sm:$0xff] }
 0x42c   :  { %v2098_v62 = vmax.f32 %v1970_v39, %v2034_v44  ;;  %2539 = vmatmul.bf16.vlgmr.msra.gmra.mxu0 %v2156_v43  ;;  %v2101_v8 = vmax.f32 %v6491_v42, %v2037_v12  ;;  %v6621_v53 = vmul.f32 0.01, %v6592_v33  ;;  %v1982_v32 = vadd.f32 %v6351_v58, %v6345_v40 }
 0x42d   :  { %v2159_v41 = vpack.c.bf16 %v2099_v36, %v2097_v48  ;;  %v2044_v13 = vmul.f32 0.01, %v6494_v56  ;;  %v1983_v63 = vadd.f32 %v6353_v6, %v6349_v2  ;;  %v2045_v35 = vmul.f32 0.01, %v6497_v45 }
 0x42e   :  { %v2158_v30 = vpack.c.bf16 %v2098_v62, %v2096_v7  ;;  %v6629_v39 = vpack.c.bf16 %v2102_v38, %v2100_v57  ;;  %v6632_v59 = vmul.f32 0.01, %v6601_v0  ;;  %v6635_v42 = vmul.f32 0.01, %v6606_v16 }
 0x42f   :  { %v2046_v19 = vmul.f32 0.01, %v1982_v32  ;;  %v2108_v52 = vmax.f32 %v6494_v56, %v2044_v13  ;;  %v2047_v40 = vmul.f32 0.01, %v1983_v63  ;;  %v2109_v4 = vmax.f32 %v6497_v45, %v2045_v35 }
 0x430   :  { %v1986_v50 = vadd.f32 %v6351_v58, %v6361_v3  ;;  %v6641_v2 = vpack.c.bf16 %v2103_v9, %v2101_v8  ;;  %v2048_v51 = vmul.f32 0.01, %v6500_v26  ;;  %v1987_v47 = vadd.f32 %v6353_v6, %v6365_v49 }
 0x431   :  { %v2110_v43 = vmax.f32 %v1982_v32, %v2046_v19  ;;  %v2111_v46 = vmax.f32 %v1983_v63, %v2047_v40  ;;  %v2049_v44 = vmul.f32 0.01, %v6503_v5  ;;  %v1990_v56 = vadd.f32 %v6351_v58, %v6373_v25  ;;  %v8528_v63 = vld [vmem:[#allocation11_spill] sm:$0xff]  ;;  %v8529_v40 = vld [vmem:[#allocation26_spill] sm:$0xff] }
 0x432   :  { %v2050_v22 = vmul.f32 0.01, %v1986_v50  ;;  %v2112_v45 = vmax.f32 %v6500_v26, %v2048_v51  ;;  %v2051_v3 = vmul.f32 0.01, %v1987_v47  ;;  %v2052_v7 = vmul.f32 0.01, %v6506_v28 }
 0x433   :  { %v6649_v17 = vpack.c.bf16 %v2110_v43, %v2108_v52  ;;  %v6653_v34 = vpack.c.bf16 %v2111_v46, %v2109_v4  ;;  %v2113_v20 = vmax.f32 %v6503_v5, %v2049_v44  ;;  %v2054_v49 = vmul.f32 0.01, %v1990_v56  ;;  %v8530_v44 = vld [vmem:[#allocation27_spill] sm:$0xff] }
 0x434   :  { %v2114_v15 = vmax.f32 %v1986_v50, %v2050_v22  ;;  %v2115_v62 = vmax.f32 %v1987_v47, %v2051_v3  ;;  %v2116_v12 = vmax.f32 %v6506_v28, %v2052_v7  ;;  %v1991_v48 = vadd.f32 %v6353_v6, %v6377_v61  ;;  %v8531_v3 = vld [vmem:[#allocation29_spill] sm:$0xff] }
 0x435   :  { %v2053_v25 = vmul.f32 0.01, %v6509_v21  ;;  %v2118_v26 = vmax.f32 %v1990_v56, %v2054_v49  ;;  %v2056_v57 = vmul.f32 0.01, %v6512_v55  ;;  %v1995_v28 = vadd.f32 %v6353_v6, %v8527_v1 }
 0x436   :  { %v6660_v36 = vpack.c.bf16 %v2114_v15, %v2112_v45  ;;  %v6665_v38 = vpack.c.bf16 %v2115_v62, %v2113_v20  ;;  %v2055_v5 = vmul.f32 0.01, %v1991_v48  ;;  %v2058_v8 = vmul.f32 0.01, %v1994_v11  ;;  %v8532_v15 = vld [vmem:[#allocation13_spill] sm:$0xff] }
 0x437   :  { %v2117_v29 = vmax.f32 %v6509_v21, %v2053_v25  ;;  %v6670_v61 = vpack.c.bf16 %v2118_v26, %v2116_v12  ;;  %v2120_v9 = vmax.f32 %v6512_v55, %v2056_v57  ;;  %v2057_v32 = vmul.f32 0.01, %v6515_v14  ;;  %v8534_v12 = vld [vmem:[#allocation34_spill] sm:$0xff] }
 0x438   :  { %v2119_v31 = vmax.f32 %v1991_v48, %v2055_v5  ;;  %v2059_v13 = vmul.f32 0.01, %v1995_v28  ;;  %v1998_v35 = vadd.f32 %v6351_v58, %v8528_v63  ;;  %v2060_v19 = vmul.f32 0.01, %v6518_v18 }
 0x439   :  { %v2122_v21 = vmax.f32 %v1994_v11, %v2058_v8  ;;  %v2121_v52 = vmax.f32 %v6515_v14, %v2057_v32  ;;  %v1999_v4 = vadd.f32 %v6353_v6, %v8529_v40  ;;  %v2061_v50 = vmul.f32 0.01, %v6521_v54  ;;  %v8535_v11 = vld [vmem:[#allocation30_spill] sm:$0xff]  ;;  %v8536_v32 = vld [vmem:[#allocation12_spill] sm:$0xff]  ;;  %v8539_v40 = vld [vmem:[#allocation31_spill] sm:$0xff] }
 0x43a   :  { %2366 = vmatmul.bf16.gmra.mxu2 %v2158_v30  ;;  %2455 = vmatmul.bf16.gmra.mxu3 %v2159_v41  ;;  %v6681_v55 = vpack.c.bf16 %v2119_v31, %v2117_v29  ;;  %v2123_v43 = vmax.f32 %v1995_v28, %v2059_v13  ;;  %v2062_v51 = vmul.f32 0.01, %v1998_v35  ;;  %v2124_v47 = vmax.f32 %v6518_v18, %v2060_v19  ;;  %v8533_v18 = vld [vmem:[#allocation21_spill] sm:$0xff]  ;;  %v8537_v13 = vld [vmem:[#allocation23_spill] sm:$0xff] }
 0x43b   :  { %2633 = vmatmul.bf16.gmra.mxu1 %v2159_v41  ;;  %v6684_v46 = vpack.c.bf16 %v2122_v21, %v2120_v9  ;;  %v2063_v22 = vmul.f32 0.01, %v1999_v4  ;;  %v2002_v14 = vadd.f32 %v6351_v58, %v8530_v44  ;;  %v2064_v7 = vmul.f32 0.01, %v8531_v3  ;;  %v8538_v21 = vld [vmem:[#allocation18_spill] sm:$0xff] }
 0x43c   :  { %2544 = vmatmul.bf16.gmra.mxu0 %v2158_v30  ;;  %v2125_v30 = vmax.f32 %v6521_v54, %v2061_v50  ;;  %v6689_v56 = vpack.c.bf16 %v2123_v43, %v2121_v52  ;;  %v2126_v45 = vmax.f32 %v1998_v35, %v2062_v51  ;;  %v2003_v20 = vadd.f32 %v6353_v6, %v8532_v15 }
 0x43d   :  { %v2127_v49 = vmax.f32 %v1999_v4, %v2063_v22  ;;  %v2066_v62 = vmul.f32 0.01, %v2002_v14  ;;  %v2065_v41 = vmul.f32 0.01, %v8533_v18  ;;  %v2006_v48 = vadd.f32 %v6351_v58, %v8534_v12 }
 0x43e   :  { %v6697_v25 = vpack.c.bf16 %v2126_v45, %v2124_v47  ;;  %v2128_v54 = vmax.f32 %v8531_v3, %v2064_v7  ;;  %v2067_v26 = vmul.f32 0.01, %v2003_v20  ;;  %v2068_v57 = vmul.f32 0.01, %v8535_v11  ;;  %v8540_v47 = vld [vmem:[#allocation37_spill] sm:$0xff] }
 0x43f   :  { %v6701_v5 = vpack.c.bf16 %v2127_v49, %v2125_v30  ;;  %v2130_v29 = vmax.f32 %v2002_v14, %v2066_v62  ;;  %v2129_v1 = vmax.f32 %v8533_v18, %v2065_v41  ;;  %v2070_v28 = vmul.f32 0.01, %v2006_v48  ;;  %v8541_v45 = vld [vmem:[#allocation33_spill] sm:$0xff]  ;;  %v8543_v62 = vld [vmem:[#allocation22_spill] sm:$0xff] }
 0x440   :  { %v2131_v8 = vmax.f32 %v2003_v20, %v2067_v26  ;;  %v2132_v9 = vmax.f32 %v8535_v11, %v2068_v57  ;;  %v2007_v31 = vadd.f32 %v6353_v6, %v8536_v32  ;;  %v2069_v63 = vmul.f32 0.01, %v8537_v13  ;;  %v8542_v20 = vld [vmem:[#allocation19_spill] sm:$0xff]  ;;  %v8545_v26 = vld [vmem:[#allocation42_spill] sm:$0xff] }
 0x441   :  { %v6708_v35 = vpack.c.bf16 %v2130_v29, %v2128_v54  ;;  %v2134_v19 = vmax.f32 %v2006_v48, %v2070_v28  ;;  %v2010_v52 = vadd.f32 %v6351_v58, %v8538_v21  ;;  %v2072_v4 = vmul.f32 0.01, %v8539_v40  ;;  %v8544_v48 = vld [vmem:[#allocation38_spill] sm:$0xff]  ;;  %v8547_v21 = vld [vmem:[#allocation39_spill] sm:$0xff] }
 0x442   :  { %v6713_v50 = vpack.c.bf16 %v2131_v8, %v2129_v1  ;;  %v2071_v43 = vmul.f32 0.01, %v2007_v31  ;;  %v2133_v51 = vmax.f32 %v8537_v13, %v2069_v63  ;;  %v2011_v22 = vadd.f32 %v6353_v6, %v8540_v47 }
 0x443   :  { %v6718_v30 = vpack.c.bf16 %v2134_v19, %v2132_v9  ;;  %v2074_v44 = vmul.f32 0.01, %v2010_v52  ;;  %v2136_v14 = vmax.f32 %v8539_v40, %v2072_v4  ;;  %v2073_v3 = vmul.f32 0.01, %v8541_v45 }
 0x444   :  { %v2135_v7 = vmax.f32 %v2007_v31, %v2071_v43  ;;  %v2075_v15 = vmul.f32 0.01, %v2011_v22  ;;  %v2014_v49 = vadd.f32 %v6351_v58, %v8542_v20  ;;  %v2076_v18 = vmul.f32 0.01, %v8543_v62  ;;  %v8546_v31 = vld [vmem:[#allocation20_spill] sm:$0xff] }
 0x445   :  { %v2138_v41 = vmax.f32 %v2010_v52, %v2074_v44  ;;  %v2137_v12 = vmax.f32 %v8541_v45, %v2073_v3  ;;  %v2015_v54 = vadd.f32 %v6353_v6, %v8544_v48  ;;  %v2077_v11 = vmul.f32 0.01, %v8545_v26  ;;  %v8549_v3 = vld [vmem:[#allocation40_spill] sm:$0xff] }
 0x446   :  { %v6729_v57 = vpack.c.bf16 %v2135_v7, %v2133_v51  ;;  %v2139_v29 = vmax.f32 %v2011_v22, %v2075_v15  ;;  %v2078_v1 = vmul.f32 0.01, %v2014_v49  ;;  %v2140_v28 = vmax.f32 %v8543_v62, %v2076_v18  ;;  %v8548_v51 = vld [vmem:[#allocation32_spill] sm:$0xff]  ;;  %v8550_v18 = vld [vmem:[#allocation7_spill] sm:$0xff] }
 0x447   :  { %v6733_v8 = vpack.c.bf16 %v2138_v41, %v2136_v14  ;;  %v2079_v9 = vmul.f32 0.01, %v2015_v54  ;;  %v2141_v32 = vmax.f32 %v8545_v26, %v2077_v11  ;;  %v2018_v13 = vadd.f32 %v6351_v58, %v8546_v31  ;;  %v8552_v26 = vld [vmem:[#allocation14_spill] sm:$0xff] }
 0x448   :  { %v6739_v63 = vpack.c.bf16 %v2139_v29, %v2137_v12  ;;  %v2142_v19 = vmax.f32 %v2014_v49, %v2078_v1  ;;  %v2080_v52 = vmul.f32 0.01, %v8547_v21  ;;  %v2019_v40 = vadd.f32 %v6353_v6, %v6587_v60 }
 0x449   :  { %v2143_v4 = vmax.f32 %v2015_v54, %v2079_v9  ;;  %v2082_v43 = vmul.f32 0.01, %v2018_v13  ;;  %v2081_v47 = vmul.f32 0.01, %v8548_v51  ;;  %v2022_v22 = vadd.f32 %v6351_v58, %v6596_v37  ;;  %v8551_v54 = vld [vmem:[#allocation25_spill] sm:$0xff] }
 0x44a   :  { %2371 = vmatmul.bf16.gmra.mxu2 %v6629_v39  ;;  %2460 = vmatmul.bf16.gmra.mxu3 %v6641_v2  ;;  %v6748_v44 = vpack.c.bf16 %v2142_v19, %v2140_v28  ;;  %v2144_v14 = vmax.f32 %v8547_v21, %v2080_v52  ;;  %v2083_v45 = vmul.f32 0.01, %v2019_v40  ;;  %v2084_v7 = vmul.f32 0.01, %v8549_v3 }
 0x44b   :  { %2638 = vmatmul.bf16.gmra.mxu1 %v6641_v2  ;;  %v6753_v15 = vpack.c.bf16 %v2143_v4, %v2141_v32  ;;  %v2146_v60 = vmax.f32 %v2018_v13, %v2082_v43  ;;  %v2086_v20 = vmul.f32 0.01, %v2022_v22  ;;  %v2023_v37 = vadd.f32 %v6353_v6, %v6610_v24  ;;  %v8553_v13 = vld [vmem:[#allocation41_spill] sm:$0xff] }
 0x44c   :  { %2549 = vmatmul.bf16.gmra.mxu0 %v6629_v39  ;;  %v2145_v39 = vmax.f32 %v8548_v51, %v2081_v47  ;;  %v2147_v49 = vmax.f32 %v2019_v40, %v2083_v45  ;;  %v2148_v62 = vmax.f32 %v8549_v3, %v2084_v7  ;;  %v2085_v41 = vmul.f32 0.01, %v8550_v18 }
 0x44d   :  { %v6760_v12 = vpack.c.bf16 %v2146_v60, %v2144_v14  ;;  %v2150_v48 = vmax.f32 %v2022_v22, %v2086_v20  ;;  %v2026_v2 = vadd.f32 %v6351_v58, %v8551_v54  ;;  %v2088_v11 = vmul.f32 0.01, %v8552_v26 }
 0x44e   :  { %v6765_v29 = vpack.c.bf16 %v2147_v49, %v2145_v39  ;;  %v2087_v1 = vmul.f32 0.01, %v2023_v37  ;;  %v2149_v28 = vmax.f32 %v8550_v18, %v2085_v41  ;;  %v2027_v9 = vadd.f32 %v6353_v6, %v6614_v10 }
 0x44f   :  { %v6770_v32 = vpack.c.bf16 %v2150_v48, %v2148_v62  ;;  %v2090_v24 = vmul.f32 0.01, %v2026_v2  ;;  %v2152_v31 = vmax.f32 %v8552_v26, %v2088_v11  ;;  %v2089_v19 = vmul.f32 0.01, %v8553_v13 }
 0x450   :  { %v2151_v21 = vmax.f32 %v2023_v37, %v2087_v1  ;;  %v2091_v52 = vmul.f32 0.01, %v2027_v9  ;;  %v2104_v58 = vmax.f32 %v6579_v27, %v6617_v23  ;;  %v2106_v40 = vmax.f32 %v6592_v33, %v6621_v53  ;;  %v3798_v33 = vld [vmem:[%s8184_s3 + $0x6] ss:$8 sm:$0x3] }
 0x451   :  { %v2154_v4 = vmax.f32 %v2026_v2, %v2090_v24  ;;  %v2153_v43 = vmax.f32 %v8553_v13, %v2089_v19  ;;  %v2105_v6 = vmax.f32 %v6601_v0, %v6632_v59  ;;  %v2107_v10 = vmax.f32 %v6606_v16, %v6635_v42 }
 0x452   :  { %v6783_v51 = vpack.c.bf16 %v2151_v21, %v2149_v28  ;;  %v2155_v47 = vmax.f32 %v2027_v9, %v2091_v52  ;;  %v2162_v27 = vpack.c.bf16 %v2106_v40, %v2104_v58  ;;  %v6808_v0 = vperm.slane %v3798_v33, 1  ;;  %v4266_v58 = vld [vmem:[%s8183_s2 + $0x38] sm:$0xff] }
 0x453   :  { %v6785_v22 = vpack.c.bf16 %v2154_v4, %v2152_v31  ;;  %v2163_v23 = vpack.c.bf16 %v2107_v10, %v2105_v6  ;;  %v6812_v59 = vperm.slane %v3798_v33, 0  ;;  %v4274_v40 = vld [vmem:[%s8183_s2 + $0x78] sm:$0xff]  ;;  %3361 = vmatpush.bf16.msrb.mxu2 %v4266_v58 }
 0x454   :  { %v6787_v14 = vpack.c.bf16 %v2155_v47, %v2153_v43  ;;  %3450 = vmatpush.bf16.msrb.mxu3 %v4274_v40 }
 0x45a   :  { %2376 = vmatmul.bf16.gmra.mxu2 %v2162_v27  ;;  %2465 = vmatmul.bf16.gmra.mxu3 %v2163_v23 }
 0x45b   :  { %2643 = vmatmul.bf16.gmra.mxu1 %v2163_v23 }
 0x45c   :  { %2554 = vmatmul.bf16.gmra.mxu0 %v2162_v27 }
 0x46a   :  { %2381 = vmatmul.bf16.gmra.mxu2 %v6649_v17  ;;  %2470 = vmatmul.bf16.gmra.mxu3 %v6653_v34 }
 0x46b   :  { %2648 = vmatmul.bf16.gmra.mxu1 %v6653_v34 }
 0x46c   :  { %2559 = vmatmul.bf16.gmra.mxu0 %v6649_v17 }
 0x47a   :  { %2386 = vmatmul.bf16.gmra.mxu2 %v6660_v36  ;;  %2475 = vmatmul.bf16.gmra.mxu3 %v6665_v38 }
 0x47b   :  { %2653 = vmatmul.bf16.gmra.mxu1 %v6665_v38 }
 0x47c   :  { %2564 = vmatmul.bf16.gmra.mxu0 %v6660_v36 }
 0x48a   :  { %2391 = vmatmul.bf16.gmra.mxu2 %v6670_v61  ;;  %2480 = vmatmul.bf16.gmra.mxu3 %v6681_v55 }
 0x48b   :  { %2658 = vmatmul.bf16.gmra.mxu1 %v6681_v55 }
 0x48c   :  { %2569 = vmatmul.bf16.gmra.mxu0 %v6670_v61 }
 0x49a   :  { %2396 = vmatmul.bf16.gmra.mxu2 %v6684_v46  ;;  %2485 = vmatmul.bf16.gmra.mxu3 %v6689_v56 }
 0x49b   :  { %2663 = vmatmul.bf16.gmra.mxu1 %v6689_v56 }
 0x49c   :  { %2574 = vmatmul.bf16.gmra.mxu0 %v6684_v46 }
 0x4a8   :  { %v2629_v42 = vpop.f32.mrf.mxu1 }
 0x4a9   :  { %v2540_v16 = vpop.f32.mrf.mxu0 }
 0x4aa   :  { %v2541_v53 = vadd.f32 %v2540_v16, %v6808_v0  ;;  %2401 = vmatmul.bf16.gmra.mxu2 %v6697_v25  ;;  %2490 = vmatmul.bf16.gmra.mxu3 %v6701_v5 }
 0x4ab   :  { %2668 = vmatmul.bf16.gmra.mxu1 %v6701_v5 }
 0x4ac   :  { %v6815_v17 = vadd.f32 %v2629_v42, %v2541_v53  ;;  %2579 = vmatmul.bf16.gmra.mxu0 %v6697_v25 }
 0x4ad   :  { %v2362_v34 = vpop.f32.mrf.mxu2  ;;  %v2451_v38 = vpop.f32.mrf.mxu3 }
 0x4ae   :  { %8554 = vst [vmem:[#allocation10_spill] sm:$0xff] %v6815_v17  ;;  %v2363_v36 = vadd.f32 %v2362_v34, %v6812_v59 }
 0x4b0   :  { %v6820_v61 = vadd.f32 %v2451_v38, %v2363_v36  ;;  %v2631_v56 = vpop.f32.mrf.mxu1 }
 0x4b1   :  { %v2542_v55 = vpop.f32.mrf.mxu0 }
 0x4b2   :  { %v2543_v46 = vadd.f32 %v2542_v55, %v6808_v0 }
 0x4b4   :  { %v6823_v45 = vadd.f32 %v2631_v56, %v2543_v46 }
 0x4b5   :  { %v2364_v3 = vpop.f32.mrf.mxu2  ;;  %v2453_v60 = vpop.f32.mrf.mxu3 }
 0x4b6   :  { %8555 = vst [vmem:[#allocation15_spill] sm:$0xff] %v6823_v45  ;;  %v2365_v7 = vadd.f32 %v2364_v3, %v6812_v59 }
 0x4b8   :  { %v6826_v39 = vadd.f32 %v2453_v60, %v2365_v7  ;;  %v2634_v20 = vpop.f32.mrf.mxu1 }
 0x4b9   :  { %v2545_v25 = vpop.f32.mrf.mxu0 }
 0x4ba   :  { %8556 = vst [vmem:[#allocation43_spill] sm:$0xff] %v6826_v39  ;;  %v2546_v5 = vadd.f32 %v2545_v25, %v6808_v0  ;;  %2406 = vmatmul.bf16.gmra.mxu2 %v6708_v35  ;;  %2495 = vmatmul.bf16.gmra.mxu3 %v6713_v50 }
 0x4bb   :  { %2673 = vmatmul.bf16.gmra.mxu1 %v6713_v50 }
 0x4bc   :  { %v6831_v49 = vadd.f32 %v2634_v20, %v2546_v5  ;;  %2584 = vmatmul.bf16.gmra.mxu0 %v6708_v35 }
 0x4bd   :  { %v2367_v62 = vpop.f32.mrf.mxu2  ;;  %v2456_v18 = vpop.f32.mrf.mxu3 }
 0x4be   :  { %8557 = vst [vmem:[#allocation16_spill] sm:$0xff] %v6831_v49  ;;  %v2368_v37 = vadd.f32 %v2367_v62, %v6812_v59 }
 0x4c0   :  { %v6836_v41 = vadd.f32 %v2456_v18, %v2368_v37  ;;  %v2636_v2 = vpop.f32.mrf.mxu1 }
 0x4c1   :  { %v2547_v48 = vpop.f32.mrf.mxu0 }
 0x4c2   :  { %8558 = vst [vmem:[#allocation6_spill] sm:$0xff] %v6836_v41  ;;  %v2548_v54 = vadd.f32 %v2547_v48, %v6808_v0 }
 0x4c4   :  { %v6839_v26 = vadd.f32 %v2636_v2, %v2548_v54  ;;  %v4265_v2 = vld [vmem:[%s8183_s2 + $0x30] sm:$0xff] }
 0x4c5   :  { %v2369_v11 = vpop.f32.mrf.mxu2  ;;  %v2458_v28 = vpop.f32.mrf.mxu3  ;;  %3362 = vmatpush.bf16.msrb.mxu2 %v4265_v2 }
 0x4c6   :  { %8559 = vst [vmem:[#allocation24_spill] sm:$0xff] %v6839_v26  ;;  %v2370_v1 = vadd.f32 %v2369_v11, %v6812_v59  ;;  %v4273_v11 = vld [vmem:[%s8183_s2 + $0x70] sm:$0xff] }
 0x4c7   :  { %3451 = vmatpush.bf16.msrb.mxu3 %v4273_v11 }
 0x4c8   :  { %v6842_v9 = vadd.f32 %v2458_v28, %v2370_v1  ;;  %v2639_v24 = vpop.f32.mrf.mxu1 }
 0x4c9   :  { %v2550_v35 = vpop.f32.mrf.mxu0 }
 0x4ca   :  { %v2551_v50 = vadd.f32 %v2550_v35, %v6808_v0  ;;  %2411 = vmatmul.bf16.gmra.mxu2 %v6718_v30  ;;  %2500 = vmatmul.bf16.gmra.mxu3 %v6729_v57 }
 0x4cb   :  { %2678 = vmatmul.bf16.gmra.mxu1 %v6729_v57 }
 0x4cc   :  { %v6847_v31 = vadd.f32 %v2639_v24, %v2551_v50  ;;  %2589 = vmatmul.bf16.gmra.mxu0 %v6718_v30 }
 0x4cd   :  { %v2372_v13 = vpop.f32.mrf.mxu2  ;;  %v2461_v21 = vpop.f32.mrf.mxu3 }
 0x4ce   :  { %8560 = vst [vmem:[#allocation17_spill] sm:$0xff] %v6847_v31  ;;  %v2373_v19 = vadd.f32 %v2372_v13, %v6812_v59 }
 0x4d0   :  { %v6852_v52 = vadd.f32 %v2461_v21, %v2373_v19  ;;  %v2641_v30 = vpop.f32.mrf.mxu1 }
 0x4d1   :  { %v2552_v4 = vpop.f32.mrf.mxu0 }
 0x4d2   :  { %v2553_v43 = vadd.f32 %v2552_v4, %v6808_v0 }
 0x4d4   :  { %v6861_v57 = vadd.f32 %v2641_v30, %v2553_v43 }
 0x4d5   :  { %v2374_v6 = vpop.f32.mrf.mxu2  ;;  %v2463_v47 = vpop.f32.mrf.mxu3 }
 0x4d6   :  { %v2375_v10 = vadd.f32 %v2374_v6, %v6812_v59 }
 0x4d8   :  { %v6864_v27 = vadd.f32 %v2463_v47, %v2375_v10  ;;  %v2644_v16 = vpop.f32.mrf.mxu1 }
 0x4d9   :  { %v2555_v23 = vpop.f32.mrf.mxu0 }
 0x4da   :  { %v2556_v33 = vadd.f32 %v2555_v23, %v6808_v0  ;;  %2416 = vmatmul.bf16.gmra.mxu2 %v6733_v8  ;;  %2505 = vmatmul.bf16.gmra.mxu3 %v6739_v63 }
 0x4db   :  { %2683 = vmatmul.bf16.gmra.mxu1 %v6739_v63 }
 0x4dc   :  { %v6869_v53 = vadd.f32 %v2644_v16, %v2556_v33  ;;  %2594 = vmatmul.bf16.gmra.mxu0 %v6733_v8 }
 0x4dd   :  { %v2377_v42 = vpop.f32.mrf.mxu2  ;;  %v2466_v36 = vpop.f32.mrf.mxu3 }
 0x4de   :  { %v2378_v34 = vadd.f32 %v2377_v42, %v6812_v59 }
 0x4e0   :  { %v6874_v38 = vadd.f32 %v2466_v36, %v2378_v34  ;;  %v2646_v56 = vpop.f32.mrf.mxu1  ;;  %v4264_v34 = vld [vmem:[%s8183_s2 + $0x28] sm:$0xff] }
 0x4e1   :  { %v2557_v55 = vpop.f32.mrf.mxu0  ;;  %v4272_v36 = vld [vmem:[%s8183_s2 + $0x68] sm:$0xff]  ;;  %3363 = vmatpush.bf16.msrb.mxu2 %v4264_v34 }
 0x4e2   :  { %v2558_v46 = vadd.f32 %v2557_v55, %v6808_v0  ;;  %3452 = vmatpush.bf16.msrb.mxu3 %v4272_v36 }
 0x4e4   :  { %v6877_v3 = vadd.f32 %v2646_v56, %v2558_v46 }
 0x4e5   :  { %v2379_v7 = vpop.f32.mrf.mxu2  ;;  %v2468_v25 = vpop.f32.mrf.mxu3 }
 0x4e6   :  { %8561 = vst [vmem:[#allocation35_spill] sm:$0xff] %v6877_v3  ;;  %v2380_v60 = vadd.f32 %v2379_v7, %v6812_v59 }
 0x4e8   :  { %v6880_v5 = vadd.f32 %v2468_v25, %v2380_v60  ;;  %v2649_v20 = vpop.f32.mrf.mxu1 }
 0x4e9   :  { %v2560_v8 = vpop.f32.mrf.mxu0 }
 0x4ea   :  { %v2561_v63 = vadd.f32 %v2560_v8, %v6808_v0  ;;  %2421 = vmatmul.bf16.gmra.mxu2 %v6748_v44  ;;  %2510 = vmatmul.bf16.gmra.mxu3 %v6753_v15 }
 0x4eb   :  { %2688 = vmatmul.bf16.gmra.mxu1 %v6753_v15 }
 0x4ec   :  { %v6885_v62 = vadd.f32 %v2649_v20, %v2561_v63  ;;  %2599 = vmatmul.bf16.gmra.mxu0 %v6748_v44 }
 0x4ed   :  { %v2382_v37 = vpop.f32.mrf.mxu2  ;;  %v2471_v48 = vpop.f32.mrf.mxu3 }
 0x4ee   :  { %v2383_v18 = vadd.f32 %v2382_v37, %v6812_v59 }
 0x4f0   :  { %v6890_v54 = vadd.f32 %v2471_v48, %v2383_v18  ;;  %v6900_v44 = vpop.f32.mrf.mxu1 }
 0x4f1   :  { %v6898_v1 = vpop.f32.mrf.mxu0 }
 0x4f5   :  { %v6902_v15 = vpop.f32.mrf.mxu2  ;;  %v6904_v28 = vpop.f32.mrf.mxu3 }
 0x4f8   :  { %v2654_v24 = vpop.f32.mrf.mxu1 }
 0x4f9   :  { %v2565_v35 = vpop.f32.mrf.mxu0 }
 0x4fa   :  { %v2566_v50 = vadd.f32 %v2565_v35, %v6808_v0  ;;  %2426 = vmatmul.bf16.gmra.mxu2 %v6760_v12  ;;  %2515 = vmatmul.bf16.gmra.mxu3 %v6765_v29 }
 0x4fb   :  { %2693 = vmatmul.bf16.gmra.mxu1 %v6765_v29 }
 0x4fc   :  { %v6909_v13 = vadd.f32 %v2654_v24, %v2566_v50  ;;  %2604 = vmatmul.bf16.gmra.mxu0 %v6760_v12 }
 0x4fd   :  { %v2387_v19 = vpop.f32.mrf.mxu2  ;;  %v2476_v58 = vpop.f32.mrf.mxu3 }
 0x4fe   :  { %v2388_v21 = vadd.f32 %v2387_v19, %v6812_v59 }
 0x500   :  { %v6914_v40 = vadd.f32 %v2476_v58, %v2388_v21  ;;  %v6918_v43 = vpop.f32.mrf.mxu1 }
 0x501   :  { %v6916_v4 = vpop.f32.mrf.mxu0 }
 0x505   :  { %v6920_v30 = vpop.f32.mrf.mxu2  ;;  %v6922_v6 = vpop.f32.mrf.mxu3 }
 0x508   :  { %v2659_v12 = vpop.f32.mrf.mxu1 }
 0x509   :  { %v2570_v10 = vpop.f32.mrf.mxu0 }
 0x50a   :  { %v2571_v47 = vadd.f32 %v2570_v10, %v6808_v0  ;;  %2431 = vmatmul.bf16.gmra.mxu2 %v6770_v32  ;;  %2520 = vmatmul.bf16.gmra.mxu3 %v6783_v51  ;;  %v4263_v10 = vld [vmem:[%s8183_s2 + $0x20] sm:$0xff] }
 0x50b   :  { %2698 = vmatmul.bf16.gmra.mxu1 %v6783_v51  ;;  %3364 = vmatpush.bf16.msrb.mxu2 %v4263_v10 }
 0x50c   :  { %v6927_v29 = vadd.f32 %v2659_v12, %v2571_v47  ;;  %2609 = vmatmul.bf16.gmra.mxu0 %v6770_v32  ;;  %v4271_v47 = vld [vmem:[%s8183_s2 + $0x60] sm:$0xff] }
 0x50d   :  { %v2392_v23 = vpop.f32.mrf.mxu2  ;;  %v2481_v16 = vpop.f32.mrf.mxu3  ;;  %3453 = vmatpush.bf16.msrb.mxu3 %v4271_v47 }
 0x50e   :  { %8562 = vst [vmem:[#allocation9_spill] sm:$0xff] %v6927_v29  ;;  %v2393_v33 = vadd.f32 %v2392_v23, %v6812_v59 }
 0x510   :  { %v6932_v42 = vadd.f32 %v2481_v16, %v2393_v33  ;;  %v6942_v32 = vpop.f32.mrf.mxu1 }
 0x511   :  { %v6940_v55 = vpop.f32.mrf.mxu0 }
 0x512   :  { %8563 = vst [vmem:[#allocation8_spill] sm:$0xff] %v6932_v42 }
 0x515   :  { %v6944_v51 = vpop.f32.mrf.mxu2  ;;  %v6946_v46 = vpop.f32.mrf.mxu3 }
 0x518   :  { %v2664_v60 = vpop.f32.mrf.mxu1 }
 0x519   :  { %v2575_v56 = vpop.f32.mrf.mxu0 }
 0x51a   :  { %v2576_v7 = vadd.f32 %v2575_v56, %v6808_v0  ;;  %2436 = vmatmul.bf16.gmra.mxu2 %v6785_v22  ;;  %2525 = vmatmul.bf16.gmra.mxu3 %v6787_v14 }
 0x51b   :  { %2703 = vmatmul.bf16.gmra.mxu1 %v6787_v14 }
 0x51c   :  { %v6951_v25 = vadd.f32 %v2664_v60, %v2576_v7  ;;  %2614 = vmatmul.bf16.gmra.mxu0 %v6785_v22 }
 0x51d   :  { %v2397_v8 = vpop.f32.mrf.mxu2  ;;  %v2486_v20 = vpop.f32.mrf.mxu3 }
 0x51e   :  { %8564 = vst [vmem:[#allocation28_spill] sm:$0xff] %v6951_v25  ;;  %v2398_v63 = vadd.f32 %v2397_v8, %v6812_v59 }
 0x520   :  { %v6956_v37 = vadd.f32 %v2486_v20, %v2398_v63  ;;  %v6960_v48 = vpop.f32.mrf.mxu1 }
 0x521   :  { %v6958_v18 = vpop.f32.mrf.mxu0 }
 0x525   :  { %v6962_v2 = vpop.f32.mrf.mxu2  ;;  %v6964_v11 = vpop.f32.mrf.mxu3 }
 0x528   :  { %v2669_v22 = vpop.f32.mrf.mxu1 }
 0x529   :  { %v2580_v35 = vpop.f32.mrf.mxu0 }
 0x52a   :  { %v2581_v50 = vadd.f32 %v2580_v35, %v6808_v0 }
 0x52c   :  { %v6967_v24 = vadd.f32 %v2669_v22, %v2581_v50 }
 0x52d   :  { %v2402_v14 = vpop.f32.mrf.mxu2  ;;  %v2491_v21 = vpop.f32.mrf.mxu3 }
 0x52e   :  { %8565 = vst [vmem:[#allocation36_spill] sm:$0xff] %v6967_v24  ;;  %v2403_v19 = vadd.f32 %v2402_v14, %v6812_v59 }
 0x530   :  { %v6970_v58 = vadd.f32 %v2491_v21, %v2403_v19  ;;  %v6980_v23 = vpop.f32.mrf.mxu1 }
 0x531   :  { %v6978_v12 = vpop.f32.mrf.mxu0 }
 0x532   :  { %8566 = vst [vmem:[#allocation11_spill] sm:$0xff] %v6970_v58  ;;  %v2790_v58 = vmul.f32 %v6831_v49, %v6831_v49 }
 0x535   :  { %v6982_v33 = vpop.f32.mrf.mxu2  ;;  %v6984_v16 = vpop.f32.mrf.mxu3 }
 0x536   :  { %8567 = vst [vmem:[#allocation26_spill] sm:$0xff] %v6982_v33 }
 0x537   :  { %8568 = vst [vmem:[#allocation27_spill] sm:$0xff] %v6984_v16 }
 0x538   :  { %v2674_v56 = vpop.f32.mrf.mxu1 }
 0x539   :  { %v2585_v34 = vpop.f32.mrf.mxu0 }
 0x53a   :  { %v2586_v36 = vadd.f32 %v2585_v34, %v6808_v0 }
 0x53c   :  { %v6987_v7 = vadd.f32 %v2674_v56, %v2586_v36 }
 0x53d   :  { %v2407_v60 = vpop.f32.mrf.mxu2  ;;  %v2496_v63 = vpop.f32.mrf.mxu3 }
 0x53e   :  { %8569 = vst [vmem:[#allocation29_spill] sm:$0xff] %v6987_v7  ;;  %v2408_v8 = vadd.f32 %v2407_v60, %v6812_v59 }
 0x540   :  { %v6990_v20 = vadd.f32 %v2496_v63, %v2408_v8  ;;  %v6994_v50 = vpop.f32.mrf.mxu1  ;;  %v4262_v8 = vld [vmem:[%s8183_s2 + $0x18] sm:$0xff] }
 0x541   :  { %v6992_v35 = vpop.f32.mrf.mxu0  ;;  %v4270_v63 = vld [vmem:[%s8183_s2 + $0x58] sm:$0xff]  ;;  %3365 = vmatpush.bf16.msrb.mxu2 %v4262_v8 }
 0x542   :  { %8570 = vst [vmem:[#allocation13_spill] sm:$0xff] %v6990_v20  ;;  %3454 = vmatpush.bf16.msrb.mxu3 %v4270_v63 }
 0x545   :  { %v6996_v22 = vpop.f32.mrf.mxu2  ;;  %v6998_v14 = vpop.f32.mrf.mxu3 }
 0x546   :  { %8571 = vst [vmem:[#allocation21_spill] sm:$0xff] %v6996_v22 }
 0x547   :  { %8572 = vst [vmem:[#allocation34_spill] sm:$0xff] %v6998_v14 }
 0x548   :  { %v2679_v10 = vpop.f32.mrf.mxu1 }
 0x549   :  { %v2590_v19 = vpop.f32.mrf.mxu0 }
 0x54a   :  { %v2591_v21 = vadd.f32 %v2590_v19, %v6808_v0 }
 0x54c   :  { %v7001_v47 = vadd.f32 %v2679_v10, %v2591_v21 }
 0x54d   :  { %v2412_v34 = vpop.f32.mrf.mxu2  ;;  %v2501_v56 = vpop.f32.mrf.mxu3 }
 0x54e   :  { %8573 = vst [vmem:[#allocation30_spill] sm:$0xff] %v7001_v47  ;;  %v2413_v36 = vadd.f32 %v2412_v34, %v6812_v59 }
 0x550   :  { %v7004_v60 = vadd.f32 %v2501_v56, %v2413_v36  ;;  %v7014_v19 = vpop.f32.mrf.mxu1 }
 0x551   :  { %v7012_v20 = vpop.f32.mrf.mxu0  ;;  %8575 = vst [vmem:[#allocation23_spill] sm:$0xff] %v7014_v19  ;;  %v2791_v19 = vmul.f32 %v6842_v9, %v6842_v9 }
 0x552   :  { %8574 = vst [vmem:[#allocation12_spill] sm:$0xff] %v7004_v60 }
 0x555   :  { %v7016_v21 = vpop.f32.mrf.mxu2  ;;  %v7018_v10 = vpop.f32.mrf.mxu3 }
 0x556   :  { %8576 = vst [vmem:[#allocation18_spill] sm:$0xff] %v7016_v21  ;;  %v2788_v21 = vmul.f32 %v6823_v45, %v6823_v45 }
 0x557   :  { %8577 = vst [vmem:[#allocation31_spill] sm:$0xff] %v7018_v10  ;;  %v2786_v10 = vmul.f32 %v6815_v17, %v6815_v17 }
 0x558   :  { %v7022_v36 = vpop.f32.mrf.mxu1 }
 0x559   :  { %v7020_v34 = vpop.f32.mrf.mxu0  ;;  %8578 = vst [vmem:[#allocation37_spill] sm:$0xff] %v7022_v36  ;;  %v2785_v36 = vmul.f32 %v6820_v61, %v6820_v61 }
 0x55d   :  { %v7024_v56 = vpop.f32.mrf.mxu2  ;;  %v7026_v60 = vpop.f32.mrf.mxu3 }
 0x55e   :  { %8579 = vst [vmem:[#allocation33_spill] sm:$0xff] %v7024_v56 }
 0x55f   :  { %8580 = vst [vmem:[#allocation19_spill] sm:$0xff] %v7026_v60  ;;  %v2746_v60 = vadd.f32 %v6823_v45, %v6815_v17  ;;  %v2794_v45 = vmul.f32 %v6847_v31, %v6847_v31 }
 0x560   :  { %v7030_v22 = vpop.f32.mrf.mxu1 }
 0x561   :  { %v7028_v14 = vpop.f32.mrf.mxu0  ;;  %8582 = vst [vmem:[#allocation38_spill] sm:$0xff] %v7030_v22  ;;  %v2787_v22 = vmul.f32 %v6826_v39, %v6826_v39  ;;  %v2747_v47 = vadd.f32 %v2746_v60, %v6831_v49 }
 0x562   :  { %8581 = vst [vmem:[#allocation22_spill] sm:$0xff] %v7028_v14 }
 0x565   :  { %v7032_v8 = vpop.f32.mrf.mxu2  ;;  %v7034_v63 = vpop.f32.mrf.mxu3 }
 0x566   :  { %8583 = vst [vmem:[#allocation42_spill] sm:$0xff] %v7032_v8  ;;  %v2886_v8 = vadd.f32 %v2788_v21, %v2786_v10  ;;  %v2709_v21 = vadd.f32 %v6826_v39, %v6820_v61  ;;  %v2849_v10 = vadd.f32 %v2787_v22, %v2785_v36  ;;  %v4261_v22 = vld [vmem:[%s8183_s2 + $0x10] sm:$0xff]  ;;  %v2793_v36 = vmul.f32 %v6852_v52, %v6852_v52 }
 0x567   :  { %8584 = vst [vmem:[#allocation20_spill] sm:$0xff] %v7034_v63  ;;  %v2792_v63 = vmul.f32 %v6839_v26, %v6839_v26  ;;  %3366 = vmatpush.bf16.msrb.mxu2 %v4261_v22 }
 0x568   :  { %v7050_v16 = vpop.f32.mrf.mxu1  ;;  %v2887_v14 = vadd.f32 %v2886_v8, %v2790_v58  ;;  %v2796_v58 = vmul.f32 %v6861_v57, %v6861_v57  ;;  %v2563_v8 = vadd.f32 %v6898_v1, %v6808_v0  ;;  %v2710_v49 = vadd.f32 %v2709_v21, %v6836_v41 }
 0x569   :  { %v7042_v56 = vpop.f32.mrf.mxu0  ;;  %8586 = vst [vmem:[#allocation32_spill] sm:$0xff] %v7050_v16  ;;  %v2748_v16 = vadd.f32 %v2747_v47, %v6839_v26  ;;  %v4269_v47 = vld [vmem:[%s8183_s2 + $0x50] sm:$0xff]  ;;  %v2798_v1 = vmul.f32 %v6869_v53, %v6869_v53 }
 0x56a   :  { %8585 = vst [vmem:[#allocation39_spill] sm:$0xff] %v7042_v56  ;;  %v2789_v56 = vmul.f32 %v6836_v41, %v6836_v41  ;;  %v2888_v60 = vadd.f32 %v2887_v14, %v2792_v63  ;;  %3455 = vmatpush.bf16.msrb.mxu3 %v4269_v47  ;;  %v2385_v47 = vadd.f32 %v6902_v15, %v6812_v59 }
 0x56b   :  { %v2749_v39 = vadd.f32 %v2748_v16, %v6847_v31  ;;  %v2800_v31 = vmul.f32 %v6877_v3, %v6877_v3 }
 0x56c   :  { %v2889_v14 = vadd.f32 %v2888_v60, %v2794_v45  ;;  %v7091_v45 = vadd.f32 %v6900_v44, %v2563_v8  ;;  %v2568_v60 = vadd.f32 %v6916_v4, %v6808_v0  ;;  %v2797_v4 = vmul.f32 %v6874_v38, %v6874_v38 }
 0x56d   :  { %v7059_v17 = vpop.f32.mrf.mxu2  ;;  %v7066_v33 = vpop.f32.mrf.mxu3  ;;  %v2750_v21 = vadd.f32 %v2749_v39, %v6861_v57 }
 0x56e   :  { %8587 = vst [vmem:[#allocation40_spill] sm:$0xff] %v7059_v17  ;;  %v2850_v17 = vadd.f32 %v2849_v10, %v2789_v56  ;;  %v2711_v56 = vadd.f32 %v2710_v49, %v6842_v9  ;;  %v2890_v10 = vadd.f32 %v2889_v14, %v2796_v58  ;;  %v2802_v58 = vmul.f32 %v6885_v62, %v6885_v62 }
 0x56f   :  { %v2751_v39 = vadd.f32 %v2750_v21, %v6869_v53  ;;  %v2799_v21 = vmul.f32 %v6880_v5, %v6880_v5 }
 0x570   :  { %v2851_v16 = vadd.f32 %v2850_v17, %v2791_v19  ;;  %v7095_v26 = vpop.f32.mrf.mxu1  ;;  %v2712_v41 = vadd.f32 %v2711_v56, %v6852_v52  ;;  %v2795_v17 = vmul.f32 %v6864_v27, %v6864_v27  ;;  %v2891_v19 = vadd.f32 %v2890_v10, %v2798_v1 }
 0x571   :  { %v7084_v63 = vpop.f32.mrf.mxu0  ;;  %v2752_v8 = vadd.f32 %v2751_v39, %v6877_v3  ;;  %v7116_v1 = vadd.f32 %v6918_v43, %v2568_v60  ;;  %v2801_v43 = vmul.f32 %v6890_v54, %v6890_v54  ;;  %v7132_v60 = vadd.f32 %v6904_v28, %v2385_v47  ;;  %v7150_v47 = vld [vmem:[%s8183_s2 + $0xb8] sm:$0xff] }
 0x572   :  { %v2852_v49 = vadd.f32 %v2851_v16, %v2793_v36  ;;  %v2713_v44 = vadd.f32 %v2712_v41, %v6864_v27  ;;  %v2892_v56 = vadd.f32 %v2891_v19, %v2800_v31  ;;  %v2804_v36 = vmul.f32 %v7091_v45, %v7091_v45  ;;  %3667 = vmatpush.bf16.msrb.mxu0 %v7150_v47 }
 0x573   :  { %v2573_v41 = vadd.f32 %v6940_v55, %v6808_v0  ;;  %v2753_v10 = vadd.f32 %v2752_v8, %v6885_v62  ;;  %v2806_v31 = vmul.f32 %v6909_v13, %v6909_v13  ;;  %v2390_v28 = vadd.f32 %v6920_v30, %v6812_v59 }
 0x574   :  { %v2853_v16 = vadd.f32 %v2852_v49, %v2795_v17  ;;  %v2714_v15 = vadd.f32 %v2713_v44, %v6874_v38  ;;  %v2893_v39 = vadd.f32 %v2892_v56, %v2802_v58  ;;  %v2808_v49 = vmul.f32 %v7116_v1, %v7116_v1 }
 0x575   :  { %v7103_v22 = vpop.f32.mrf.mxu2  ;;  %v7111_v14 = vpop.f32.mrf.mxu3  ;;  %v2754_v55 = vadd.f32 %v2753_v10, %v7091_v45  ;;  %v7137_v58 = vadd.f32 %v6942_v32, %v2573_v41  ;;  %v2578_v44 = vadd.f32 %v6958_v18, %v6808_v0 }
 0x576   :  { %v2854_v3 = vadd.f32 %v2853_v16, %v2797_v4  ;;  %v2894_v17 = vadd.f32 %v2893_v39, %v2804_v36  ;;  %v2715_v4 = vadd.f32 %v2714_v15, %v6880_v5  ;;  %v2810_v36 = vmul.f32 %v6927_v29, %v6927_v29 }
 0x577   :  { %8588 = vst [vmem:[#allocation7_spill] sm:$0xff] %v7137_v58  ;;  %v2755_v16 = vadd.f32 %v2754_v55, %v6909_v13  ;;  %v2812_v15 = vmul.f32 %v7137_v58, %v7137_v58  ;;  %v7164_v39 = vadd.f32 %v6960_v48, %v2578_v44  ;;  %v7170_v55 = vadd.f32 %v6922_v6, %v2390_v28 }
 0x578   :  { %v7141_v8 = vpop.f32.mrf.mxu1  ;;  %v2855_v56 = vadd.f32 %v2854_v3, %v2799_v21  ;;  %v2895_v32 = vadd.f32 %v2894_v17, %v2806_v31  ;;  %v2716_v18 = vadd.f32 %v2715_v4, %v6890_v54  ;;  %v2803_v3 = vmul.f32 %v7132_v60, %v7132_v60 }
 0x579   :  { %v7126_v19 = vpop.f32.mrf.mxu0  ;;  %v2756_v21 = vadd.f32 %v2755_v16, %v7116_v1  ;;  %8589 = vst [vmem:[#allocation25_spill] sm:$0xff] %v7164_v39  ;;  %v2583_v31 = vadd.f32 %v6978_v12, %v6808_v0  ;;  %v2395_v4 = vadd.f32 %v6944_v51, %v6812_v59  ;;  %v2814_v48 = vmul.f32 %v6951_v25, %v6951_v25 }
 0x57a   :  { %v2856_v41 = vadd.f32 %v2855_v56, %v2801_v43  ;;  %v2896_v30 = vadd.f32 %v2895_v32, %v2808_v49  ;;  %v2717_v43 = vadd.f32 %v2716_v18, %v7132_v60  ;;  %v2805_v6 = vmul.f32 %v6914_v40, %v6914_v40 }
 0x57b   :  { %v2757_v17 = vadd.f32 %v2756_v21, %v6927_v29  ;;  %v2816_v51 = vmul.f32 %v7164_v39, %v7164_v39  ;;  %v7188_v18 = vadd.f32 %v6980_v23, %v2583_v31  ;;  %v2818_v23 = vmul.f32 %v6967_v24, %v6967_v24 }
 0x57c   :  { %v2897_v56 = vadd.f32 %v2896_v30, %v2810_v36  ;;  %v2857_v16 = vadd.f32 %v2856_v41, %v2803_v3  ;;  %v2718_v12 = vadd.f32 %v2717_v43, %v6914_v40  ;;  %v2588_v36 = vadd.f32 %v6992_v35, %v6808_v0 }
 0x57d   :  { %v7158_v10 = vpop.f32.mrf.mxu2  ;;  %v7175_v49 = vpop.f32.mrf.mxu3  ;;  %v2758_v28 = vadd.f32 %v2757_v17, %v7137_v58  ;;  %8590 = vst [vmem:[#allocation14_spill] sm:$0xff] %v7188_v18  ;;  %v2807_v41 = vmul.f32 %v7170_v55, %v7170_v55  ;;  %v7197_v3 = vadd.f32 %v6946_v46, %v2395_v4  ;;  %v2809_v17 = vmul.f32 %v6932_v42, %v6932_v42 }
 0x57e   :  { %v2898_v32 = vadd.f32 %v2897_v56, %v2812_v15  ;;  %v2400_v15 = vadd.f32 %v6962_v2, %v6812_v59  ;;  %v2858_v31 = vadd.f32 %v2857_v16, %v2805_v6  ;;  %v2719_v35 = vadd.f32 %v2718_v12, %v7170_v55 }
 0x57f   :  { %8591 = vst [vmem:[#allocation41_spill] sm:$0xff] %v7197_v3  ;;  %v2759_v30 = vadd.f32 %v2758_v28, %v6951_v25  ;;  %v2820_v46 = vmul.f32 %v7188_v18, %v7188_v18  ;;  %v7211_v4 = vadd.f32 %v6994_v50, %v2588_v36  ;;  %v2593_v2 = vadd.f32 %v7012_v20, %v6808_v0  ;;  %v8598_v25 = vld [vmem:[#allocation37_spill] sm:$0xff] }
 0x580   :  { %v7192_v21 = vpop.f32.mrf.mxu1  ;;  %v2899_v43 = vadd.f32 %v2898_v32, %v2814_v48  ;;  %v2859_v48 = vadd.f32 %v2858_v31, %v2807_v41  ;;  %v2811_v16 = vmul.f32 %v7197_v3, %v7197_v3  ;;  %v7218_v12 = vadd.f32 %v6964_v11, %v2400_v15  ;;  %v8593_v15 = vld [vmem:[#allocation26_spill] sm:$0xff] }
 0x581   :  { %v7179_v44 = vpop.f32.mrf.mxu0  ;;  %v2760_v56 = vadd.f32 %v2759_v30, %v7164_v39  ;;  %8592 = vst [vmem:[#allocation44_spill] sm:$0xff] %v7211_v4  ;;  %v2720_v32 = vadd.f32 %v2719_v35, %v6932_v42  ;;  %v2822_v50 = vmul.f32 %v6987_v7, %v6987_v7  ;;  %v2596_v20 = vadd.f32 %v7020_v34, %v6808_v0  ;;  %v8596_v34 = vld [vmem:[#allocation22_spill] sm:$0xff] }
 0x582   :  { %v2900_v58 = vadd.f32 %v2899_v43, %v2816_v51  ;;  %v2860_v41 = vadd.f32 %v2859_v48, %v2809_v17  ;;  %v2813_v30 = vmul.f32 %v6956_v37, %v6956_v37  ;;  %v2405_v43 = vadd.f32 %v8593_v15, %v6812_v59 }
 0x583   :  { %v2761_v6 = vadd.f32 %v2760_v56, %v6967_v24  ;;  %v2598_v17 = vadd.f32 %v8596_v34, %v6808_v0  ;;  %v2721_v24 = vadd.f32 %v2720_v32, %v7197_v3  ;;  %v2815_v15 = vmul.f32 %v7218_v12, %v7218_v12  ;;  %v8601_v32 = vld [vmem:[#allocation27_spill] sm:$0xff] }
 0x584   :  { %v2901_v51 = vadd.f32 %v2900_v58, %v2818_v23  ;;  %v2824_v58 = vmul.f32 %v7211_v4, %v7211_v4  ;;  %v8594_v23 = vld [vmem:[#allocation23_spill] sm:$0xff] }
 0x585   :  { %v7221_v28 = vpop.f32.mrf.mxu2  ;;  %v2762_v11 = vadd.f32 %v2761_v6, %v7188_v18  ;;  %v7233_v31 = vpop.f32.mrf.mxu3  ;;  %v7238_v56 = vadd.f32 %v8594_v23, %v2593_v2  ;;  %v2861_v6 = vadd.f32 %v2860_v41, %v2811_v16  ;;  %v7251_v2 = vadd.f32 %v8598_v25, %v2596_v20  ;;  %v8600_v23 = vld [vmem:[#allocation39_spill] sm:$0xff]  ;;  %v8603_v25 = vld [vmem:[#allocation38_spill] sm:$0xff] }
 0x586   :  { %v2902_v35 = vadd.f32 %v2901_v51, %v2820_v46  ;;  %v8597_v51 = vld [vmem:[#allocation30_spill] sm:$0xff]  ;;  %v2601_v34 = vadd.f32 %v8600_v23, %v6808_v0  ;;  %v2722_v29 = vadd.f32 %v2721_v24, %v6956_v37  ;;  %v7257_v16 = vadd.f32 %v8601_v32, %v2405_v43  ;;  %v8602_v3 = vld [vmem:[#allocation11_spill] sm:$0xff] }
 0x587   :  { %8595 = vst [vmem:[#allocation26_spill] sm:$0xff] %v7238_v56  ;;  %v2763_v18 = vadd.f32 %v2762_v11, %v6987_v7  ;;  %v2826_v39 = vmul.f32 %v8597_v51, %v8597_v51  ;;  %v2862_v42 = vadd.f32 %v2861_v6, %v2813_v30  ;;  %v7265_v20 = vadd.f32 %v8603_v25, %v2598_v17 }
 0x588   :  { %v7242_v48 = vpop.f32.mrf.mxu1  ;;  %v2903_v46 = vadd.f32 %v2902_v35, %v2822_v50  ;;  %8599 = vst [vmem:[#allocation23_spill] sm:$0xff] %v7251_v2  ;;  %v2817_v50 = vmul.f32 %v8602_v3, %v8602_v3  ;;  %v2828_v35 = vmul.f32 %v7238_v56, %v7238_v56  ;;  %v2723_v23 = vadd.f32 %v2722_v29, %v7218_v12 }
 0x589   :  { %v2610_v36 = vpop.f32.mrf.mxu0  ;;  %v2764_v41 = vadd.f32 %v2763_v18, %v7211_v4  ;;  %8604 = vst [vmem:[#allocation22_spill] sm:$0xff] %v7265_v20  ;;  %v2863_v7 = vadd.f32 %v2862_v42, %v2815_v15  ;;  %v2603_v30 = vadd.f32 %v7084_v63, %v6808_v0  ;;  %v8605_v18 = vld [vmem:[#allocation21_spill] sm:$0xff]  ;;  %v2819_v29 = vmul.f32 %v7257_v16, %v7257_v16 }
 0x58a   :  { %v2904_v11 = vadd.f32 %v2903_v46, %v2824_v58  ;;  %v2410_v43 = vadd.f32 %v8605_v18, %v6812_v59  ;;  %v2830_v58 = vmul.f32 %v7251_v2, %v7251_v2  ;;  %v8606_v46 = vld [vmem:[#allocation32_spill] sm:$0xff]  ;;  %v2724_v25 = vadd.f32 %v2723_v23, %v8602_v3 }
 0x58b   :  { %v2765_v24 = vadd.f32 %v2764_v41, %v8597_v51  ;;  %v7276_v32 = vadd.f32 %v8606_v46, %v2601_v34  ;;  %v2606_v63 = vadd.f32 %v7126_v19, %v6808_v0  ;;  %v7291_v46 = vadd.f32 %v7095_v26, %v2603_v30  ;;  %v8609_v19 = vld [vmem:[#allocation34_spill] sm:$0xff]  ;;  %v8612_v30 = vld [vmem:[#allocation13_spill] sm:$0xff] }
 0x58c   :  { %v2905_v6 = vadd.f32 %v2904_v11, %v2826_v39  ;;  %v2864_v39 = vadd.f32 %v2863_v7, %v2817_v50  ;;  %v2832_v11 = vmul.f32 %v7265_v20, %v7265_v20  ;;  %v2725_v18 = vadd.f32 %v2724_v25, %v7257_v16  ;;  %v8610_v7 = vld [vmem:[#allocation18_spill] sm:$0xff] }
 0x58d   :  { %8607 = vst [vmem:[#allocation37_spill] sm:$0xff] %v7276_v32  ;;  %v2766_v42 = vadd.f32 %v2765_v24, %v7238_v56  ;;  %v7284_v15 = vpop.f32.mrf.mxu2  ;;  %v2608_v24 = vadd.f32 %v7179_v44, %v6808_v0  ;;  %v7295_v56 = vpop.f32.mrf.mxu3  ;;  %v7298_v51 = vadd.f32 %v8609_v19, %v2410_v43  ;;  %v2415_v50 = vadd.f32 %v8610_v7, %v6812_v59  ;;  %v8613_v19 = vld [vmem:[#allocation33_spill] sm:$0xff] }
 0x58e   :  { %v2906_v41 = vadd.f32 %v2905_v6, %v2828_v35  ;;  %8608 = vst [vmem:[#allocation39_spill] sm:$0xff] %v7291_v46  ;;  %v2834_v6 = vmul.f32 %v7276_v32, %v7276_v32  ;;  %v2865_v25 = vadd.f32 %v2864_v39, %v2819_v29  ;;  %v7306_v26 = vadd.f32 %v7141_v8, %v2606_v63  ;;  %v8614_v63 = vld [vmem:[#allocation31_spill] sm:$0xff] }
 0x58f   :  { %v2767_v23 = vadd.f32 %v2766_v42, %v7251_v2  ;;  %v2611_v44 = vadd.f32 %v2610_v36, %v6808_v0  ;;  %v2726_v2 = vadd.f32 %v2725_v18, %v8612_v30  ;;  %v2821_v43 = vmul.f32 %v8612_v30, %v8612_v30 }
 0x590   :  { %v2701_v34 = vpop.f32.mrf.mxu1  ;;  %v2907_v35 = vadd.f32 %v2906_v41, %v2830_v58  ;;  %8611 = vst [vmem:[#allocation27_spill] sm:$0xff] %v7306_v26  ;;  %v2418_v7 = vadd.f32 %v8613_v19, %v6812_v59  ;;  %v2836_v29 = vmul.f32 %v7291_v46, %v7291_v46  ;;  %v7318_v39 = vadd.f32 %v7192_v21, %v2608_v24 }
 0x591   :  { %v2612_v17 = vpop.f32.mrf.mxu0  ;;  %v2768_v42 = vadd.f32 %v2767_v23, %v7265_v20  ;;  %v2823_v36 = vmul.f32 %v7298_v51, %v7298_v51  ;;  %v7324_v18 = vadd.f32 %v8614_v63, %v2415_v50  ;;  %v8615_v23 = vld [vmem:[#allocation42_spill] sm:$0xff]  ;;  %v7332_v21 = vadd.f32 %v7242_v48, %v2611_v44  ;;  %v8616_v20 = vld [vmem:[#allocation12_spill] sm:$0xff]  ;;  %v8617_v63 = vld [vmem:[#allocation19_spill] sm:$0xff] }
 0x592   :  { %v2908_v58 = vadd.f32 %v2907_v35, %v2832_v11  ;;  %v2613_v8 = vadd.f32 %v2612_v17, %v6808_v0  ;;  %v2420_v19 = vadd.f32 %v8615_v23, %v6812_v59  ;;  %v2866_v24 = vadd.f32 %v2865_v25, %v2821_v43 }
 0x593   :  { %v2769_v41 = vadd.f32 %v2768_v42, %v7276_v32  ;;  %v2838_v32 = vmul.f32 %v7306_v26, %v7306_v26  ;;  %v2825_v50 = vmul.f32 %v8616_v20, %v8616_v20  ;;  %v7338_v4 = vadd.f32 %v8617_v63, %v2418_v7  ;;  %v8619_v63 = vld [vmem:[#allocation20_spill] sm:$0xff] }
 0x594   :  { %v2909_v11 = vadd.f32 %v2908_v58, %v2834_v6  ;;  %v8618_v6 = vld [vmem:[#allocation40_spill] sm:$0xff]  ;;  %v2840_v48 = vmul.f32 %v7318_v39, %v7318_v39  ;;  %v7345_v44 = vadd.f32 %v2701_v34, %v2613_v8  ;;  %v2727_v25 = vadd.f32 %v2726_v2, %v7298_v51 }
 0x595   :  { %v2770_v42 = vadd.f32 %v2769_v41, %v7291_v46  ;;  %v2423_v58 = vadd.f32 %v8618_v6, %v6812_v59  ;;  %v2867_v43 = vadd.f32 %v2866_v24, %v2823_v36  ;;  %v2827_v7 = vmul.f32 %v7324_v18, %v7324_v18 }
 0x596   :  { %v2910_v41 = vadd.f32 %v2909_v11, %v2836_v29  ;;  %v7351_v30 = vadd.f32 %v8619_v63, %v2420_v19  ;;  %v2842_v11 = vmul.f32 %v7332_v21, %v7332_v21  ;;  %v2728_v34 = vadd.f32 %v2727_v25, %v8616_v20 }
 0x597   :  { %v2771_v46 = vadd.f32 %v2770_v42, %v7306_v26  ;;  %v2523_v42 = vpop.f32.mrf.mxu3  ;;  %v2868_v8 = vadd.f32 %v2867_v43, %v2825_v50  ;;  %v2829_v2 = vmul.f32 %v7338_v4, %v7338_v4  ;;  %v2425_v36 = vadd.f32 %v7103_v22, %v6812_v59 }
 0x598   :  { %v2704_v23 = vpop.f32.mrf.mxu1  ;;  %v2911_v6 = vadd.f32 %v2910_v41, %v2838_v32  ;;  %v7364_v19 = vadd.f32 %v7066_v33, %v2423_v58  ;;  %v2844_v24 = vmul.f32 %v7345_v44, %v7345_v44  ;;  %v2831_v50 = vmul.f32 %v7351_v30, %v7351_v30 }
 0x599   :  { %v2615_v35 = vpop.f32.mrf.mxu0  ;;  %v2772_v29 = vadd.f32 %v2771_v46, %v7318_v39  ;;  %v2428_v41 = vadd.f32 %v7158_v10, %v6812_v59 }
 0x59a   :  { %v2616_v17 = vadd.f32 %v2615_v35, %v6808_v0  ;;  %v2434_v35 = vpop.f32.mrf.mxu2  ;;  %v2912_v32 = vadd.f32 %v2911_v6, %v2840_v48  ;;  %v2430_v6 = vadd.f32 %v7221_v28, %v6812_v59  ;;  %v2833_v10 = vmul.f32 %v7364_v19, %v7364_v19 }
 0x59b   :  { %v2773_v46 = vadd.f32 %v2772_v29, %v7332_v21 }
 0x59c   :  { %v7356_v26 = vadd.f32 %v2704_v23, %v2616_v17  ;;  %v2729_v17 = vadd.f32 %v2728_v34, %v7324_v18  ;;  %v2869_v23 = vadd.f32 %v2868_v8, %v2827_v7  ;;  %v2913_v22 = vadd.f32 %v2912_v32, %v2842_v11 }
 0x59d   :  { %v2774_v33 = vadd.f32 %v2773_v46, %v7345_v44  ;;  %v7380_v7 = vadd.f32 %v7111_v14, %v2425_v36  ;;  %v7391_v32 = vadd.f32 %v7175_v49, %v2428_v41  ;;  %v2433_v14 = vadd.f32 %v7284_v15, %v6812_v59 }
 0x59e   :  { %v2846_v58 = vmul.f32 %v7356_v26, %v7356_v26  ;;  %v2730_v43 = vadd.f32 %v2729_v17, %v7338_v4  ;;  %v2870_v63 = vadd.f32 %v2869_v23, %v2829_v2  ;;  %v2914_v11 = vadd.f32 %v2913_v22, %v2844_v24 }
 0x59f   :  { %v2775_v34 = vadd.f32 %v2774_v33, %v7356_v26  ;;  %v2835_v23 = vmul.f32 %v7380_v7, %v7380_v7  ;;  %v2435_v49 = vadd.f32 %v2434_v35, %v6812_v59  ;;  %v2526_v15 = vpop.f32.mrf.mxu3 }
 0x5a0   :  { %v2706_v29 = vpop.f32.mrf.mxu1  ;;  %v2871_v2 = vadd.f32 %v2870_v63, %v2831_v50  ;;  %v2915_v36 = vadd.f32 %v2914_v11, %v2846_v58  ;;  %v2837_v58 = vmul.f32 %v7391_v32, %v7391_v32 }
 0x5a1   :  { %v2617_v25 = vpop.f32.mrf.mxu0 }
 0x5a2   :  { %v2618_v48 = vadd.f32 %v2617_v25, %v6808_v0  ;;  %v2731_v0 = vadd.f32 %v2730_v43, %v7351_v30  ;;  %v2437_v28 = vpop.f32.mrf.mxu2  ;;  %v7402_v25 = vadd.f32 %v7233_v31, %v2430_v6  ;;  %v2872_v41 = vadd.f32 %v2871_v2, %v2833_v10 }
 0x5a3   :  { %v2438_v43 = vadd.f32 %v2437_v28, %v6812_v59  ;;  %v7415_v10 = vadd.f32 %v2523_v42, %v2435_v49 }
 0x5a4   :  { %v7387_v8 = vadd.f32 %v2706_v29, %v2618_v48  ;;  %v2732_v17 = vadd.f32 %v2731_v0, %v7364_v19  ;;  %8620 = vst [vmem:[#allocation11_spill] sm:$0xff] %v7402_v25  ;;  %v7409_v48 = vadd.f32 %v7295_v56, %v2433_v14  ;;  %v2873_v31 = vadd.f32 %v2872_v41, %v2835_v23 }
 0x5a5   :  { %v2839_v35 = vmul.f32 %v7402_v25, %v7402_v25  ;;  %8621 = vst [vmem:[#allocation38_spill] sm:$0xff] %v7415_v10  ;;  %v7420_v14 = vadd.f32 %v2526_v15, %v2438_v43 }
 0x5a6   :  { %v2776_v46 = vadd.f32 %v2775_v34, %v7387_v8  ;;  %v2848_v24 = vmul.f32 %v7387_v8, %v7387_v8  ;;  %v2733_v33 = vadd.f32 %v2732_v17, %v7380_v7  ;;  %v2874_v0 = vadd.f32 %v2873_v31, %v2837_v58 }
 0x5a7   :  { %v2841_v56 = vmul.f32 %v7409_v48, %v7409_v48  ;;  %v2843_v17 = vmul.f32 %v7415_v10, %v7415_v10  ;;  %v2528_v43 = vpop.f32.mrf.mxu3 }
 0x5a8   :  { %v2777_v50 = vrot.slane %v2776_v46, 4  ;;  %v2916_v22 = vadd.f32 %v2915_v36, %v2848_v24  ;;  %v2734_v6 = vadd.f32 %v2733_v33, %v7391_v32 }
 0x5aa   :  { %v2778_v63 = vadd.f32 %v2777_v50, %v2776_v46  ;;  %v2917_v29 = vrot.slane %v2916_v22, 4  ;;  %v2735_v2 = vadd.f32 %v2734_v6, %v7402_v25  ;;  %v2875_v46 = vadd.f32 %v2874_v0, %v2839_v35  ;;  %v2439_v49 = vpop.f32.mrf.mxu2 }
 0x5ab   :  { %v2440_v15 = vadd.f32 %v2439_v49, %v6812_v59 }
 0x5ac   :  { %v2779_v11 = vrot.slane %v2778_v63, 2  ;;  %v2918_v34 = vadd.f32 %v2917_v29, %v2916_v22  ;;  %v2736_v24 = vadd.f32 %v2735_v2, %v7409_v48  ;;  %v2876_v41 = vadd.f32 %v2875_v46, %v2841_v56 }
 0x5ad   :  { %v2845_v22 = vmul.f32 %v7420_v14, %v7420_v14  ;;  %v2529_v31 = vadd.f32 %v2528_v43, %v2440_v15 }
 0x5ae   :  { %v2780_v36 = vadd.f32 %v2779_v11, %v2778_v63  ;;  %v2919_v28 = vrot.slane %v2918_v34, 2  ;;  %v2737_v50 = vadd.f32 %v2736_v24, %v7415_v10  ;;  %v2877_v63 = vadd.f32 %v2876_v41, %v2843_v17 }
 0x5af   :  { %v2847_v0 = vmul.f32 %v2529_v31, %v2529_v31 }
 0x5b0   :  { %v2781_v42 = vrot.slane %v2780_v36, 1  ;;  %v2920_v23 = vadd.f32 %v2919_v28, %v2918_v34  ;;  %v2738_v29 = vadd.f32 %v2737_v50, %v7420_v14  ;;  %v2878_v11 = vadd.f32 %v2877_v63, %v2845_v22 }
 0x5b2   :  { %v2782_v33 = vadd.f32 %v2781_v42, %v2780_v36  ;;  %v2921_v58 = vrot.slane %v2920_v23, 1  ;;  %v2739_v34 = vadd.f32 %v2738_v29, %v2529_v31  ;;  %v2879_v46 = vadd.f32 %v2878_v11, %v2847_v0 }
 0x5b4   :  { %v2784_v6 = vmul.f32 0.00390625, %v2782_v33  ;;  %v2922_v35 = vadd.f32 %v2921_v58, %v2920_v23  ;;  %v2740_v28 = vrot.slane %v2739_v34, 4  ;;  %v2880_v25 = vrot.slane %v2879_v46, 4 }
 0x5b6   :  { %v2924_v2 = vmul.f32 0.00390625, %v2922_v35  ;;  %v2926_v56 = vmul.f32 %v2784_v6, %v2784_v6  ;;  %v2741_v10 = vadd.f32 %v2740_v28, %v2739_v34  ;;  %v2881_v42 = vadd.f32 %v2880_v25, %v2879_v46  ;;  %v4260_v46 = vld [vmem:[%s8183_s2 + $0x8] sm:$0xff] }
 0x5b7   :  { %3367 = vmatpush.bf16.msrb.mxu2 %v4260_v46 }
 0x5b8   :  { %v2928_v24 = vsub.f32 %v2924_v2, %v2926_v56  ;;  %v2742_v36 = vrot.slane %v2741_v10, 2  ;;  %v2882_v41 = vrot.slane %v2881_v42, 2 }
 0x5ba   :  { %v2930_v59 = vmax.f32 %v2928_v24, 0.0  ;;  %v2743_v17 = vadd.f32 %v2742_v36, %v2741_v10  ;;  %v2883_v15 = vadd.f32 %v2882_v41, %v2881_v42 }
 0x5bc   :  { %v2932_v49 = vadd.f32 1e-05, %v2930_v59  ;;  %v2744_v50 = vrot.slane %v2743_v17, 1  ;;  %v2884_v22 = vrot.slane %v2883_v15, 1 }
 0x5be   :  { %4306 = vrsqrt.f32 %v2932_v49  ;;  %v2745_v23 = vadd.f32 %v2744_v50, %v2743_v17  ;;  %v2885_v58 = vadd.f32 %v2884_v22, %v2883_v15  ;;  %vm2949_vm0 = vweird.f32 %v2932_v49  ;;  %v3799_v15 = vld [vmem:[%s8184_s3 + $0x7] ss:$8 sm:$0x3] }
 0x5c0   :  { %v2783_v33 = vmul.f32 0.00390625, %v2745_v23  ;;  %v2923_v63 = vmul.f32 0.00390625, %v2885_v58 }
 0x5c2   :  { %v2925_v29 = vmul.f32 %v2783_v33, %v2783_v33 }
 0x5c4   :  { %v4307_v43 = vpop.eup %4306  ;;  %v2927_v11 = vsub.f32 %v2923_v63, %v2925_v29 }
 0x5c5   :  { %v2944_v35 = vmul.f32 %v4307_v43, %v2932_v49  ;;  %vm2950_vm15 = vweird.f32 %v4307_v43 }
 0x5c6   :  { %v2929_v34 = vmax.f32 %v2927_v11, 0.0  ;;  %vm2951_vm1 = vmor %vm2949_vm0, %vm2950_vm15  ;;  %v4281_v11 = vld [vmem:[%s8183_s2 + $0xb0] sm:$0xff] }
 0x5c7   :  { %v2945_v0 = vmul.f32 %v4307_v43, %v2944_v35  ;;  %v4268_v35 = vld [vmem:[%s8183_s2 + $0x48] sm:$0xff]  ;;  %3668 = vmatpush.bf16.msrb.mxu0 %v4281_v11 }
 0x5c8   :  { %v2931_v2 = vadd.f32 1e-05, %v2929_v34  ;;  %v4259_v34 = vld [vmem:[%s8183_s2] sm:$0xff]  ;;  %3456 = vmatpush.bf16.msrb.mxu3 %v4268_v35 }
 0x5c9   :  { %v2946_v25 = vmul.f32 0.5, %v2945_v0  ;;  %v3800_v0 = vld [vmem:[%s8184_s3 + $0x10] ss:$8 sm:$0x3]  ;;  %3368 = vmatpush.bf16.msrb.mxu2 %v4259_v34 }
 0x5ca   :  { %4308 = vrsqrt.f32 %v2931_v2  ;;  %vm2939_vm3 = vweird.f32 %v2931_v2 }
 0x5cb   :  { %v2947_v56 = vsub.f32 1.5, %v2946_v25 }
 0x5cd   :  { %v2948_v24 = vmul.f32 %v4307_v43, %v2947_v56  ;;  %v8623_v56 = vld [vmem:[#allocation10_spill] sm:$0xff]  ;;  %4286 = vmatpush.bf16.msra.mxu2 %v7150_v47 }
 0x5cf   :  { %v2952_v42 = vsel %vm2951_vm1, %v4307_v43, %v2948_v24 }
 0x5d0   :  { %v4309_v10 = vpop.eup %4308  ;;  %v2955_v50 = vrot.slane %v2952_v42, 7 }
 0x5d1   :  { %v2934_v28 = vmul.f32 %v4309_v10, %v2931_v2  ;;  %vm2940_vm2 = vweird.f32 %v4309_v10  ;;  %v4267_v2 = vld [vmem:[%s8183_s2 + $0x40] sm:$0xff]  ;;  %4287 = vmatpush.bf16.msra.mxu2 %v4281_v11  ;;  %v8639_v11 = vld [vmem:[#allocation41_spill] sm:$0xff] }
 0x5d2   :  { %vm2941_vm4 = vmor %vm2939_vm3, %vm2940_vm2  ;;  %3457 = vmatpush.bf16.msrb.mxu3 %v4267_v2 }
 0x5d3   :  { %v2935_v59 = vmul.f32 %v4309_v10, %v2934_v28  ;;  %v8624_v28 = vld [vmem:[#allocation43_spill] sm:$0xff] }
 0x5d5   :  { %v2936_v36 = vmul.f32 0.5, %v2935_v59  ;;  %v8625_v59 = vld [vmem:[#allocation15_spill] sm:$0xff] }
 0x5d7   :  { %v2937_v17 = vsub.f32 1.5, %v2936_v36 }
 0x5d9   :  { %v2938_v41 = vmul.f32 %v4309_v10, %v2937_v17  ;;  %v8627_v17 = vld [vmem:[#allocation16_spill] sm:$0xff] }
 0x5db   :  { %v2942_v23 = vsel %vm2941_vm4, %v4309_v10, %v2938_v41 }
 0x5dc   :  { %v2956_v22 = vsel %vm801_vm5, %v2942_v23, %v2955_v50  ;;  %v8628_v23 = vld [vmem:[#allocation24_spill] sm:$0xff] }
 0x5dd   :  { %v2958_v58 = vmul.f32 %v3799_v15, %v2956_v22 }
 0x5df   :  { %v7437_v63 = vperm.slane %v2958_v58, 0  ;;  %v7439_v49 = vperm.slane %v2958_v58, 1 }
 0x5e1   :  { %v2965_v43 = vmul.f32 %v7439_v49, %v2784_v6  ;;  %v7443_v29 = vmul.f32 %v7437_v63, %v2529_v31  ;;  %v2964_v6 = vmul.f32 %v7437_v63, %v2783_v33  ;;  %v7463_v25 = vmul.f32 %v7437_v63, %v6820_v61  ;;  %v4280_v33 = vld [vmem:[%s8183_s2 + $0xa8] sm:$0xff]  ;;  %v8626_v61 = vld [vmem:[#allocation6_spill] sm:$0xff] }
 0x5e2   :  { %v7467_v10 = vmul.f32 %v7439_v49, %v8623_v56  ;;  %v7471_v46 = vmul.f32 %v7437_v63, %v8624_v28  ;;  %v7479_v36 = vmul.f32 %v7439_v49, %v8625_v59  ;;  %v7483_v42 = vmul.f32 %v7437_v63, %v8626_v61  ;;  %3669 = vmatpush.bf16.msrb.mxu0 %v4280_v33  ;;  %v8638_v59 = vld [vmem:[#allocation9_spill] sm:$0xff] }
 0x5e3   :  { %8622 = vst [vmem:[#allocation21_spill] sm:$0xff] %v7443_v29  ;;  %v2968_v31 = vrot.slane %v2965_v43, 7  ;;  %v7487_v41 = vmul.f32 %v7439_v49, %v8627_v17  ;;  %v7492_v15 = vmul.f32 %v7437_v63, %v6842_v9  ;;  %v7496_v22 = vmul.f32 %v7439_v49, %v8628_v23  ;;  %v8629_v43 = vld [vmem:[#allocation17_spill] sm:$0xff]  ;;  %v8641_v17 = vld [vmem:[#allocation7_spill] sm:$0xff]  ;;  %4288 = vmatpush.bf16.msra.mxu2 %v4280_v33 }
 0x5e4   :  { %v7500_v58 = vmul.f32 %v7437_v63, %v6852_v52  ;;  %v7504_v35 = vmul.f32 %v7439_v49, %v8629_v43  ;;  %v7508_v47 = vmul.f32 %v7437_v63, %v6864_v27  ;;  %v7512_v9 = vmul.f32 %v7439_v49, %v6861_v57  ;;  %v8644_v43 = vld [vmem:[#allocation25_spill] sm:$0xff] }
 0x5e5   :  { %v2969_v24 = vsel %vm801_vm5, %v2964_v6, %v2968_v31  ;;  %v7516_v34 = vmul.f32 %v7437_v63, %v6874_v38  ;;  %v7520_v52 = vmul.f32 %v7439_v49, %v6869_v53  ;;  %v8633_v6 = vld [vmem:[#allocation35_spill] sm:$0xff]  ;;  %v2988_v57 = vmul.f32 %v7437_v63, %v6890_v54  ;;  %v4279_v38 = vld [vmem:[%s8183_s2 + $0xa0] sm:$0xff] }
 0x5e6   :  { %v2971_v50 = vsub.f32 %v3800_v0, %v2969_v24  ;;  %v7524_v0 = vmul.f32 %v7437_v63, %v6880_v5  ;;  %v7528_v27 = vmul.f32 %v7439_v49, %v8633_v6  ;;  %v2989_v53 = vmul.f32 %v7439_v49, %v6885_v62  ;;  %v8637_v24 = vld [vmem:[#allocation8_spill] sm:$0xff]  ;;  %3670 = vmatpush.bf16.msrb.mxu0 %v4279_v38 }
 0x5e7   :  { %8630 = vst [vmem:[#allocation32_spill] sm:$0xff] %v7516_v34  ;;  %v7539_v31 = vmul.f32 %v7437_v63, %v7132_v60  ;;  %v2991_v5 = vmul.f32 %v7439_v49, %v7091_v45  ;;  %v2992_v2 = vmul.f32 %v7437_v63, %v6914_v40  ;;  %v2993_v28 = vmul.f32 %v7439_v49, %v6909_v13  ;;  %v8657_v34 = vld [vmem:[#allocation27_spill] sm:$0xff] }
 0x5e8   :  { %8631 = vst [vmem:[#allocation34_spill] sm:$0xff] %v7520_v52  ;;  %v7545_v54 = vperm.slane %v2971_v50, 0  ;;  %v7547_v56 = vperm.slane %v2971_v50, 1  ;;  %v7553_v62 = vmul.f32 %v7437_v63, %v7170_v55  ;;  %v2995_v60 = vmul.f32 %v7439_v49, %v7116_v1  ;;  %v8642_v50 = vld [vmem:[#allocation28_spill] sm:$0xff]  ;;  %v8656_v52 = vld [vmem:[#allocation39_spill] sm:$0xff]  ;;  %4289 = vmatpush.bf16.msra.mxu2 %v4279_v38 }
 0x5e9   :  { %8632 = vst [vmem:[#allocation18_spill] sm:$0xff] %v7524_v0  ;;  %v2996_v45 = vmul.f32 %v7437_v63, %v8637_v24  ;;  %v2997_v40 = vmul.f32 %v7439_v49, %v8638_v59  ;;  %v7563_v61 = vmul.f32 %v7437_v63, %v8639_v11  ;;  %v2999_v13 = vmul.f32 %v7439_v49, %v8641_v17  ;;  %v8645_v59 = vld [vmem:[#allocation36_spill] sm:$0xff]  ;;  %v8647_v17 = vld [vmem:[#allocation14_spill] sm:$0xff] }
 0x5ea   :  { %8634 = vst [vmem:[#allocation33_spill] sm:$0xff] %v7528_v27  ;;  %v3000_v55 = vmul.f32 %v7437_v63, %v6956_v37  ;;  %v3001_v23 = vmul.f32 %v7439_v49, %v8642_v50  ;;  %v7573_v1 = vmul.f32 %v7437_v63, %v7218_v12  ;;  %v3003_v6 = vmul.f32 %v7439_v49, %v8644_v43  ;;  %v8648_v12 = vld [vmem:[#allocation13_spill] sm:$0xff]  ;;  %v8653_v27 = vld [vmem:[#allocation23_spill] sm:$0xff]  ;;  %v8654_v0 = vld [vmem:[#allocation22_spill] sm:$0xff] }
 0x5eb   :  { %8635 = vst [vmem:[#allocation31_spill] sm:$0xff] %v7539_v31  ;;  %v3004_v24 = vmul.f32 %v7437_v63, %v8602_v3  ;;  %v3005_v11 = vmul.f32 %v7439_v49, %v8645_v59  ;;  %v7583_v37 = vmul.f32 %v7437_v63, %v7257_v16  ;;  %v3007_v50 = vmul.f32 %v7439_v49, %v8647_v17  ;;  %v8655_v31 = vld [vmem:[#allocation37_spill] sm:$0xff] }
 0x5ec   :  { %8636 = vst [vmem:[#allocation42_spill] sm:$0xff] %v7553_v62  ;;  %v3008_v29 = vmul.f32 %v7437_v63, %v8648_v12  ;;  %v3012_v59 = vmul.f32 %v7437_v63, %v8616_v20  ;;  %v8651_v62 = vld [vmem:[#allocation30_spill] sm:$0xff]  ;;  %v3016_v17 = vmul.f32 %v7437_v63, %v7338_v4  ;;  %v3017_v12 = vmul.f32 %v7439_v49, %v8653_v27 }
 0x5ed   :  { %8640 = vst [vmem:[#allocation12_spill] sm:$0xff] %v7563_v61  ;;  %v8650_v61 = vld [vmem:[#allocation44_spill] sm:$0xff]  ;;  %v3013_v16 = vmul.f32 %v7439_v49, %v8651_v62  ;;  %v3021_v20 = vmul.f32 %v7439_v49, %v8655_v31  ;;  %v3023_v62 = vmul.f32 %v7439_v49, %v8656_v52  ;;  %v3025_v4 = vmul.f32 %v7439_v49, %v8657_v34 }
 0x5ee   :  { %8643 = vst [vmem:[#allocation19_spill] sm:$0xff] %v7573_v1  ;;  %v8649_v1 = vld [vmem:[#allocation29_spill] sm:$0xff]  ;;  %v3011_v3 = vmul.f32 %v7439_v49, %v8650_v61  ;;  %v3020_v61 = vmul.f32 %v7437_v63, %v7364_v19  ;;  %v3027_v27 = vmul.f32 %v7439_v49, %v7318_v39  ;;  %v3029_v19 = vmul.f32 %v7439_v49, %v7332_v21 }
 0x5ef   :  { %8646 = vst [vmem:[#allocation40_spill] sm:$0xff] %v7583_v37  ;;  %v3009_v43 = vmul.f32 %v7439_v49, %v8649_v1  ;;  %v8652_v37 = vld [vmem:[#allocation26_spill] sm:$0xff]  ;;  %v3019_v1 = vmul.f32 %v7439_v49, %v8654_v0  ;;  %v3028_v0 = vmul.f32 %v7437_v63, %v7409_v48  ;;  %v3031_v31 = vmul.f32 %v7439_v49, %v7345_v44 }
 0x5f0   :  { %v3015_v33 = vmul.f32 %v7439_v49, %v8652_v37  ;;  %v3024_v37 = vmul.f32 %v7437_v63, %v7391_v32  ;;  %v3032_v52 = vmul.f32 %v7437_v63, %v7420_v14  ;;  %v3033_v32 = vmul.f32 %v7439_v49, %v7356_v26 }
 0x5f1   :  { %v3035_v34 = vmul.f32 %v7439_v49, %v7387_v8  ;;  %v3041_v39 = vadd.f32 %v7545_v54, %v7463_v25  ;;  %v7633_v48 = vadd.f32 %v7547_v56, %v7467_v10  ;;  %v3043_v21 = vadd.f32 %v7545_v54, %v7471_v46 }
 0x5f2   :  { %v3044_v44 = vadd.f32 %v7547_v56, %v7479_v36  ;;  %v7641_v14 = vadd.f32 %v7545_v54, %v7483_v42  ;;  %v7645_v26 = vadd.f32 %v7547_v56, %v7487_v41  ;;  %v7649_v8 = vadd.f32 %v7545_v54, %v7500_v58 }
 0x5f3   :  { %v7652_v49 = vadd.f32 %v7545_v54, %v2988_v57  ;;  %v7655_v25 = vadd.f32 %v7547_v56, %v2989_v53  ;;  %v7658_v10 = vadd.f32 %v7547_v56, %v2991_v5  ;;  %v7661_v46 = vadd.f32 %v7545_v54, %v2992_v2 }
 0x5f4   :  { %v7664_v36 = vadd.f32 %v7547_v56, %v2993_v28  ;;  %v7667_v42 = vadd.f32 %v7547_v56, %v2995_v60  ;;  %v7670_v41 = vadd.f32 %v7545_v54, %v2996_v45  ;;  %v7673_v58 = vadd.f32 %v7547_v56, %v2997_v40 }
 0x5f5   :  { %v7676_v57 = vadd.f32 %v7547_v56, %v2999_v13  ;;  %v7679_v38 = vadd.f32 %v7545_v54, %v3000_v55  ;;  %v7682_v53 = vadd.f32 %v7547_v56, %v3001_v23  ;;  %v7685_v5 = vadd.f32 %v7547_v56, %v3003_v6 }
 0x5f6   :  { %v7688_v2 = vadd.f32 %v7545_v54, %v3004_v24  ;;  %v7691_v28 = vadd.f32 %v7547_v56, %v3005_v11  ;;  %v7694_v60 = vadd.f32 %v7547_v56, %v3007_v50  ;;  %v7697_v45 = vadd.f32 %v7545_v54, %v3008_v29 }
 0x5f7   :  { %v7700_v40 = vadd.f32 %v7547_v56, %v3009_v43  ;;  %v7703_v13 = vadd.f32 %v7547_v56, %v3011_v3  ;;  %v7706_v55 = vadd.f32 %v7545_v54, %v3012_v59  ;;  %v7709_v23 = vadd.f32 %v7547_v56, %v3013_v16 }
 0x5f8   :  { %v7712_v6 = vadd.f32 %v7547_v56, %v3015_v33  ;;  %v7715_v24 = vadd.f32 %v7545_v54, %v3016_v17  ;;  %v7718_v29 = vadd.f32 %v7547_v56, %v3017_v12  ;;  %v7721_v11 = vadd.f32 %v7547_v56, %v3019_v1 }
 0x5f9   :  { %v7724_v50 = vadd.f32 %v7545_v54, %v3020_v61  ;;  %v7727_v43 = vadd.f32 %v7547_v56, %v3021_v20  ;;  %v7730_v3 = vadd.f32 %v7547_v56, %v3023_v62  ;;  %v7733_v59 = vadd.f32 %v7545_v54, %v3024_v37 }
 0x5fa   :  { %v7736_v16 = vadd.f32 %v7547_v56, %v3025_v4  ;;  %v7739_v33 = vadd.f32 %v7547_v56, %v3027_v27  ;;  %v7742_v17 = vadd.f32 %v7545_v54, %v3028_v0  ;;  %v7745_v12 = vadd.f32 %v7547_v56, %v3029_v19 }
 0x5fb   :  { %v7748_v1 = vadd.f32 %v7547_v56, %v3031_v31  ;;  %v7751_v61 = vadd.f32 %v7545_v54, %v3032_v52  ;;  %v7754_v20 = vadd.f32 %v7547_v56, %v3033_v32  ;;  %v7757_v62 = vadd.f32 %v7547_v56, %v3035_v34 }
 0x5fc   :  { %8658 = vst [vmem:[#allocation20_spill] sm:$0xff] %v7739_v33  ;;  %v3105_v37 = vmul.f32 0.01, %v3041_v39  ;;  %v3106_v4 = vmul.f32 0.01, %v7633_v48  ;;  %v3050_v0 = vadd.f32 %v7547_v56, %v7504_v35  ;;  %v3047_v31 = vadd.f32 %v7545_v54, %v7492_v15 }
 0x5fd   :  { %8659 = vst [vmem:[#allocation10_spill] sm:$0xff] %v7742_v17  ;;  %v3107_v27 = vmul.f32 0.01, %v3043_v21  ;;  %v3108_v19 = vmul.f32 0.01, %v3044_v44  ;;  %v3048_v52 = vadd.f32 %v7547_v56, %v7496_v22  ;;  %v7771_v35 = vmul.f32 %v7437_v63, %v7298_v51 }
 0x5fe   :  { %8660 = vst [vmem:[#allocation43_spill] sm:$0xff] %v7745_v12  ;;  %v3170_v32 = vmax.f32 %v7633_v48, %v3106_v4  ;;  %v3109_v34 = vmul.f32 0.01, %v7641_v14  ;;  %v3110_v12 = vmul.f32 0.01, %v7645_v26  ;;  %v3051_v15 = vadd.f32 %v7545_v54, %v7508_v47 }
 0x5ff   :  { %8661 = vst [vmem:[#allocation15_spill] sm:$0xff] %v7748_v1  ;;  %v3111_v1 = vmul.f32 0.01, %v3047_v31  ;;  %v3112_v17 = vmul.f32 0.01, %v3048_v52  ;;  %v7782_v48 = vmul.f32 %v7437_v63, %v7351_v30  ;;  %v7788_v51 = vmul.f32 %v7437_v63, %v7380_v7  ;;  %v8666_v7 = vld [vmem:[#allocation38_spill] sm:$0xff] }
 0x600   :  { %8662 = vst [vmem:[#allocation6_spill] sm:$0xff] %v7751_v61  ;;  %v3169_v61 = vmax.f32 %v3041_v39, %v3105_v37  ;;  %v3113_v22 = vmul.f32 0.01, %v7649_v8  ;;  %v7778_v39 = vmul.f32 %v7437_v63, %v7324_v18  ;;  %v3173_v47 = vmax.f32 %v7641_v14, %v3109_v34 }
 0x601   :  { %8663 = vst [vmem:[#allocation16_spill] sm:$0xff] %v7754_v20  ;;  %v3171_v20 = vmax.f32 %v3043_v21, %v3107_v27  ;;  %v3175_v18 = vmax.f32 %v3047_v31, %v3111_v1  ;;  %v3174_v37 = vmax.f32 %v7645_v26, %v3110_v12  ;;  %v3176_v4 = vmax.f32 %v3048_v52, %v3112_v17  ;;  %v8667_v1 = vld [vmem:[#allocation32_spill] sm:$0xff]  ;;  %v8668_v17 = vld [vmem:[#allocation34_spill] sm:$0xff]  ;;  %v8669_v31 = vld [vmem:[#allocation31_spill] sm:$0xff] }
 0x602   :  { %8664 = vst [vmem:[#allocation24_spill] sm:$0xff] %v7757_v62  ;;  %v3172_v62 = vmax.f32 %v3044_v44, %v3108_v19  ;;  %v3052_v44 = vadd.f32 %v7547_v56, %v7512_v9  ;;  %v8665_v9 = vld [vmem:[#allocation11_spill] sm:$0xff]  ;;  %v3177_v14 = vmax.f32 %v7649_v8, %v3113_v22  ;;  %v7806_v26 = vadd.f32 %v7545_v54, %v8667_v1  ;;  %v8671_v1 = vld [vmem:[#allocation33_spill] sm:$0xff] }
 0x603   :  { %v3233_v33 = vpack.c.bf16 %v3171_v20, %v3169_v61  ;;  %v3115_v61 = vmul.f32 0.01, %v3051_v15  ;;  %v3114_v20 = vmul.f32 0.01, %v3050_v0  ;;  %v7797_v27 = vmul.f32 %v7437_v63, %v8665_v9 }
 0x604   :  { %v3234_v21 = vpack.c.bf16 %v3172_v62, %v3170_v32  ;;  %v3116_v30 = vmul.f32 0.01, %v3052_v44  ;;  %v4278_v62 = vld [vmem:[%s8183_s2 + $0x98] sm:$0xff]  ;;  %v7810_v12 = vadd.f32 %v7547_v56, %v8668_v17  ;;  %v3059_v52 = vadd.f32 %v7545_v54, %v8669_v31 }
 0x605   :  { %3369 = vmatmul.bf16.vlgmr.msrb.gmra.mxu2 %v3233_v33  ;;  %v7801_v33 = vmul.f32 %v7437_v63, %v8666_v7  ;;  %v3179_v19 = vmax.f32 %v3051_v15, %v3115_v61  ;;  %3671 = vmatpush.bf16.msrb.mxu0 %v4278_v62  ;;  %v3178_v32 = vmax.f32 %v3050_v0, %v3114_v20  ;;  %v8670_v63 = vld [vmem:[#allocation18_spill] sm:$0xff]  ;;  %v3121_v8 = vmul.f32 0.01, %v7652_v49 }
 0x606   :  { %3458 = vmatmul.bf16.vlgmr.msrb.gmra.mxu3 %v3234_v21  ;;  %4290 = vmatpush.bf16.msra.mxu2 %v4278_v62  ;;  %v3180_v34 = vmax.f32 %v3052_v44, %v3116_v30  ;;  %v7816_v21 = vadd.f32 %v7545_v54, %v8670_v63  ;;  %v3235_v15 = vpack.c.bf16 %v3175_v18, %v3173_v47  ;;  %v3123_v61 = vmul.f32 0.01, %v3059_v52  ;;  %v8672_v62 = vld [vmem:[#allocation42_spill] sm:$0xff] }
 0x607   :  { %v3236_v22 = vpack.c.bf16 %v3176_v4, %v3174_v37  ;;  %v3122_v9 = vmul.f32 0.01, %v7655_v25  ;;  %v7820_v7 = vpack.c.bf16 %v3179_v19, %v3177_v14  ;;  %v7824_v17 = vadd.f32 %v7547_v56, %v8671_v1 }
 0x608   :  { %v3185_v0 = vmax.f32 %v7652_v49, %v3121_v8  ;;  %v3124_v44 = vmul.f32 0.01, %v7658_v10  ;;  %v3187_v20 = vmax.f32 %v3059_v52, %v3123_v61  ;;  %v3063_v47 = vadd.f32 %v7545_v54, %v8672_v62  ;;  %v8673_v52 = vld [vmem:[#allocation12_spill] sm:$0xff] }
 0x609   :  { %v3186_v30 = vmax.f32 %v7655_v25, %v3122_v9  ;;  %v3125_v18 = vmul.f32 0.01, %v7661_v46  ;;  %v7832_v37 = vpack.c.bf16 %v3180_v34, %v3178_v32  ;;  %v3126_v14 = vmul.f32 0.01, %v7664_v36 }
 0x60a   :  { %v3188_v4 = vmax.f32 %v7658_v10, %v3124_v44  ;;  %v3128_v56 = vmul.f32 0.01, %v7667_v42  ;;  %v7837_v19 = vpack.c.bf16 %v3187_v20, %v3185_v0  ;;  %v3127_v49 = vmul.f32 0.01, %v3063_v47  ;;  %v8674_v44 = vld [vmem:[#allocation19_spill] sm:$0xff] }
 0x60b   :  { %v3189_v31 = vmax.f32 %v7661_v46, %v3125_v18  ;;  %v3067_v25 = vadd.f32 %v7545_v54, %v8673_v52  ;;  %v3190_v8 = vmax.f32 %v7664_v36, %v3126_v14  ;;  %v3129_v10 = vmul.f32 0.01, %v7670_v41  ;;  %v8675_v52 = vld [vmem:[#allocation40_spill] sm:$0xff] }
 0x60c   :  { %v7842_v63 = vpack.c.bf16 %v3188_v4, %v3186_v30  ;;  %v3192_v32 = vmax.f32 %v7667_v42, %v3128_v56  ;;  %v3191_v34 = vmax.f32 %v3063_v47, %v3127_v49  ;;  %v3130_v9 = vmul.f32 0.01, %v7673_v58 }
 0x60d   :  { %v3131_v61 = vmul.f32 0.01, %v3067_v25  ;;  %v3132_v1 = vmul.f32 0.01, %v7676_v57  ;;  %v3193_v46 = vmax.f32 %v7670_v41, %v3129_v10  ;;  %v3071_v20 = vadd.f32 %v7545_v54, %v8674_v44 }
 0x60e   :  { %v7849_v0 = vpack.c.bf16 %v3192_v32, %v3190_v8  ;;  %v3133_v30 = vmul.f32 0.01, %v7679_v38  ;;  %v7855_v36 = vpack.c.bf16 %v3191_v34, %v3189_v31  ;;  %v3194_v62 = vmax.f32 %v7673_v58, %v3130_v9 }
 0x60f   :  { %v3195_v42 = vmax.f32 %v3067_v25, %v3131_v61  ;;  %v3196_v47 = vmax.f32 %v7676_v57, %v3132_v1  ;;  %v3135_v18 = vmul.f32 0.01, %v3071_v20  ;;  %v3134_v14 = vmul.f32 0.01, %v7682_v53 }
 0x610   :  { %v3197_v4 = vmax.f32 %v7679_v38, %v3133_v30  ;;  %v3136_v56 = vmul.f32 0.01, %v7685_v5  ;;  %v3075_v31 = vadd.f32 %v7545_v54, %v8675_v52  ;;  %v3137_v25 = vmul.f32 0.01, %v7688_v2 }
 0x611   :  { %v7862_v41 = vpack.c.bf16 %v3195_v42, %v3193_v46  ;;  %v7864_v49 = vpack.c.bf16 %v3196_v47, %v3194_v62  ;;  %v3199_v58 = vmax.f32 %v3071_v20, %v3135_v18  ;;  %v3198_v57 = vmax.f32 %v7682_v53, %v3134_v14 }
 0x612   :  { %v3200_v8 = vmax.f32 %v7685_v5, %v3136_v56  ;;  %v3138_v38 = vmul.f32 0.01, %v7691_v28  ;;  %v3139_v32 = vmul.f32 0.01, %v3075_v31  ;;  %v3201_v10 = vmax.f32 %v7688_v2, %v3137_v25 }
 0x613   :  { %v3140_v34 = vmul.f32 0.01, %v7694_v60  ;;  %v3079_v61 = vadd.f32 %v7545_v54, %v7771_v35  ;;  %v7876_v9 = vpack.c.bf16 %v3199_v58, %v3197_v4  ;;  %v3141_v53 = vmul.f32 0.01, %v7697_v45 }
 0x614   :  { %v7878_v1 = vpack.c.bf16 %v3200_v8, %v3198_v57  ;;  %v3203_v5 = vmax.f32 %v3075_v31, %v3139_v32  ;;  %v3142_v44 = vmul.f32 0.01, %v7700_v40  ;;  %v3144_v20 = vmul.f32 0.01, %v7703_v13 }
 0x615   :  { %3374 = vmatmul.bf16.gmra.mxu2 %v3235_v15  ;;  %v3202_v15 = vmax.f32 %v7691_v28, %v3138_v38  ;;  %v3204_v46 = vmax.f32 %v7694_v60, %v3140_v34  ;;  %v3205_v2 = vmax.f32 %v7697_v45, %v3141_v53  ;;  %v3083_v35 = vadd.f32 %v7545_v54, %v7778_v39 }
 0x616   :  { %3463 = vmatmul.bf16.gmra.mxu3 %v3236_v22  ;;  %v3143_v22 = vmul.f32 0.01, %v3079_v61  ;;  %v3145_v30 = vmul.f32 0.01, %v7706_v55  ;;  %v7889_v42 = vpack.c.bf16 %v3203_v5, %v3201_v10  ;;  %v3206_v47 = vmax.f32 %v7700_v40, %v3142_v44 }
 0x617   :  { %v7891_v28 = vpack.c.bf16 %v3204_v46, %v3202_v15  ;;  %v3208_v60 = vmax.f32 %v7703_v13, %v3144_v20  ;;  %v3147_v18 = vmul.f32 0.01, %v3083_v35  ;;  %v3146_v45 = vmul.f32 0.01, %v7709_v23 }
 0x618   :  { %v3207_v62 = vmax.f32 %v3079_v61, %v3143_v22  ;;  %v3209_v4 = vmax.f32 %v7706_v55, %v3145_v30  ;;  %v3148_v39 = vmul.f32 0.01, %v7712_v6  ;;  %v3087_v56 = vadd.f32 %v7545_v54, %v7782_v48 }
 0x619   :  { %v3149_v52 = vmul.f32 0.01, %v7715_v24  ;;  %v7903_v31 = vpack.c.bf16 %v3208_v60, %v3206_v47  ;;  %v3211_v25 = vmax.f32 %v3083_v35, %v3147_v18  ;;  %v3210_v40 = vmax.f32 %v7709_v23, %v3146_v45  ;;  %v8676_v35 = vld [vmem:[#allocation20_spill] sm:$0xff] }
 0x61a   :  { %v7897_v14 = vpack.c.bf16 %v3207_v62, %v3205_v2  ;;  %v3150_v13 = vmul.f32 0.01, %v7718_v29  ;;  %v3212_v55 = vmax.f32 %v7712_v6, %v3148_v39  ;;  %v3151_v58 = vmul.f32 0.01, %v3087_v56  ;;  %v8677_v62 = vld [vmem:[#allocation10_spill] sm:$0xff]  ;;  %v8678_v39 = vld [vmem:[#allocation43_spill] sm:$0xff] }
 0x61b   :  { %v3213_v57 = vmax.f32 %v7715_v24, %v3149_v52  ;;  %v3152_v8 = vmul.f32 0.01, %v7721_v11  ;;  %v7910_v38 = vpack.c.bf16 %v3211_v25, %v3209_v4  ;;  %v3091_v32 = vadd.f32 %v7545_v54, %v7788_v51  ;;  %v8679_v52 = vld [vmem:[#allocation15_spill] sm:$0xff] }
 0x61c   :  { %v3214_v48 = vmax.f32 %v7718_v29, %v3150_v13  ;;  %v3153_v10 = vmul.f32 0.01, %v7724_v50  ;;  %v7916_v34 = vpack.c.bf16 %v3212_v55, %v3210_v40  ;;  %v3215_v23 = vmax.f32 %v3087_v56, %v3151_v58  ;;  %v8680_v40 = vld [vmem:[#allocation21_spill] sm:$0xff]  ;;  %v8681_v13 = vld [vmem:[#allocation6_spill] sm:$0xff] }
 0x61d   :  { %v3216_v61 = vmax.f32 %v7721_v11, %v3152_v8  ;;  %v3154_v6 = vmul.f32 0.01, %v7727_v43  ;;  %v3155_v15 = vmul.f32 0.01, %v3091_v32  ;;  %v3156_v53 = vmul.f32 0.01, %v7730_v3 }
 0x61e   :  { %v3217_v24 = vmax.f32 %v7724_v50, %v3153_v10  ;;  %v3095_v29 = vadd.f32 %v7545_v54, %v7797_v27  ;;  %v7924_v5 = vpack.c.bf16 %v3215_v23, %v3213_v57  ;;  %v3157_v22 = vmul.f32 0.01, %v7733_v59  ;;  %v8682_v8 = vld [vmem:[#allocation16_spill] sm:$0xff] }
 0x61f   :  { %v7926_v51 = vpack.c.bf16 %v3216_v61, %v3214_v48  ;;  %v3218_v46 = vmax.f32 %v7727_v43, %v3154_v6  ;;  %v3219_v44 = vmax.f32 %v3091_v32, %v3155_v15  ;;  %v3220_v11 = vmax.f32 %v7730_v3, %v3156_v53  ;;  %v8683_v61 = vld [vmem:[#allocation24_spill] sm:$0xff] }
 0x620   :  { %v3159_v2 = vmul.f32 0.01, %v3095_v29  ;;  %v3158_v20 = vmul.f32 0.01, %v7736_v16  ;;  %v3221_v50 = vmax.f32 %v7733_v59, %v3157_v22  ;;  %v3160_v30 = vmul.f32 0.01, %v8676_v35 }
 0x621   :  { %v3099_v27 = vadd.f32 %v7545_v54, %v7801_v33  ;;  %v3161_v47 = vmul.f32 0.01, %v8677_v62  ;;  %v7938_v43 = vpack.c.bf16 %v3219_v44, %v3217_v24  ;;  %v7940_v60 = vpack.c.bf16 %v3220_v11, %v3218_v46  ;;  %v4277_v59 = vld [vmem:[%s8183_s2 + $0x90] sm:$0xff] }
 0x622   :  { %v3223_v18 = vmax.f32 %v3095_v29, %v3159_v2  ;;  %v3222_v3 = vmax.f32 %v7736_v16, %v3158_v20  ;;  %v3224_v4 = vmax.f32 %v8676_v35, %v3160_v30  ;;  %v3164_v25 = vmul.f32 0.01, %v8679_v52  ;;  %3672 = vmatpush.bf16.msrb.mxu0 %v4277_v59  ;;  %4291 = vmatpush.bf16.msra.mxu2 %v4277_v59 }
 0x623   :  { %v3163_v33 = vmul.f32 0.01, %v3099_v27  ;;  %v3225_v45 = vmax.f32 %v8677_v62, %v3161_v47  ;;  %v3103_v16 = vadd.f32 %v7545_v54, %v8680_v40  ;;  %v3166_v48 = vmul.f32 0.01, %v8682_v8 }
 0x624   :  { %v7950_v56 = vpack.c.bf16 %v3223_v18, %v3221_v50  ;;  %v7956_v55 = vpack.c.bf16 %v3224_v4, %v3222_v3  ;;  %v3228_v32 = vmax.f32 %v8679_v52, %v3164_v25  ;;  %v3168_v6 = vmul.f32 0.01, %v8683_v61  ;;  %v4276_v18 = vld [vmem:[%s8183_s2 + $0x88] sm:$0xff] }
 0x625   :  { %3379 = vmatmul.bf16.gmra.mxu2 %v7820_v7  ;;  %v3162_v7 = vmul.f32 0.01, %v8678_v39  ;;  %v3227_v58 = vmax.f32 %v3099_v27, %v3163_v33  ;;  %v3167_v10 = vmul.f32 0.01, %v3103_v16  ;;  %v3117_v54 = vmul.f32 0.01, %v7806_v26 }
 0x626   :  { %3468 = vmatmul.bf16.gmra.mxu3 %v7832_v37  ;;  %v3165_v37 = vmul.f32 0.01, %v8681_v13  ;;  %v3230_v24 = vmax.f32 %v8682_v8, %v3166_v48  ;;  %v3119_v53 = vmul.f32 0.01, %v7816_v21  ;;  %v3232_v22 = vmax.f32 %v8683_v61, %v3168_v6  ;;  %3673 = vmatpush.bf16.msrb.mxu0 %v4276_v18 }
 0x627   :  { %v3226_v57 = vmax.f32 %v8678_v39, %v3162_v7  ;;  %v7964_v15 = vpack.c.bf16 %v3227_v58, %v3225_v45  ;;  %v3231_v46 = vmax.f32 %v3103_v16, %v3167_v10  ;;  %v3118_v44 = vmul.f32 0.01, %v7810_v12  ;;  %4292 = vmatpush.bf16.msra.mxu2 %v4276_v18 }
 0x628   :  { %v3229_v23 = vmax.f32 %v8681_v13, %v3165_v37  ;;  %v3120_v11 = vmul.f32 0.01, %v7824_v17  ;;  %v7975_v20 = vpack.c.bf16 %v3232_v22, %v3230_v24  ;;  %v3181_v50 = vmax.f32 %v7806_v26, %v3117_v54  ;;  %v4275_v26 = vld [vmem:[%s8183_s2 + $0x80] sm:$0xff] }
 0x629   :  { %v7968_v29 = vpack.c.bf16 %v3228_v32, %v3226_v57  ;;  %v3183_v35 = vmax.f32 %v7816_v21, %v3119_v53  ;;  %v3182_v30 = vmax.f32 %v7810_v12, %v3118_v44  ;;  %v8000_v12 = vld [vmem:[%s8184_s3 + $0x11] ss:$0 sm:$0xff] }
 0x62a   :  { %v7973_v2 = vpack.c.bf16 %v3231_v46, %v3229_v23  ;;  %v3184_v27 = vmax.f32 %v7824_v17, %v3120_v11  ;;  %3674 = vmatpush.bf16.msrb.mxu0 %v4275_v26 }
 0x62b   :  { %v3239_v62 = vpack.c.bf16 %v3183_v35, %v3181_v50  ;;  %4293 = vmatpush.bf16.msra.mxu2 %v4275_v26 }
 0x62c   :  { %v3240_v47 = vpack.c.bf16 %v3184_v27, %v3182_v30 }
 0x635   :  { %3384 = vmatmul.bf16.gmra.mxu2 %v3239_v62 }
 0x636   :  { %3473 = vmatmul.bf16.gmra.mxu3 %v3240_v47 }
 0x645   :  { %3389 = vmatmul.bf16.gmra.mxu2 %v7837_v19 }
 0x646   :  { %3478 = vmatmul.bf16.gmra.mxu3 %v7842_v63 }
 0x655   :  { %3394 = vmatmul.bf16.gmra.mxu2 %v7855_v36 }
 0x656   :  { %3483 = vmatmul.bf16.gmra.mxu3 %v7849_v0 }
 0x665   :  { %3399 = vmatmul.bf16.gmra.mxu2 %v7862_v41 }
 0x666   :  { %3488 = vmatmul.bf16.gmra.mxu3 %v7864_v49 }
 0x675   :  { %3404 = vmatmul.bf16.gmra.mxu2 %v7876_v9 }
 0x676   :  { %3493 = vmatmul.bf16.gmra.mxu3 %v7878_v1 }
 0x685   :  { %3409 = vmatmul.bf16.gmra.mxu2 %v7889_v42 }
 0x686   :  { %3498 = vmatmul.bf16.gmra.mxu3 %v7891_v28 }
 0x688   :  { %v3370_v21 = vpop.f32.mrf.mxu2 }
 0x689   :  { %v3459_v17 = vpop.f32.mrf.mxu3  ;;  %v3371_v19 = vadd.f32 %v3370_v21, %v8000_v12 }
 0x68b   :  { %v3460_v63 = vadd.f32 %v3459_v17, %v3371_v19 }
 0x68d   :  { %v3539_v49 = vmul.f32 0.01, %v3460_v63 }
 0x68f   :  { %v3571_v42 = vmax.f32 %v3460_v63, %v3539_v49 }
 0x690   :  { %v3372_v0 = vpop.f32.mrf.mxu2 }
 0x691   :  { %v3373_v36 = vadd.f32 %v3372_v0, %v8000_v12  ;;  %v3461_v41 = vpop.f32.mrf.mxu3 }
 0x693   :  { %v3462_v9 = vadd.f32 %v3461_v41, %v3373_v36 }
 0x695   :  { %v3540_v1 = vmul.f32 0.01, %v3462_v9  ;;  %3414 = vmatmul.bf16.gmra.mxu2 %v7897_v14 }
 0x696   :  { %3503 = vmatmul.bf16.gmra.mxu3 %v7903_v31 }
 0x697   :  { %v3572_v28 = vmax.f32 %v3462_v9, %v3540_v1 }
 0x698   :  { %v3375_v3 = vpop.f32.mrf.mxu2 }
 0x699   :  { %v3603_v59 = vpack.c.bf16 %v3572_v28, %v3571_v42  ;;  %v3464_v4 = vpop.f32.mrf.mxu3  ;;  %v3376_v33 = vadd.f32 %v3375_v3, %v8000_v12 }
 0x69b   :  { %3675 = vmatmul.bf16.vlgmr.msrb.gmra.mxu0 %v3603_v59  ;;  %v3465_v45 = vadd.f32 %v3464_v4, %v3376_v33 }
 0x69d   :  { %v3541_v25 = vmul.f32 0.01, %v3465_v45 }
 0x69f   :  { %v3573_v14 = vmax.f32 %v3465_v45, %v3541_v25 }
 0x6a0   :  { %v3377_v39 = vpop.f32.mrf.mxu2 }
 0x6a1   :  { %v3378_v7 = vadd.f32 %v3377_v39, %v8000_v12  ;;  %v3466_v52 = vpop.f32.mrf.mxu3 }
 0x6a3   :  { %v3467_v40 = vadd.f32 %v3466_v52, %v3378_v7 }
 0x6a5   :  { %v3542_v16 = vmul.f32 0.01, %v3467_v40  ;;  %3419 = vmatmul.bf16.gmra.mxu2 %v7910_v38 }
 0x6a6   :  { %3508 = vmatmul.bf16.gmra.mxu3 %v7916_v34 }
 0x6a7   :  { %v3574_v31 = vmax.f32 %v3467_v40, %v3542_v16 }
 0x6a8   :  { %v3380_v13 = vpop.f32.mrf.mxu2 }
 0x6a9   :  { %v3469_v37 = vpop.f32.mrf.mxu3  ;;  %v3604_v58 = vpack.c.bf16 %v3574_v31, %v3573_v14  ;;  %v3381_v57 = vadd.f32 %v3380_v13, %v8000_v12 }
 0x6ab   :  { %3680 = vmatmul.bf16.gmra.mxu0 %v3604_v58  ;;  %v3470_v8 = vadd.f32 %v3469_v37, %v3381_v57 }
 0x6ad   :  { %v3543_v23 = vmul.f32 0.01, %v3470_v8 }
 0x6af   :  { %v3575_v38 = vmax.f32 %v3470_v8, %v3543_v23 }
 0x6b0   :  { %v3382_v48 = vpop.f32.mrf.mxu2 }
 0x6b1   :  { %v3383_v32 = vadd.f32 %v3382_v48, %v8000_v12  ;;  %v3471_v10 = vpop.f32.mrf.mxu3 }
 0x6b3   :  { %v3472_v61 = vadd.f32 %v3471_v10, %v3383_v32 }
 0x6b5   :  { %v3544_v6 = vmul.f32 0.01, %v3472_v61  ;;  %3424 = vmatmul.bf16.gmra.mxu2 %v7924_v5 }
 0x6b6   :  { %3513 = vmatmul.bf16.gmra.mxu3 %v7926_v51 }
 0x6b7   :  { %v3576_v34 = vmax.f32 %v3472_v61, %v3544_v6 }
 0x6b8   :  { %v3385_v54 = vpop.f32.mrf.mxu2 }
 0x6b9   :  { %v3474_v24 = vpop.f32.mrf.mxu3  ;;  %v3605_v53 = vpack.c.bf16 %v3576_v34, %v3575_v38  ;;  %v3386_v46 = vadd.f32 %v3385_v54, %v8000_v12 }
 0x6bb   :  { %3685 = vmatmul.bf16.gmra.mxu0 %v3605_v53  ;;  %v3475_v22 = vadd.f32 %v3474_v24, %v3386_v46 }
 0x6bd   :  { %v3545_v35 = vmul.f32 0.01, %v3475_v22 }
 0x6bf   :  { %v3577_v5 = vmax.f32 %v3475_v22, %v3545_v35 }
 0x6c0   :  { %v3387_v44 = vpop.f32.mrf.mxu2 }
 0x6c1   :  { %v3388_v11 = vadd.f32 %v3387_v44, %v8000_v12  ;;  %v3476_v50 = vpop.f32.mrf.mxu3 }
 0x6c3   :  { %v3477_v30 = vadd.f32 %v3476_v50, %v3388_v11 }
 0x6c5   :  { %v3546_v27 = vmul.f32 0.01, %v3477_v30  ;;  %3429 = vmatmul.bf16.gmra.mxu2 %v7938_v43 }
 0x6c6   :  { %3518 = vmatmul.bf16.gmra.mxu3 %v7940_v60 }
 0x6c7   :  { %v3578_v51 = vmax.f32 %v3477_v30, %v3546_v27 }
 0x6c8   :  { %v3390_v62 = vpop.f32.mrf.mxu2 }
 0x6c9   :  { %v3479_v47 = vpop.f32.mrf.mxu3  ;;  %v3606_v18 = vpack.c.bf16 %v3578_v51, %v3577_v5  ;;  %v3391_v26 = vadd.f32 %v3390_v62, %v8000_v12  ;;  %v8037_v62 = vld [vmem:[%s8184_s3 + $0x12] ss:$0 sm:$0xff] }
 0x6cb   :  { %3690 = vmatmul.bf16.gmra.mxu0 %v3606_v18  ;;  %v3480_v21 = vadd.f32 %v3479_v47, %v3391_v26 }
 0x6cd   :  { %v3547_v0 = vmul.f32 0.01, %v3480_v21 }
 0x6cf   :  { %v3579_v43 = vmax.f32 %v3480_v21, %v3547_v0 }
 0x6d0   :  { %v3392_v17 = vpop.f32.mrf.mxu2 }
 0x6d1   :  { %v3393_v19 = vadd.f32 %v3392_v17, %v8000_v12  ;;  %v3481_v63 = vpop.f32.mrf.mxu3 }
 0x6d3   :  { %v3482_v36 = vadd.f32 %v3481_v63, %v3393_v19 }
 0x6d5   :  { %v3548_v41 = vmul.f32 0.01, %v3482_v36  ;;  %3434 = vmatmul.bf16.gmra.mxu2 %v7950_v56 }
 0x6d6   :  { %3523 = vmatmul.bf16.gmra.mxu3 %v7956_v55 }
 0x6d7   :  { %v3580_v60 = vmax.f32 %v3482_v36, %v3548_v41 }
 0x6d8   :  { %v3395_v49 = vpop.f32.mrf.mxu2 }
 0x6d9   :  { %v3484_v9 = vpop.f32.mrf.mxu3  ;;  %v3607_v1 = vpack.c.bf16 %v3580_v60, %v3579_v43  ;;  %v3396_v42 = vadd.f32 %v3395_v49, %v8000_v12 }
 0x6db   :  { %3695 = vmatmul.bf16.gmra.mxu0 %v3607_v1  ;;  %v3485_v28 = vadd.f32 %v3484_v9, %v3396_v42 }
 0x6dd   :  { %v3549_v33 = vmul.f32 0.01, %v3485_v28 }
 0x6df   :  { %v3581_v56 = vmax.f32 %v3485_v28, %v3549_v33 }
 0x6e0   :  { %v3397_v3 = vpop.f32.mrf.mxu2 }
 0x6e1   :  { %v3398_v59 = vadd.f32 %v3397_v3, %v8000_v12  ;;  %v3486_v4 = vpop.f32.mrf.mxu3 }
 0x6e3   :  { %v3487_v45 = vadd.f32 %v3486_v4, %v3398_v59 }
 0x6e5   :  { %v3550_v39 = vmul.f32 0.01, %v3487_v45  ;;  %3439 = vmatmul.bf16.gmra.mxu2 %v7964_v15 }
 0x6e6   :  { %3528 = vmatmul.bf16.gmra.mxu3 %v7968_v29 }
 0x6e7   :  { %v3582_v55 = vmax.f32 %v3487_v45, %v3550_v39 }
 0x6e8   :  { %v3400_v7 = vpop.f32.mrf.mxu2 }
 0x6e9   :  { %v3489_v52 = vpop.f32.mrf.mxu3  ;;  %v3608_v25 = vpack.c.bf16 %v3582_v55, %v3581_v56  ;;  %v3401_v40 = vadd.f32 %v3400_v7, %v8000_v12 }
 0x6eb   :  { %3700 = vmatmul.bf16.gmra.mxu0 %v3608_v25  ;;  %v3490_v16 = vadd.f32 %v3489_v52, %v3401_v40 }
 0x6ed   :  { %v3551_v37 = vmul.f32 0.01, %v3490_v16 }
 0x6ef   :  { %v3583_v15 = vmax.f32 %v3490_v16, %v3551_v37 }
 0x6f0   :  { %v3402_v14 = vpop.f32.mrf.mxu2 }
 0x6f1   :  { %v3403_v31 = vadd.f32 %v3402_v14, %v8000_v12  ;;  %v3491_v13 = vpop.f32.mrf.mxu3 }
 0x6f3   :  { %v3492_v58 = vadd.f32 %v3491_v13, %v3403_v31 }
 0x6f5   :  { %v3552_v57 = vmul.f32 0.01, %v3492_v58  ;;  %3444 = vmatmul.bf16.gmra.mxu2 %v7973_v2 }
 0x6f6   :  { %3533 = vmatmul.bf16.gmra.mxu3 %v7975_v20 }
 0x6f7   :  { %v3584_v29 = vmax.f32 %v3492_v58, %v3552_v57 }
 0x6f8   :  { %v3405_v8 = vpop.f32.mrf.mxu2 }
 0x6f9   :  { %v3494_v48 = vpop.f32.mrf.mxu3  ;;  %v3609_v32 = vpack.c.bf16 %v3584_v29, %v3583_v15  ;;  %v3406_v10 = vadd.f32 %v3405_v8, %v8000_v12 }
 0x6fb   :  { %3705 = vmatmul.bf16.gmra.mxu0 %v3609_v32  ;;  %v3495_v23 = vadd.f32 %v3494_v48, %v3406_v10 }
 0x6fd   :  { %v3553_v34 = vmul.f32 0.01, %v3495_v23 }
 0x6ff   :  { %v3585_v53 = vmax.f32 %v3495_v23, %v3553_v34 }
 0x700   :  { %v3407_v61 = vpop.f32.mrf.mxu2 }
 0x701   :  { %v3408_v6 = vadd.f32 %v3407_v61, %v8000_v12  ;;  %v3496_v38 = vpop.f32.mrf.mxu3 }
 0x703   :  { %v3497_v54 = vadd.f32 %v3496_v38, %v3408_v6 }
 0x705   :  { %v3554_v24 = vmul.f32 0.01, %v3497_v54 }
 0x707   :  { %v3586_v2 = vmax.f32 %v3497_v54, %v3554_v24 }
 0x708   :  { %v3410_v46 = vpop.f32.mrf.mxu2 }
 0x709   :  { %v3499_v20 = vpop.f32.mrf.mxu3  ;;  %v3610_v22 = vpack.c.bf16 %v3586_v2, %v3585_v53  ;;  %v3411_v44 = vadd.f32 %v3410_v46, %v8000_v12 }
 0x70b   :  { %3710 = vmatmul.bf16.gmra.mxu0 %v3610_v22  ;;  %v3500_v11 = vadd.f32 %v3499_v20, %v3411_v44 }
 0x70d   :  { %v3555_v27 = vmul.f32 0.01, %v3500_v11 }
 0x70f   :  { %v3587_v47 = vmax.f32 %v3500_v11, %v3555_v27 }
 0x710   :  { %v3412_v50 = vpop.f32.mrf.mxu2 }
 0x711   :  { %v3413_v35 = vadd.f32 %v3412_v50, %v8000_v12  ;;  %v3501_v30 = vpop.f32.mrf.mxu3 }
 0x713   :  { %v3502_v5 = vadd.f32 %v3501_v30, %v3413_v35 }
 0x715   :  { %v3556_v51 = vmul.f32 0.01, %v3502_v5 }
 0x717   :  { %v3588_v18 = vmax.f32 %v3502_v5, %v3556_v51 }
 0x718   :  { %v3415_v26 = vpop.f32.mrf.mxu2  ;;  %v3676_v21 = vpop.f32.mrf.mxu0 }
 0x719   :  { %v3504_v17 = vpop.f32.mrf.mxu3  ;;  %v3677_v19 = vadd.f32 %v3676_v21, %v8037_v62  ;;  %v3611_v63 = vpack.c.bf16 %v3588_v18, %v3587_v47  ;;  %v3416_v0 = vadd.f32 %v3415_v26, %v8000_v12 }
 0x71b   :  { %3756 = vst [vmem:[%s8185_s4] sm:$0xff] %v3677_v19  ;;  %3715 = vmatmul.bf16.gmra.mxu0 %v3611_v63  ;;  %v3505_v36 = vadd.f32 %v3504_v17, %v3416_v0 }
 0x71d   :  { %v3557_v1 = vmul.f32 0.01, %v3505_v36 }
 0x71f   :  { %v3589_v3 = vmax.f32 %v3505_v36, %v3557_v1 }
 0x720   :  { %v3417_v41 = vpop.f32.mrf.mxu2  ;;  %v3678_v43 = vpop.f32.mrf.mxu0 }
 0x721   :  { %v3418_v60 = vadd.f32 %v3417_v41, %v8000_v12  ;;  %v3506_v49 = vpop.f32.mrf.mxu3  ;;  %v3679_v9 = vadd.f32 %v3678_v43, %v8037_v62 }
 0x723   :  { %v3507_v42 = vadd.f32 %v3506_v49, %v3418_v60  ;;  %3757 = vst [vmem:[%s8185_s4 + $0x8] sm:$0xff] %v3679_v9 }
 0x725   :  { %v3558_v28 = vmul.f32 0.01, %v3507_v42 }
 0x727   :  { %v3590_v59 = vmax.f32 %v3507_v42, %v3558_v28 }
 0x728   :  { %v3420_v4 = vpop.f32.mrf.mxu2  ;;  %v3681_v33 = vpop.f32.mrf.mxu0 }
 0x729   :  { %v3509_v45 = vpop.f32.mrf.mxu3  ;;  %v3682_v39 = vadd.f32 %v3681_v33, %v8037_v62  ;;  %v3612_v56 = vpack.c.bf16 %v3590_v59, %v3589_v3  ;;  %v3421_v55 = vadd.f32 %v3420_v4, %v8000_v12 }
 0x72b   :  { %3758 = vst [vmem:[%s8185_s4 + $0x10] sm:$0xff] %v3682_v39  ;;  %3720 = vmatmul.bf16.gmra.mxu0 %v3612_v56  ;;  %v3510_v7 = vadd.f32 %v3509_v45, %v3421_v55 }
 0x72d   :  { %v3559_v31 = vmul.f32 0.01, %v3510_v7 }
 0x72f   :  { %v3591_v58 = vmax.f32 %v3510_v7, %v3559_v31 }
 0x730   :  { %v3422_v52 = vpop.f32.mrf.mxu2  ;;  %v3683_v25 = vpop.f32.mrf.mxu0 }
 0x731   :  { %v3423_v40 = vadd.f32 %v3422_v52, %v8000_v12  ;;  %v3511_v16 = vpop.f32.mrf.mxu3  ;;  %v3684_v14 = vadd.f32 %v3683_v25, %v8037_v62 }
 0x733   :  { %v3512_v13 = vadd.f32 %v3511_v16, %v3423_v40  ;;  %3759 = vst [vmem:[%s8185_s4 + $0x18] sm:$0xff] %v3684_v14 }
 0x735   :  { %v3560_v37 = vmul.f32 0.01, %v3512_v13 }
 0x737   :  { %v3592_v57 = vmax.f32 %v3512_v13, %v3560_v37 }
 0x738   :  { %v3425_v15 = vpop.f32.mrf.mxu2  ;;  %v3686_v29 = vpop.f32.mrf.mxu0 }
 0x739   :  { %v3514_v8 = vpop.f32.mrf.mxu3  ;;  %v3687_v48 = vadd.f32 %v3686_v29, %v8037_v62  ;;  %v3613_v32 = vpack.c.bf16 %v3592_v57, %v3591_v58  ;;  %v3426_v10 = vadd.f32 %v3425_v15, %v8000_v12 }
 0x73b   :  { %3760 = vst [vmem:[%s8185_s4 + $0x20] sm:$0xff] %v3687_v48  ;;  %3725 = vmatmul.bf16.gmra.mxu0 %v3613_v32  ;;  %v3515_v23 = vadd.f32 %v3514_v8, %v3426_v10 }
 0x73d   :  { %v3561_v24 = vmul.f32 0.01, %v3515_v23 }
 0x73f   :  { %v3593_v46 = vmax.f32 %v3515_v23, %v3561_v24 }
 0x740   :  { %v3427_v61 = vpop.f32.mrf.mxu2  ;;  %v3688_v6 = vpop.f32.mrf.mxu0 }
 0x741   :  { %v3428_v38 = vadd.f32 %v3427_v61, %v8000_v12  ;;  %v3516_v34 = vpop.f32.mrf.mxu3  ;;  %v3689_v54 = vadd.f32 %v3688_v6, %v8037_v62 }
 0x743   :  { %v3517_v53 = vadd.f32 %v3516_v34, %v3428_v38  ;;  %3761 = vst [vmem:[%s8185_s4 + $0x28] sm:$0xff] %v3689_v54 }
 0x745   :  { %v3562_v2 = vmul.f32 0.01, %v3517_v53 }
 0x747   :  { %v3594_v20 = vmax.f32 %v3517_v53, %v3562_v2 }
 0x748   :  { %v3430_v22 = vpop.f32.mrf.mxu2  ;;  %v3691_v44 = vpop.f32.mrf.mxu0 }
 0x749   :  { %v3519_v11 = vpop.f32.mrf.mxu3  ;;  %v3692_v50 = vadd.f32 %v3691_v44, %v8037_v62  ;;  %v3614_v35 = vpack.c.bf16 %v3594_v20, %v3593_v46  ;;  %v3431_v30 = vadd.f32 %v3430_v22, %v8000_v12 }
 0x74b   :  { %3762 = vst [vmem:[%s8185_s4 + $0x30] sm:$0xff] %v3692_v50  ;;  %3730 = vmatmul.bf16.gmra.mxu0 %v3614_v35  ;;  %v3520_v27 = vadd.f32 %v3519_v11, %v3431_v30 }
 0x74d   :  { %v3563_v21 = vmul.f32 0.01, %v3520_v27 }
 0x74f   :  { %v3595_v63 = vmax.f32 %v3520_v27, %v3563_v21 }
 0x750   :  { %v3432_v5 = vpop.f32.mrf.mxu2  ;;  %v3693_v51 = vpop.f32.mrf.mxu0 }
 0x751   :  { %v3433_v47 = vadd.f32 %v3432_v5, %v8000_v12  ;;  %v3521_v18 = vpop.f32.mrf.mxu3  ;;  %v3694_v26 = vadd.f32 %v3693_v51, %v8037_v62 }
 0x753   :  { %v3522_v17 = vadd.f32 %v3521_v18, %v3433_v47  ;;  %3763 = vst [vmem:[%s8185_s4 + $0x38] sm:$0xff] %v3694_v26 }
 0x755   :  { %v3564_v19 = vmul.f32 0.01, %v3522_v17 }
 0x757   :  { %v3596_v0 = vmax.f32 %v3522_v17, %v3564_v19 }
 0x758   :  { %v3435_v36 = vpop.f32.mrf.mxu2  ;;  %v3696_v41 = vpop.f32.mrf.mxu0 }
 0x759   :  { %v3524_v43 = vpop.f32.mrf.mxu3  ;;  %v3697_v60 = vadd.f32 %v3696_v41, %v8037_v62  ;;  %v3615_v49 = vpack.c.bf16 %v3596_v0, %v3595_v63  ;;  %v3436_v9 = vadd.f32 %v3435_v36, %v8000_v12 }
 0x75b   :  { %3764 = vst [vmem:[%s8185_s4 + $0x40] sm:$0xff] %v3697_v60  ;;  %3735 = vmatmul.bf16.gmra.mxu0 %v3615_v49  ;;  %v3525_v1 = vadd.f32 %v3524_v43, %v3436_v9 }
 0x75d   :  { %v3565_v33 = vmul.f32 0.01, %v3525_v1 }
 0x75f   :  { %v3597_v56 = vmax.f32 %v3525_v1, %v3565_v33 }
 0x760   :  { %v3437_v42 = vpop.f32.mrf.mxu2  ;;  %v3698_v28 = vpop.f32.mrf.mxu0 }
 0x761   :  { %v3438_v3 = vadd.f32 %v3437_v42, %v8000_v12  ;;  %v3526_v59 = vpop.f32.mrf.mxu3  ;;  %v3699_v4 = vadd.f32 %v3698_v28, %v8037_v62 }
 0x763   :  { %v3527_v45 = vadd.f32 %v3526_v59, %v3438_v3  ;;  %3765 = vst [vmem:[%s8185_s4 + $0x48] sm:$0xff] %v3699_v4 }
 0x765   :  { %v3566_v39 = vmul.f32 0.01, %v3527_v45 }
 0x767   :  { %v3598_v55 = vmax.f32 %v3527_v45, %v3566_v39 }
 0x768   :  { %v3440_v7 = vpop.f32.mrf.mxu2  ;;  %v3701_v52 = vpop.f32.mrf.mxu0 }
 0x769   :  { %v3529_v25 = vpop.f32.mrf.mxu3  ;;  %v3702_v40 = vadd.f32 %v3701_v52, %v8037_v62  ;;  %v3616_v16 = vpack.c.bf16 %v3598_v55, %v3597_v56  ;;  %v3441_v14 = vadd.f32 %v3440_v7, %v8000_v12 }
 0x76b   :  { %3766 = vst [vmem:[%s8185_s4 + $0x50] sm:$0xff] %v3702_v40  ;;  %3740 = vmatmul.bf16.gmra.mxu0 %v3616_v16  ;;  %v3530_v31 = vadd.f32 %v3529_v25, %v3441_v14 }
 0x76d   :  { %v3567_v29 = vmul.f32 0.01, %v3530_v31 }
 0x76f   :  { %v3599_v32 = vmax.f32 %v3530_v31, %v3567_v29 }
 0x770   :  { %v3442_v13 = vpop.f32.mrf.mxu2  ;;  %v3703_v37 = vpop.f32.mrf.mxu0 }
 0x771   :  { %v3443_v58 = vadd.f32 %v3442_v13, %v8000_v12  ;;  %v3531_v57 = vpop.f32.mrf.mxu3  ;;  %v3704_v15 = vadd.f32 %v3703_v37, %v8037_v62 }
 0x773   :  { %v3532_v8 = vadd.f32 %v3531_v57, %v3443_v58  ;;  %3767 = vst [vmem:[%s8185_s4 + $0x58] sm:$0xff] %v3704_v15 }
 0x775   :  { %v3568_v48 = vmul.f32 0.01, %v3532_v8 }
 0x777   :  { %v3600_v10 = vmax.f32 %v3532_v8, %v3568_v48 }
 0x778   :  { %v3445_v23 = vpop.f32.mrf.mxu2  ;;  %v3706_v61 = vpop.f32.mrf.mxu0 }
 0x779   :  { %v3534_v6 = vpop.f32.mrf.mxu3  ;;  %v3707_v38 = vadd.f32 %v3706_v61, %v8037_v62  ;;  %v3617_v34 = vpack.c.bf16 %v3600_v10, %v3599_v32  ;;  %v3446_v54 = vadd.f32 %v3445_v23, %v8000_v12 }
 0x77b   :  { %3768 = vst [vmem:[%s8185_s4 + $0x60] sm:$0xff] %v3707_v38  ;;  %3745 = vmatmul.bf16.gmra.mxu0 %v3617_v34  ;;  %v3535_v24 = vadd.f32 %v3534_v6, %v3446_v54 }
 0x77d   :  { %v3569_v44 = vmul.f32 0.01, %v3535_v24 }
 0x77f   :  { %v3601_v35 = vmax.f32 %v3535_v24, %v3569_v44 }
 0x780   :  { %v3447_v53 = vpop.f32.mrf.mxu2  ;;  %v3708_v2 = vpop.f32.mrf.mxu0 }
 0x781   :  { %v3448_v46 = vadd.f32 %v3447_v53, %v8000_v12  ;;  %v3709_v20 = vadd.f32 %v3708_v2, %v8037_v62  ;;  %v3536_v22 = vpop.f32.mrf.mxu3 }
 0x783   :  { %v3537_v11 = vadd.f32 %v3536_v22, %v3448_v46  ;;  %3769 = vst [vmem:[%s8185_s4 + $0x68] sm:$0xff] %v3709_v20 }
 0x785   :  { %v3570_v50 = vmul.f32 0.01, %v3537_v11 }
 0x787   :  { %v3602_v30 = vmax.f32 %v3537_v11, %v3570_v50 }
 0x788   :  { %v3711_v27 = vpop.f32.mrf.mxu0 }
 0x789   :  { %v3618_v5 = vpack.c.bf16 %v3602_v30, %v3601_v35  ;;  %v3712_v51 = vadd.f32 %v3711_v27, %v8037_v62 }
 0x78b   :  { %3770 = vst [vmem:[%s8185_s4 + $0x70] sm:$0xff] %v3712_v51  ;;  %3750 = vmatmul.bf16.vlgmr.msra.gmra.mxu2 %v3618_v5 }
 0x790   :  { %v3713_v12 = vpop.f32.mrf.mxu0 }
 0x791   :  { %v3714_v47 = vadd.f32 %v3713_v12, %v8037_v62 }
 0x793   :  { %3771 = vst [vmem:[%s8185_s4 + $0x78] sm:$0xff] %v3714_v47 }
 0x798   :  { %v3716_v18 = vpop.f32.mrf.mxu0 }
 0x799   :  { %v3717_v26 = vadd.f32 %v3716_v18, %v8037_v62 }
 0x79b   :  { %3772 = vst [vmem:[%s8185_s4 + $0x80] sm:$0xff] %v3717_v26 }
 0x7a0   :  { %v3718_v21 = vpop.f32.mrf.mxu0 }
 0x7a1   :  { %v3719_v17 = vadd.f32 %v3718_v21, %v8037_v62 }
 0x7a3   :  { %3773 = vst [vmem:[%s8185_s4 + $0x88] sm:$0xff] %v3719_v17 }
 0x7a8   :  { %v3721_v19 = vpop.f32.mrf.mxu0 }
 0x7a9   :  { %v3722_v63 = vadd.f32 %v3721_v19, %v8037_v62 }
 0x7ab   :  { %3774 = vst [vmem:[%s8185_s4 + $0x90] sm:$0xff] %v3722_v63 }
 0x7b0   :  { %v3723_v0 = vpop.f32.mrf.mxu0 }
 0x7b1   :  { %v3724_v36 = vadd.f32 %v3723_v0, %v8037_v62 }
 0x7b3   :  { %3775 = vst [vmem:[%s8185_s4 + $0x98] sm:$0xff] %v3724_v36 }
 0x7b8   :  { %v3726_v41 = vpop.f32.mrf.mxu0 }
 0x7b9   :  { %v3727_v43 = vadd.f32 %v3726_v41, %v8037_v62 }
 0x7bb   :  { %3776 = vst [vmem:[%s8185_s4 + $0xa0] sm:$0xff] %v3727_v43 }
 0x7c0   :  { %v3728_v60 = vpop.f32.mrf.mxu0 }
 0x7c1   :  { %v3729_v49 = vadd.f32 %v3728_v60, %v8037_v62 }
 0x7c3   :  { %3777 = vst [vmem:[%s8185_s4 + $0xa8] sm:$0xff] %v3729_v49 }
 0x7c8   :  { %v3731_v9 = vpop.f32.mrf.mxu0 }
 0x7c9   :  { %v3732_v1 = vadd.f32 %v3731_v9, %v8037_v62 }
 0x7cb   :  { %3778 = vst [vmem:[%s8185_s4 + $0xb0] sm:$0xff] %v3732_v1 }
 0x7d0   :  { %v3733_v42 = vpop.f32.mrf.mxu0 }
 0x7d1   :  { %v3734_v28 = vadd.f32 %v3733_v42, %v8037_v62 }
 0x7d3   :  { %3779 = vst [vmem:[%s8185_s4 + $0xb8] sm:$0xff] %v3734_v28 }
 0x7d8   :  { %v3736_v3 = vpop.f32.mrf.mxu0 }
 0x7d9   :  { %v3737_v59 = vadd.f32 %v3736_v3, %v8037_v62 }
 0x7db   :  { %3780 = vst [vmem:[%s8185_s4 + $0xc0] sm:$0xff] %v3737_v59 }
 0x7e0   :  { %v3738_v4 = vpop.f32.mrf.mxu0 }
 0x7e1   :  { %v3739_v33 = vadd.f32 %v3738_v4, %v8037_v62 }
 0x7e3   :  { %3781 = vst [vmem:[%s8185_s4 + $0xc8] sm:$0xff] %v3739_v33 }
 0x7e8   :  { %v3741_v45 = vpop.f32.mrf.mxu0 }
 0x7e9   :  { %v3742_v39 = vadd.f32 %v3741_v45, %v8037_v62 }
 0x7eb   :  { %3782 = vst [vmem:[%s8185_s4 + $0xd0] sm:$0xff] %v3742_v39 }
 0x7f0   :  { %v3743_v56 = vpop.f32.mrf.mxu0 }
 0x7f1   :  { %v3744_v55 = vadd.f32 %v3743_v56, %v8037_v62 }
 0x7f3   :  { %3783 = vst [vmem:[%s8185_s4 + $0xd8] sm:$0xff] %v3744_v55 }
 0x7f8   :  { %v3746_v7 = vpop.f32.mrf.mxu0 }
 0x7f9   :  { %v3747_v52 = vadd.f32 %v3746_v7, %v8037_v62 }
 0x7fb   :  { %3784 = vst [vmem:[%s8185_s4 + $0xe0] sm:$0xff] %v3747_v52 }
 0x800   :  { %v3748_v25 = vpop.f32.mrf.mxu0 }
 0x801   :  { %v3749_v40 = vadd.f32 %v3748_v25, %v8037_v62 }
 0x803   :  { %3785 = vst [vmem:[%s8185_s4 + $0xe8] sm:$0xff] %v3749_v40 }
 0x80e   :  { %v3751_v16 = vpop.f32.mrf.mxu2 }
 0x80f   :  { %v3752_v14 = vadd.f32 %v3751_v16, %v8037_v62 }
 0x811   :  { %3786 = vst [vmem:[%s8185_s4 + $0xf0] sm:$0xff] %v3752_v14 }
 0x816   :  { %v3753_v31 = vpop.f32.mrf.mxu2 }
 0x817   :  { %v3754_v13 = vadd.f32 %v3753_v31, %v8037_v62 }
 0x819   :  { %3787 = vst [vmem:[%s8185_s4 + $0xf8] sm:$0xff] %v3754_v13 }
 0x81a   :  { %3792 = vsyncpa [#allocation4], 1 }

</bundles_post_ra>
